<compile_context>
chip_gen: v6e
topology: v6e:2x2x1
jax: 0.10.0
libtpu: 0.0.40
codegen_flags: <defaults>
</compile_context>

<pallas_src>
import functools

import jax
import jax.numpy as jnp
from jax.experimental import pallas as pl
from jax.experimental.pallas import tpu as pltpu


# ==========================================================================
# Fused forward kernel (gridless: everything fits VMEM with huge margin)
# ==========================================================================
def _fused_forward_kernel(
    # activations / boxes
    x0_ref,            # [H, N, W*C0] f32   roi pool, row-major layout (y, n, x*C0+c)
    rep_ref,           # [N, R]       f32
    ploc_ref,          # [N, 4]       f32   previous_loc (x1,y1,x2,y2)
    cloc_ref,          # [N, 4]       f32   curr_loc
    # appearance_conv: Toeplitz weights per kernel-row + width-tiled biases
    w1_ref, b1_ref,    # [3, 7*C0, 5*2C0] bf16 ; [1, 5*2C0] f32
    w2_ref, b2_ref,    # [3, 5*2C0, 3*2C0]     ; [1, 3*2C0]
    w3_ref, b3_ref,    # [3, 3*2C0, R]         ; [1, R]
    # appearance_fuse (weight split in place of the concat)
    fuse_wa_ref, fuse_wb_ref, fuse_b_ref,   # [R,R] bf16, [R,R] bf16, [1,R] f32
    # motion_repr (VPU path, f32)
    mrepr_w_ref, mrepr_b_ref,               # [4,M] f32, [1,M] f32
    # motion_regress
    reg1_wa_ref, reg1_wb_ref, reg1_b_ref,   # [R,R+M] bf16, [M,R+M] bf16, [1,R+M] f32
    reg2_w_ref, reg2_b_ref,                 # [R+M,M] bf16, [1,M] f32
    reg3_w_ref, reg3_b_ref,                 # [M,4]   bf16, [1,4] f32
    # output
    o_ref,                                  # [N, 4] f32
    *, output_motion,
):
    f32, bf16 = jnp.float32, jnp.bfloat16
    n = o_ref.shape[0]

    # ---------- box / motion encode: tiny [N,1] columns, pure VPU/EUP -------
    def wh_cols(loc):
        x1, y1 = loc[:, 0:1], loc[:, 1:2]
        x2, y2 = loc[:, 2:3], loc[:, 3:4]
        w, h = x2 - x1, y2 - y1
        return x1 + 0.5 * w, y1 + 0.5 * h, w, h

    pcx, pcy, pw, ph = wh_cols(ploc_ref[...])
    ccx, ccy, cw, ch = wh_cols(cloc_ref[...])
    m_dx = (ccx - pcx) / pw
    m_dy = (ccy - pcy) / ph
    m_dw = jnp.log(cw / pw)
    m_dh = jnp.log(ch / ph)

    # ---------- appearance_conv: 3x (Conv3x3 valid + ReLU) ------------------
    # Row-Toeplitz form: out_row[oy] = relu( sum_ky in_row[oy+ky] @ W[ky] + b )
    def conv_rows(in_rows, w_ref, b_ref):
        wk = [w_ref[k] for k in range(3)]
        bias = b_ref[...]
        out_rows = []
        for oy in range(len(in_rows) - 2):
            acc = jnp.dot(in_rows[oy], wk[0], preferred_element_type=f32)
            acc = acc + jnp.dot(in_rows[oy + 1], wk[1], preferred_element_type=f32)
            acc = acc + jnp.dot(in_rows[oy + 2], wk[2], preferred_element_type=f32)
            out_rows.append(jnp.maximum(acc + bias, 0.0).astype(bf16))
        return out_rows

    x_rows = [x0_ref[y].astype(bf16) for y in range(x0_ref.shape[0])]
    a1 = conv_rows(x_rows, w1_ref, b1_ref)      # 5 rows of [N, 5*2C0]
    a2 = conv_rows(a1, w2_ref, b2_ref)          # 3 rows of [N, 3*2C0]
    a3 = conv_rows(a2, w3_ref, b3_ref)          # 1 row  of [N, R]
    spatial = a3[0]                             # spatial_feature (1x1 squeezed)

    # ---------- appearance_fuse: Linear(2R -> R) + ReLU ----------------------
    rep = rep_ref[...].astype(bf16)
    app = (jnp.dot(rep, fuse_wa_ref[...], preferred_element_type=f32)
           + jnp.dot(spatial, fuse_wb_ref[...], preferred_element_type=f32)
           + fuse_b_ref[...])
    app = jnp.maximum(app, 0.0).astype(bf16)

    # ---------- motion_repr: Linear(4 -> M) + ReLU on the VPU ----------------
    mrepr = (m_dx * mrepr_w_ref[0:1, :] + m_dy * mrepr_w_ref[1:2, :]
             + m_dw * mrepr_w_ref[2:3, :] + m_dh * mrepr_w_ref[3:4, :]
             + mrepr_b_ref[...])
    mrepr = jnp.maximum(mrepr, 0.0)

    # ---------- motion_regress MLP -------------------------------------------
    h1 = (jnp.dot(app, reg1_wa_ref[...], preferred_element_type=f32)
          + jnp.dot(mrepr.astype(bf16), reg1_wb_ref[...], preferred_element_type=f32)
          + reg1_b_ref[...])
    h1 = jnp.maximum(h1, 0.0).astype(bf16)
    h2 = jnp.dot(h1, reg2_w_ref[...], preferred_element_type=f32) + reg2_b_ref[...]
    h2 = jnp.maximum(h2, 0.0).astype(bf16)
    resid = jnp.dot(h2, reg3_w_ref[...], preferred_element_type=f32) + reg3_b_ref[...]

    # ---------- residual add, optional decode, pack [N,4] --------------------
    pm_dx = resid[:, 0:1] + m_dx
    pm_dy = resid[:, 1:2] + m_dy
    pm_dw = resid[:, 2:3] + m_dw
    pm_dh = resid[:, 3:4] + m_dh

    lane = jax.lax.broadcasted_iota(jnp.int32, (n, 4), 1)

    def pack4(c0, c1, c2, c3):   # concat-free [N,1] -> [N,4] packing
        return jnp.where(lane == 0, c0,
                         jnp.where(lane == 1, c1,
                                   jnp.where(lane == 2, c2, c3)))

    if output_motion:
        o_ref[...] = pack4(pm_dx, pm_dy, pm_dw, pm_dh)
    else:
        o_ref[...] = pack4(pm_dx * cw + ccx,
                           pm_dy * ch + ccy,
                           jnp.exp(pm_dw) * cw,
                           jnp.exp(pm_dh) * ch)


# ==========================================================================
# Parameter construction / preparation
# ==========================================================================
def init_params(key, roi_output_dim, representation_dim, motion_repr_dim):
    """Synthetic params with the same shapes as MotionModelV3 (HWIO / [in,out])."""
    ks = jax.random.split(key, 8)

    def w(k, shape, scale=0.05):
        return jax.random.normal(k, shape, jnp.float32) * scale

    c0, r, m = roi_output_dim, representation_dim, motion_repr_dim
    return {
        "conv1_w": w(ks[0], (3, 3, c0, 2 * c0)), "conv1_b": jnp.zeros((2 * c0,), jnp.float32),
        "conv2_w": w(ks[1], (3, 3, 2 * c0, 2 * c0)), "conv2_b": jnp.zeros((2 * c0,), jnp.float32),
        "conv3_w": w(ks[2], (3, 3, 2 * c0, r)), "conv3_b": jnp.zeros((r,), jnp.float32),
        "fuse_w": w(ks[3], (2 * r, r)), "fuse_b": jnp.zeros((r,), jnp.float32),
        "mrepr_w": w(ks[4], (4, m), 0.1), "mrepr_b": jnp.zeros((m,), jnp.float32),
        "reg1_w": w(ks[5], (r + m, r + m)), "reg1_b": jnp.zeros((r + m,), jnp.float32),
        "reg2_w": w(ks[6], (r + m, m)), "reg2_b": jnp.zeros((m,), jnp.float32),
        "reg3_w": w(ks[7], (m, 4)), "reg3_b": jnp.zeros((4,), jnp.float32),
    }


def _conv_toeplitz(w_hwio, w_in):
    """[3,3,Cin,Cout] HWIO -> [3, w_in*Cin, w_out*Cout] row-lowered matrices."""
    kh, kw, cin, cout = w_hwio.shape
    w_out = w_in - kw + 1
    t = jnp.zeros((kh, w_in * cin, w_out * cout), jnp.float32)
    for ky in range(kh):
        for ox in range(w_out):
            for kx in range(kw):
                xin = ox + kx
                t = t.at[ky,
                         xin * cin:(xin + 1) * cin,
                         ox * cout:(ox + 1) * cout].set(w_hwio[ky, kx])
    return t


def prepare_fused_params(params, pool_size=7):
    """One-time prep: Toeplitz bf16 conv weights, tiled biases, split linears."""
    bf16 = jnp.bfloat16
    r = params["conv3_w"].shape[3]
    w1, w2, w3 = pool_size, pool_size - 2, pool_size - 4

    def tile_bias(b, w_out):
        return jnp.tile(b, w_out).reshape(1, -1)

    return {
        "w1": _conv_toeplitz(params["conv1_w"], w1).astype(bf16),
        "b1": tile_bias(params["conv1_b"], w1 - 2),
        "w2": _conv_toeplitz(params["conv2_w"], w2).astype(bf16),
        "b2": tile_bias(params["conv2_b"], w2 - 2),
        "w3": _conv_toeplitz(params["conv3_w"], w3).astype(bf16),
        "b3": tile_bias(params["conv3_b"], w3 - 2),
        "fuse_wa": params["fuse_w"][:r].astype(bf16),      # representation half
        "fuse_wb": params["fuse_w"][r:].astype(bf16),      # spatial half
        "fuse_b": params["fuse_b"].reshape(1, -1),
        "mrepr_w": params["mrepr_w"],                      # f32 (VPU path)
        "mrepr_b": params["mrepr_b"].reshape(1, -1),
        "reg1_wa": params["reg1_w"][:r].astype(bf16),      # appearance half
        "reg1_wb": params["reg1_w"][r:].astype(bf16),      # motion-repr half
        "reg1_b": params["reg1_b"].reshape(1, -1),
        "reg2_w": params["reg2_w"].astype(bf16),
        "reg2_b": params["reg2_b"].reshape(1, -1),
        "reg3_w": params["reg3_w"].astype(bf16),
        "reg3_b": params["reg3_b"].reshape(1, -1),
    }


_WEIGHT_ORDER = ("w1", "b1", "w2", "b2", "w3", "b3",
                 "fuse_wa", "fuse_wb", "fuse_b",
                 "mrepr_w", "mrepr_b",
                 "reg1_wa", "reg1_wb", "reg1_b",
                 "reg2_w", "reg2_b", "reg3_w", "reg3_b")


# ==========================================================================
# Forward wrapper (single pallas_call)
# ==========================================================================
def motion_model_v3_forward(fused_params, early_reid, curr_reid, roi_pool_output,
                            representation_feature, previous_loc, curr_loc,
                            output_motion=False):
    del early_reid, curr_reid  # only used when use_historical_appearance=True

    n, c0, h, w = roi_pool_output.shape
    # NCHW -> [H, N, W*C0]  (single XLA transpose; lane index = x*C0 + c)
    x0 = jnp.transpose(roi_pool_output, (2, 0, 3, 1)).reshape(h, n, w * c0)

    weights = [fused_params[k] for k in _WEIGHT_ORDER]
    operands = [x0, representation_feature, previous_loc, curr_loc] + weights

    # Advisory cost estimate so XLA schedules the surrounding glue sensibly.
    def mm_flops(wmat, reps=1):
        return 2 * n * reps * wmat.shape[-2] * wmat.shape[-1]
    flops = (mm_flops(fused_params["w1"], 3 * (h - 2))
             + mm_flops(fused_params["w2"], 3 * (h - 4))
             + mm_flops(fused_params["w3"], 3 * (h - 6))
             + mm_flops(fused_params["fuse_wa"]) + mm_flops(fused_params["fuse_wb"])
             + mm_flops(fused_params["reg1_wa"]) + mm_flops(fused_params["reg1_wb"])
             + mm_flops(fused_params["reg2_w"]) + mm_flops(fused_params["reg3_w"]))
    bytes_accessed = sum(int(a.size) * a.dtype.itemsize for a in operands) + n * 4 * 4

    # TODO(synk): for large track batches, tile the batch dim with a grid and
    #             dimension_semantics=("parallel",) to use both v7x TensorCores.
    out = pl.pallas_call(
        functools.partial(_fused_forward_kernel, output_motion=output_motion),
        out_shape=jax.ShapeDtypeStruct((n, 4), jnp.float32),
        in_specs=[pl.BlockSpec(memory_space=pltpu.MemorySpace.VMEM)] * len(operands),
        out_specs=pl.BlockSpec(memory_space=pltpu.MemorySpace.VMEM),
        cost_estimate=pl.CostEstimate(flops=flops, transcendentals=8 * n,
                                      bytes_accessed=bytes_accessed),
    )(*operands)

    if output_motion:
        return out
    return out, None  # vis_output is None when use_vis_model=False


# ==========================================================================
# Pure-JAX f32 reference (same math, no Pallas) for a correctness check
# ==========================================================================
def _reference_forward(params, roi_nchw, rep, ploc, cloc):
    def two_p_to_wh(loc):
        x1, y1, x2, y2 = loc[:, 0], loc[:, 1], loc[:, 2], loc[:, 3]
        w, h = x2 - x1, y2 - y1
        return jnp.stack([x1 + 0.5 * w, y1 + 0.5 * h, w, h], axis=1)

    def conv3x3_relu(x, w_hwio, b):
        n, hh, ww, c = x.shape
        ho, wo = hh - 2, ww - 2
        cols = [x[:, ky:ky + ho, kx:kx + wo, :] for ky in range(3) for kx in range(3)]
        p = jnp.concatenate(cols, -1).reshape(n * ho * wo, 9 * c)
        y = jnp.maximum(p @ w_hwio.reshape(9 * c, -1) + b, 0.0)
        return y.reshape(n, ho, wo, -1)

    p_wh, c_wh = two_p_to_wh(ploc), two_p_to_wh(cloc)
    im = jnp.stack([(c_wh[:, 0] - p_wh[:, 0]) / p_wh[:, 2],
                    (c_wh[:, 1] - p_wh[:, 1]) / p_wh[:, 3],
                    jnp.log(c_wh[:, 2] / p_wh[:, 2]),
                    jnp.log(c_wh[:, 3] / p_wh[:, 3])], axis=1)
    x = jnp.transpose(roi_nchw, (0, 2, 3, 1))
    x = conv3x3_relu(x, params["conv1_w"], params["conv1_b"])
    x = conv3x3_relu(x, params["conv2_w"], params["conv2_b"])
    x = conv3x3_relu(x, params["conv3_w"], params["conv3_b"])
    spatial = x.reshape(x.shape[0], -1)
    app = jnp.maximum(jnp.concatenate([rep, spatial], 1) @ params["fuse_w"]
                      + params["fuse_b"], 0.0)
    mrepr = jnp.maximum(im @ params["mrepr_w"] + params["mrepr_b"], 0.0)
    h1 = jnp.maximum(jnp.concatenate([app, mrepr], 1) @ params["reg1_w"]
                     + params["reg1_b"], 0.0)
    h2 = jnp.maximum(h1 @ params["reg2_w"] + params["reg2_b"], 0.0)
    pm = h2 @ params["reg3_w"] + params["reg3_b"] + im
    return jnp.stack([pm[:, 0] * c_wh[:, 2] + c_wh[:, 0],
                      pm[:, 1] * c_wh[:, 3] + c_wh[:, 1],
                      jnp.exp(pm[:, 2]) * c_wh[:, 2],
                      jnp.exp(pm[:, 3]) * c_wh[:, 3]], axis=1)


if __name__ == "__main__":
    key = jax.random.PRNGKey(0)
    (k_par, k_roi, k_rep, k_reid1, k_reid2,
     k_xy1, k_wh1, k_xy2, k_wh2) = jax.random.split(key, 9)

    N = 8
    roi_output_dim, representation_dim, motion_repr_dim, reid_dim = 32, 128, 64, 32
    pool = 7

    params = init_params(k_par, roi_output_dim, representation_dim, motion_repr_dim)
    fused_params = prepare_fused_params(params, pool_size=pool)

    roi_pool_output = jax.random.normal(
        k_roi, (N, roi_output_dim, pool, pool), jnp.float32)          # NCHW (PyTorch)
    representation_feature = jax.random.normal(
        k_rep, (N, representation_dim), jnp.float32)
    early_reid = jax.random.normal(k_reid1, (N, reid_dim), jnp.float32)
    curr_reid = jax.random.normal(k_reid2, (N, reid_dim), jnp.float32)

    def make_boxes(kxy, kwh):
        xy = jax.random.uniform(kxy, (N, 2), minval=0.0, maxval=50.0)
        wh = jax.random.uniform(kwh, (N, 2), minval=10.0, maxval=60.0)
        return jnp.concatenate([xy, xy + wh], axis=1)                 # [x1,y1,x2,y2]

    previous_loc = make_boxes(k_xy1, k_wh1)
    curr_loc = make_boxes(k_xy2, k_wh2)

    fwd = jax.jit(lambda fp, er, cr, roi, rep, p_loc, c_loc:
                  motion_model_v3_forward(fp, er, cr, roi, rep, p_loc, c_loc))
    pred_loc_wh, vis_out = fwd(fused_params, early_reid, curr_reid, roi_pool_output,
                               representation_feature, previous_loc, curr_loc)
    pred_loc_wh = jax.block_until_ready(pred_loc_wh)

    assert pred_loc_wh.shape == (N, 4)
    assert bool(jnp.all(jnp.isfinite(pred_loc_wh)))
    assert vis_out is None

    # Compare against an f32 pure-JAX reference (kernel uses bf16 MXU operands).
    ref = _reference_forward(params, roi_pool_output, representation_feature,
                             previous_loc, curr_loc)
    rel_err = float(jnp.max(jnp.abs(pred_loc_wh - ref) / (jnp.abs(ref) + 1.0)))
    assert rel_err < 5e-2, f"mismatch vs reference: rel_err={rel_err}"

    print("KERNEL_OK")
</pallas_src>

<mosaic_0001>
module attributes {stable_mosaic.version = 11 : i64} {
  func.func @_fused_forward_kernel(%arg0: memref<7x8x224xf32, #tpu.memory_space<vmem>>, %arg1: memref<8x128xf32, #tpu.memory_space<vmem>>, %arg2: memref<8x4xf32, #tpu.memory_space<vmem>>, %arg3: memref<8x4xf32, #tpu.memory_space<vmem>>, %arg4: memref<3x224x320xbf16, #tpu.memory_space<vmem>>, %arg5: memref<1x320xf32, #tpu.memory_space<vmem>>, %arg6: memref<3x320x192xbf16, #tpu.memory_space<vmem>>, %arg7: memref<1x192xf32, #tpu.memory_space<vmem>>, %arg8: memref<3x192x128xbf16, #tpu.memory_space<vmem>>, %arg9: memref<1x128xf32, #tpu.memory_space<vmem>>, %arg10: memref<128x128xbf16, #tpu.memory_space<vmem>>, %arg11: memref<128x128xbf16, #tpu.memory_space<vmem>>, %arg12: memref<1x128xf32, #tpu.memory_space<vmem>>, %arg13: memref<4x64xf32, #tpu.memory_space<vmem>>, %arg14: memref<1x64xf32, #tpu.memory_space<vmem>>, %arg15: memref<128x192xbf16, #tpu.memory_space<vmem>>, %arg16: memref<64x192xbf16, #tpu.memory_space<vmem>>, %arg17: memref<1x192xf32, #tpu.memory_space<vmem>>, %arg18: memref<192x64xbf16, #tpu.memory_space<vmem>>, %arg19: memref<1x64xf32, #tpu.memory_space<vmem>>, %arg20: memref<64x4xbf16, #tpu.memory_space<vmem>>, %arg21: memref<1x4xf32, #tpu.memory_space<vmem>>, %arg22: memref<8x4xf32, #tpu.memory_space<vmem>>) attributes {dimension_semantics = [], scalar_prefetch = 0 : i64, scratch_operands = 0 : i64, tpu.core_type = #tpu.core_type<tc>} {
    %c0 = arith.constant 0 : index
    %c0_0 = arith.constant 0 : index
    %0 = vector.load %arg2[%c0, %c0_0] : memref<8x4xf32, #tpu.memory_space<vmem>>, vector<8x4xf32>
    %1 = vector.extract_strided_slice %0 {offsets = [0, 0], sizes = [8, 1], strides = [1, 1]} : vector<8x4xf32> to vector<8x1xf32>
    %2 = vector.extract_strided_slice %0 {offsets = [0, 1], sizes = [8, 1], strides = [1, 1]} : vector<8x4xf32> to vector<8x1xf32>
    %3 = vector.extract_strided_slice %0 {offsets = [0, 2], sizes = [8, 1], strides = [1, 1]} : vector<8x4xf32> to vector<8x1xf32>
    %4 = vector.extract_strided_slice %0 {offsets = [0, 3], sizes = [8, 1], strides = [1, 1]} : vector<8x4xf32> to vector<8x1xf32>
    %5 = arith.subf %3, %1 : vector<8x1xf32>
    %6 = arith.subf %4, %2 : vector<8x1xf32>
    %cst = arith.constant 5.000000e-01 : f32
    %7 = vector.broadcast %cst : f32 to vector<8x1xf32>
    %8 = arith.mulf %7, %5 : vector<8x1xf32>
    %9 = arith.addf %1, %8 : vector<8x1xf32>
    %cst_1 = arith.constant 5.000000e-01 : f32
    %10 = vector.broadcast %cst_1 : f32 to vector<8x1xf32>
    %11 = arith.mulf %10, %6 : vector<8x1xf32>
    %12 = arith.addf %2, %11 : vector<8x1xf32>
    %c0_2 = arith.constant 0 : index
    %c0_3 = arith.constant 0 : index
    %13 = vector.load %arg3[%c0_2, %c0_3] : memref<8x4xf32, #tpu.memory_space<vmem>>, vector<8x4xf32>
    %14 = vector.extract_strided_slice %13 {offsets = [0, 0], sizes = [8, 1], strides = [1, 1]} : vector<8x4xf32> to vector<8x1xf32>
    %15 = vector.extract_strided_slice %13 {offsets = [0, 1], sizes = [8, 1], strides = [1, 1]} : vector<8x4xf32> to vector<8x1xf32>
    %16 = vector.extract_strided_slice %13 {offsets = [0, 2], sizes = [8, 1], strides = [1, 1]} : vector<8x4xf32> to vector<8x1xf32>
    %17 = vector.extract_strided_slice %13 {offsets = [0, 3], sizes = [8, 1], strides = [1, 1]} : vector<8x4xf32> to vector<8x1xf32>
    %18 = arith.subf %16, %14 : vector<8x1xf32>
    %19 = arith.subf %17, %15 : vector<8x1xf32>
    %cst_4 = arith.constant 5.000000e-01 : f32
    %20 = vector.broadcast %cst_4 : f32 to vector<8x1xf32>
    %21 = arith.mulf %20, %18 : vector<8x1xf32>
    %22 = arith.addf %14, %21 : vector<8x1xf32>
    %cst_5 = arith.constant 5.000000e-01 : f32
    %23 = vector.broadcast %cst_5 : f32 to vector<8x1xf32>
    %24 = arith.mulf %23, %19 : vector<8x1xf32>
    %25 = arith.addf %15, %24 : vector<8x1xf32>
    %26 = arith.subf %22, %9 : vector<8x1xf32>
    %27 = arith.divf %26, %5 : vector<8x1xf32>
    %28 = arith.subf %25, %12 : vector<8x1xf32>
    %29 = arith.divf %28, %6 : vector<8x1xf32>
    %30 = arith.divf %18, %5 : vector<8x1xf32>
    %31 = math.log %30 : vector<8x1xf32>
    %32 = arith.divf %19, %6 : vector<8x1xf32>
    %33 = math.log %32 : vector<8x1xf32>
    %c0_6 = arith.constant 0 : index
    %c0_7 = arith.constant 0 : index
    %c0_8 = arith.constant 0 : index
    %34 = vector.load %arg0[%c0_6, %c0_7, %c0_8] : memref<7x8x224xf32, #tpu.memory_space<vmem>>, vector<1x8x224xf32>
    %35 = vector.shape_cast %34 : vector<1x8x224xf32> to vector<8x224xf32>
    %36 = arith.truncf %35 : vector<8x224xf32> to vector<8x224xbf16>
    %c1 = arith.constant 1 : index
    %c0_9 = arith.constant 0 : index
    %c0_10 = arith.constant 0 : index
    %37 = vector.load %arg0[%c1, %c0_9, %c0_10] : memref<7x8x224xf32, #tpu.memory_space<vmem>>, vector<1x8x224xf32>
    %38 = vector.shape_cast %37 : vector<1x8x224xf32> to vector<8x224xf32>
    %39 = arith.truncf %38 : vector<8x224xf32> to vector<8x224xbf16>
    %c2 = arith.constant 2 : index
    %c0_11 = arith.constant 0 : index
    %c0_12 = arith.constant 0 : index
    %40 = vector.load %arg0[%c2, %c0_11, %c0_12] : memref<7x8x224xf32, #tpu.memory_space<vmem>>, vector<1x8x224xf32>
    %41 = vector.shape_cast %40 : vector<1x8x224xf32> to vector<8x224xf32>
    %42 = arith.truncf %41 : vector<8x224xf32> to vector<8x224xbf16>
    %c3 = arith.constant 3 : index
    %c0_13 = arith.constant 0 : index
    %c0_14 = arith.constant 0 : index
    %43 = vector.load %arg0[%c3, %c0_13, %c0_14] : memref<7x8x224xf32, #tpu.memory_space<vmem>>, vector<1x8x224xf32>
    %44 = vector.shape_cast %43 : vector<1x8x224xf32> to vector<8x224xf32>
    %45 = arith.truncf %44 : vector<8x224xf32> to vector<8x224xbf16>
    %c4 = arith.constant 4 : index
    %c0_15 = arith.constant 0 : index
    %c0_16 = arith.constant 0 : index
    %46 = vector.load %arg0[%c4, %c0_15, %c0_16] : memref<7x8x224xf32, #tpu.memory_space<vmem>>, vector<1x8x224xf32>
    %47 = vector.shape_cast %46 : vector<1x8x224xf32> to vector<8x224xf32>
    %48 = arith.truncf %47 : vector<8x224xf32> to vector<8x224xbf16>
    %c5 = arith.constant 5 : index
    %c0_17 = arith.constant 0 : index
    %c0_18 = arith.constant 0 : index
    %49 = vector.load %arg0[%c5, %c0_17, %c0_18] : memref<7x8x224xf32, #tpu.memory_space<vmem>>, vector<1x8x224xf32>
    %50 = vector.shape_cast %49 : vector<1x8x224xf32> to vector<8x224xf32>
    %51 = arith.truncf %50 : vector<8x224xf32> to vector<8x224xbf16>
    %c6 = arith.constant 6 : index
    %c0_19 = arith.constant 0 : index
    %c0_20 = arith.constant 0 : index
    %52 = vector.load %arg0[%c6, %c0_19, %c0_20] : memref<7x8x224xf32, #tpu.memory_space<vmem>>, vector<1x8x224xf32>
    %53 = vector.shape_cast %52 : vector<1x8x224xf32> to vector<8x224xf32>
    %54 = arith.truncf %53 : vector<8x224xf32> to vector<8x224xbf16>
    %c0_21 = arith.constant 0 : index
    %c0_22 = arith.constant 0 : index
    %c0_23 = arith.constant 0 : index
    %55 = vector.load %arg4[%c0_21, %c0_22, %c0_23] : memref<3x224x320xbf16, #tpu.memory_space<vmem>>, vector<1x224x320xbf16>
    %56 = vector.shape_cast %55 : vector<1x224x320xbf16> to vector<224x320xbf16>
    %c1_24 = arith.constant 1 : index
    %c0_25 = arith.constant 0 : index
    %c0_26 = arith.constant 0 : index
    %57 = vector.load %arg4[%c1_24, %c0_25, %c0_26] : memref<3x224x320xbf16, #tpu.memory_space<vmem>>, vector<1x224x320xbf16>
    %58 = vector.shape_cast %57 : vector<1x224x320xbf16> to vector<224x320xbf16>
    %c2_27 = arith.constant 2 : index
    %c0_28 = arith.constant 0 : index
    %c0_29 = arith.constant 0 : index
    %59 = vector.load %arg4[%c2_27, %c0_28, %c0_29] : memref<3x224x320xbf16, #tpu.memory_space<vmem>>, vector<1x224x320xbf16>
    %60 = vector.shape_cast %59 : vector<1x224x320xbf16> to vector<224x320xbf16>
    %c0_30 = arith.constant 0 : index
    %c0_31 = arith.constant 0 : index
    %61 = vector.load %arg5[%c0_30, %c0_31] : memref<1x320xf32, #tpu.memory_space<vmem>>, vector<1x320xf32>
    %cst_32 = arith.constant dense<0.000000e+00> : vector<8x320xf32>
    %62 = tpu.matmul %36, %56, %cst_32 {dimension_numbers = #tpu.dot_dimension_numbers<[1], [0], [0], [1], [0, 0, 1, 1], [], []>} : vector<8x224xbf16>, vector<224x320xbf16>, vector<8x320xf32> -> vector<8x320xf32>
    %cst_33 = arith.constant dense<0.000000e+00> : vector<8x320xf32>
    %63 = tpu.matmul %39, %58, %cst_33 {dimension_numbers = #tpu.dot_dimension_numbers<[1], [0], [0], [1], [0, 0, 1, 1], [], []>} : vector<8x224xbf16>, vector<224x320xbf16>, vector<8x320xf32> -> vector<8x320xf32>
    %64 = arith.addf %62, %63 : vector<8x320xf32>
    %cst_34 = arith.constant dense<0.000000e+00> : vector<8x320xf32>
    %65 = tpu.matmul %42, %60, %cst_34 {dimension_numbers = #tpu.dot_dimension_numbers<[1], [0], [0], [1], [0, 0, 1, 1], [], []>} : vector<8x224xbf16>, vector<224x320xbf16>, vector<8x320xf32> -> vector<8x320xf32>
    %66 = arith.addf %64, %65 : vector<8x320xf32>
    %67 = vector.broadcast %61 : vector<1x320xf32> to vector<8x320xf32>
    %68 = arith.addf %66, %67 : vector<8x320xf32>
    %cst_35 = arith.constant 0.000000e+00 : f32
    %69 = vector.broadcast %cst_35 : f32 to vector<8x320xf32>
    %70 = arith.maximumf %68, %69 : vector<8x320xf32>
    %71 = arith.truncf %70 : vector<8x320xf32> to vector<8x320xbf16>
    %cst_36 = arith.constant dense<0.000000e+00> : vector<8x320xf32>
    %72 = tpu.matmul %39, %56, %cst_36 {dimension_numbers = #tpu.dot_dimension_numbers<[1], [0], [0], [1], [0, 0, 1, 1], [], []>} : vector<8x224xbf16>, vector<224x320xbf16>, vector<8x320xf32> -> vector<8x320xf32>
    %cst_37 = arith.constant dense<0.000000e+00> : vector<8x320xf32>
    %73 = tpu.matmul %42, %58, %cst_37 {dimension_numbers = #tpu.dot_dimension_numbers<[1], [0], [0], [1], [0, 0, 1, 1], [], []>} : vector<8x224xbf16>, vector<224x320xbf16>, vector<8x320xf32> -> vector<8x320xf32>
    %74 = arith.addf %72, %73 : vector<8x320xf32>
    %cst_38 = arith.constant dense<0.000000e+00> : vector<8x320xf32>
    %75 = tpu.matmul %45, %60, %cst_38 {dimension_numbers = #tpu.dot_dimension_numbers<[1], [0], [0], [1], [0, 0, 1, 1], [], []>} : vector<8x224xbf16>, vector<224x320xbf16>, vector<8x320xf32> -> vector<8x320xf32>
    %76 = arith.addf %74, %75 : vector<8x320xf32>
    %77 = vector.broadcast %61 : vector<1x320xf32> to vector<8x320xf32>
    %78 = arith.addf %76, %77 : vector<8x320xf32>
    %cst_39 = arith.constant 0.000000e+00 : f32
    %79 = vector.broadcast %cst_39 : f32 to vector<8x320xf32>
    %80 = arith.maximumf %78, %79 : vector<8x320xf32>
    %81 = arith.truncf %80 : vector<8x320xf32> to vector<8x320xbf16>
    %cst_40 = arith.constant dense<0.000000e+00> : vector<8x320xf32>
    %82 = tpu.matmul %42, %56, %cst_40 {dimension_numbers = #tpu.dot_dimension_numbers<[1], [0], [0], [1], [0, 0, 1, 1], [], []>} : vector<8x224xbf16>, vector<224x320xbf16>, vector<8x320xf32> -> vector<8x320xf32>
    %cst_41 = arith.constant dense<0.000000e+00> : vector<8x320xf32>
    %83 = tpu.matmul %45, %58, %cst_41 {dimension_numbers = #tpu.dot_dimension_numbers<[1], [0], [0], [1], [0, 0, 1, 1], [], []>} : vector<8x224xbf16>, vector<224x320xbf16>, vector<8x320xf32> -> vector<8x320xf32>
    %84 = arith.addf %82, %83 : vector<8x320xf32>
    %cst_42 = arith.constant dense<0.000000e+00> : vector<8x320xf32>
    %85 = tpu.matmul %48, %60, %cst_42 {dimension_numbers = #tpu.dot_dimension_numbers<[1], [0], [0], [1], [0, 0, 1, 1], [], []>} : vector<8x224xbf16>, vector<224x320xbf16>, vector<8x320xf32> -> vector<8x320xf32>
    %86 = arith.addf %84, %85 : vector<8x320xf32>
    %87 = vector.broadcast %61 : vector<1x320xf32> to vector<8x320xf32>
    %88 = arith.addf %86, %87 : vector<8x320xf32>
    %cst_43 = arith.constant 0.000000e+00 : f32
    %89 = vector.broadcast %cst_43 : f32 to vector<8x320xf32>
    %90 = arith.maximumf %88, %89 : vector<8x320xf32>
    %91 = arith.truncf %90 : vector<8x320xf32> to vector<8x320xbf16>
    %cst_44 = arith.constant dense<0.000000e+00> : vector<8x320xf32>
    %92 = tpu.matmul %45, %56, %cst_44 {dimension_numbers = #tpu.dot_dimension_numbers<[1], [0], [0], [1], [0, 0, 1, 1], [], []>} : vector<8x224xbf16>, vector<224x320xbf16>, vector<8x320xf32> -> vector<8x320xf32>
    %cst_45 = arith.constant dense<0.000000e+00> : vector<8x320xf32>
    %93 = tpu.matmul %48, %58, %cst_45 {dimension_numbers = #tpu.dot_dimension_numbers<[1], [0], [0], [1], [0, 0, 1, 1], [], []>} : vector<8x224xbf16>, vector<224x320xbf16>, vector<8x320xf32> -> vector<8x320xf32>
    %94 = arith.addf %92, %93 : vector<8x320xf32>
    %cst_46 = arith.constant dense<0.000000e+00> : vector<8x320xf32>
    %95 = tpu.matmul %51, %60, %cst_46 {dimension_numbers = #tpu.dot_dimension_numbers<[1], [0], [0], [1], [0, 0, 1, 1], [], []>} : vector<8x224xbf16>, vector<224x320xbf16>, vector<8x320xf32> -> vector<8x320xf32>
    %96 = arith.addf %94, %95 : vector<8x320xf32>
    %97 = vector.broadcast %61 : vector<1x320xf32> to vector<8x320xf32>
    %98 = arith.addf %96, %97 : vector<8x320xf32>
    %cst_47 = arith.constant 0.000000e+00 : f32
    %99 = vector.broadcast %cst_47 : f32 to vector<8x320xf32>
    %100 = arith.maximumf %98, %99 : vector<8x320xf32>
    %101 = arith.truncf %100 : vector<8x320xf32> to vector<8x320xbf16>
    %cst_48 = arith.constant dense<0.000000e+00> : vector<8x320xf32>
    %102 = tpu.matmul %48, %56, %cst_48 {dimension_numbers = #tpu.dot_dimension_numbers<[1], [0], [0], [1], [0, 0, 1, 1], [], []>} : vector<8x224xbf16>, vector<224x320xbf16>, vector<8x320xf32> -> vector<8x320xf32>
    %cst_49 = arith.constant dense<0.000000e+00> : vector<8x320xf32>
    %103 = tpu.matmul %51, %58, %cst_49 {dimension_numbers = #tpu.dot_dimension_numbers<[1], [0], [0], [1], [0, 0, 1, 1], [], []>} : vector<8x224xbf16>, vector<224x320xbf16>, vector<8x320xf32> -> vector<8x320xf32>
    %104 = arith.addf %102, %103 : vector<8x320xf32>
    %cst_50 = arith.constant dense<0.000000e+00> : vector<8x320xf32>
    %105 = tpu.matmul %54, %60, %cst_50 {dimension_numbers = #tpu.dot_dimension_numbers<[1], [0], [0], [1], [0, 0, 1, 1], [], []>} : vector<8x224xbf16>, vector<224x320xbf16>, vector<8x320xf32> -> vector<8x320xf32>
    %106 = arith.addf %104, %105 : vector<8x320xf32>
    %107 = vector.broadcast %61 : vector<1x320xf32> to vector<8x320xf32>
    %108 = arith.addf %106, %107 : vector<8x320xf32>
    %cst_51 = arith.constant 0.000000e+00 : f32
    %109 = vector.broadcast %cst_51 : f32 to vector<8x320xf32>
    %110 = arith.maximumf %108, %109 : vector<8x320xf32>
    %111 = arith.truncf %110 : vector<8x320xf32> to vector<8x320xbf16>
    %c0_52 = arith.constant 0 : index
    %c0_53 = arith.constant 0 : index
    %c0_54 = arith.constant 0 : index
    %112 = vector.load %arg6[%c0_52, %c0_53, %c0_54] : memref<3x320x192xbf16, #tpu.memory_space<vmem>>, vector<1x320x192xbf16>
    %113 = vector.shape_cast %112 : vector<1x320x192xbf16> to vector<320x192xbf16>
    %c1_55 = arith.constant 1 : index
    %c0_56 = arith.constant 0 : index
    %c0_57 = arith.constant 0 : index
    %114 = vector.load %arg6[%c1_55, %c0_56, %c0_57] : memref<3x320x192xbf16, #tpu.memory_space<vmem>>, vector<1x320x192xbf16>
    %115 = vector.shape_cast %114 : vector<1x320x192xbf16> to vector<320x192xbf16>
    %c2_58 = arith.constant 2 : index
    %c0_59 = arith.constant 0 : index
    %c0_60 = arith.constant 0 : index
    %116 = vector.load %arg6[%c2_58, %c0_59, %c0_60] : memref<3x320x192xbf16, #tpu.memory_space<vmem>>, vector<1x320x192xbf16>
    %117 = vector.shape_cast %116 : vector<1x320x192xbf16> to vector<320x192xbf16>
    %c0_61 = arith.constant 0 : index
    %c0_62 = arith.constant 0 : index
    %118 = vector.load %arg7[%c0_61, %c0_62] : memref<1x192xf32, #tpu.memory_space<vmem>>, vector<1x192xf32>
    %cst_63 = arith.constant dense<0.000000e+00> : vector<8x192xf32>
    %119 = tpu.matmul %71, %113, %cst_63 {dimension_numbers = #tpu.dot_dimension_numbers<[1], [0], [0], [1], [0, 0, 1, 1], [], []>} : vector<8x320xbf16>, vector<320x192xbf16>, vector<8x192xf32> -> vector<8x192xf32>
    %cst_64 = arith.constant dense<0.000000e+00> : vector<8x192xf32>
    %120 = tpu.matmul %81, %115, %cst_64 {dimension_numbers = #tpu.dot_dimension_numbers<[1], [0], [0], [1], [0, 0, 1, 1], [], []>} : vector<8x320xbf16>, vector<320x192xbf16>, vector<8x192xf32> -> vector<8x192xf32>
    %121 = arith.addf %119, %120 : vector<8x192xf32>
    %cst_65 = arith.constant dense<0.000000e+00> : vector<8x192xf32>
    %122 = tpu.matmul %91, %117, %cst_65 {dimension_numbers = #tpu.dot_dimension_numbers<[1], [0], [0], [1], [0, 0, 1, 1], [], []>} : vector<8x320xbf16>, vector<320x192xbf16>, vector<8x192xf32> -> vector<8x192xf32>
    %123 = arith.addf %121, %122 : vector<8x192xf32>
    %124 = vector.broadcast %118 : vector<1x192xf32> to vector<8x192xf32>
    %125 = arith.addf %123, %124 : vector<8x192xf32>
    %cst_66 = arith.constant 0.000000e+00 : f32
    %126 = vector.broadcast %cst_66 : f32 to vector<8x192xf32>
    %127 = arith.maximumf %125, %126 : vector<8x192xf32>
    %128 = arith.truncf %127 : vector<8x192xf32> to vector<8x192xbf16>
    %cst_67 = arith.constant dense<0.000000e+00> : vector<8x192xf32>
    %129 = tpu.matmul %81, %113, %cst_67 {dimension_numbers = #tpu.dot_dimension_numbers<[1], [0], [0], [1], [0, 0, 1, 1], [], []>} : vector<8x320xbf16>, vector<320x192xbf16>, vector<8x192xf32> -> vector<8x192xf32>
    %cst_68 = arith.constant dense<0.000000e+00> : vector<8x192xf32>
    %130 = tpu.matmul %91, %115, %cst_68 {dimension_numbers = #tpu.dot_dimension_numbers<[1], [0], [0], [1], [0, 0, 1, 1], [], []>} : vector<8x320xbf16>, vector<320x192xbf16>, vector<8x192xf32> -> vector<8x192xf32>
    %131 = arith.addf %129, %130 : vector<8x192xf32>
    %cst_69 = arith.constant dense<0.000000e+00> : vector<8x192xf32>
    %132 = tpu.matmul %101, %117, %cst_69 {dimension_numbers = #tpu.dot_dimension_numbers<[1], [0], [0], [1], [0, 0, 1, 1], [], []>} : vector<8x320xbf16>, vector<320x192xbf16>, vector<8x192xf32> -> vector<8x192xf32>
    %133 = arith.addf %131, %132 : vector<8x192xf32>
    %134 = vector.broadcast %118 : vector<1x192xf32> to vector<8x192xf32>
    %135 = arith.addf %133, %134 : vector<8x192xf32>
    %cst_70 = arith.constant 0.000000e+00 : f32
    %136 = vector.broadcast %cst_70 : f32 to vector<8x192xf32>
    %137 = arith.maximumf %135, %136 : vector<8x192xf32>
    %138 = arith.truncf %137 : vector<8x192xf32> to vector<8x192xbf16>
    %cst_71 = arith.constant dense<0.000000e+00> : vector<8x192xf32>
    %139 = tpu.matmul %91, %113, %cst_71 {dimension_numbers = #tpu.dot_dimension_numbers<[1], [0], [0], [1], [0, 0, 1, 1], [], []>} : vector<8x320xbf16>, vector<320x192xbf16>, vector<8x192xf32> -> vector<8x192xf32>
    %cst_72 = arith.constant dense<0.000000e+00> : vector<8x192xf32>
    %140 = tpu.matmul %101, %115, %cst_72 {dimension_numbers = #tpu.dot_dimension_numbers<[1], [0], [0], [1], [0, 0, 1, 1], [], []>} : vector<8x320xbf16>, vector<320x192xbf16>, vector<8x192xf32> -> vector<8x192xf32>
    %141 = arith.addf %139, %140 : vector<8x192xf32>
    %cst_73 = arith.constant dense<0.000000e+00> : vector<8x192xf32>
    %142 = tpu.matmul %111, %117, %cst_73 {dimension_numbers = #tpu.dot_dimension_numbers<[1], [0], [0], [1], [0, 0, 1, 1], [], []>} : vector<8x320xbf16>, vector<320x192xbf16>, vector<8x192xf32> -> vector<8x192xf32>
    %143 = arith.addf %141, %142 : vector<8x192xf32>
    %144 = vector.broadcast %118 : vector<1x192xf32> to vector<8x192xf32>
    %145 = arith.addf %143, %144 : vector<8x192xf32>
    %cst_74 = arith.constant 0.000000e+00 : f32
    %146 = vector.broadcast %cst_74 : f32 to vector<8x192xf32>
    %147 = arith.maximumf %145, %146 : vector<8x192xf32>
    %148 = arith.truncf %147 : vector<8x192xf32> to vector<8x192xbf16>
    %c0_75 = arith.constant 0 : index
    %c0_76 = arith.constant 0 : index
    %c0_77 = arith.constant 0 : index
    %149 = vector.load %arg8[%c0_75, %c0_76, %c0_77] : memref<3x192x128xbf16, #tpu.memory_space<vmem>>, vector<1x192x128xbf16>
    %150 = vector.shape_cast %149 : vector<1x192x128xbf16> to vector<192x128xbf16>
    %c1_78 = arith.constant 1 : index
    %c0_79 = arith.constant 0 : index
    %c0_80 = arith.constant 0 : index
    %151 = vector.load %arg8[%c1_78, %c0_79, %c0_80] : memref<3x192x128xbf16, #tpu.memory_space<vmem>>, vector<1x192x128xbf16>
    %152 = vector.shape_cast %151 : vector<1x192x128xbf16> to vector<192x128xbf16>
    %c2_81 = arith.constant 2 : index
    %c0_82 = arith.constant 0 : index
    %c0_83 = arith.constant 0 : index
    %153 = vector.load %arg8[%c2_81, %c0_82, %c0_83] : memref<3x192x128xbf16, #tpu.memory_space<vmem>>, vector<1x192x128xbf16>
    %154 = vector.shape_cast %153 : vector<1x192x128xbf16> to vector<192x128xbf16>
    %c0_84 = arith.constant 0 : index
    %c0_85 = arith.constant 0 : index
    %155 = vector.load %arg9[%c0_84, %c0_85] : memref<1x128xf32, #tpu.memory_space<vmem>>, vector<1x128xf32>
    %cst_86 = arith.constant dense<0.000000e+00> : vector<8x128xf32>
    %156 = tpu.matmul %128, %150, %cst_86 {dimension_numbers = #tpu.dot_dimension_numbers<[1], [0], [0], [1], [0, 0, 1, 1], [], []>} : vector<8x192xbf16>, vector<192x128xbf16>, vector<8x128xf32> -> vector<8x128xf32>
    %cst_87 = arith.constant dense<0.000000e+00> : vector<8x128xf32>
    %157 = tpu.matmul %138, %152, %cst_87 {dimension_numbers = #tpu.dot_dimension_numbers<[1], [0], [0], [1], [0, 0, 1, 1], [], []>} : vector<8x192xbf16>, vector<192x128xbf16>, vector<8x128xf32> -> vector<8x128xf32>
    %158 = arith.addf %156, %157 : vector<8x128xf32>
    %cst_88 = arith.constant dense<0.000000e+00> : vector<8x128xf32>
    %159 = tpu.matmul %148, %154, %cst_88 {dimension_numbers = #tpu.dot_dimension_numbers<[1], [0], [0], [1], [0, 0, 1, 1], [], []>} : vector<8x192xbf16>, vector<192x128xbf16>, vector<8x128xf32> -> vector<8x128xf32>
    %160 = arith.addf %158, %159 : vector<8x128xf32>
    %161 = vector.broadcast %155 : vector<1x128xf32> to vector<8x128xf32>
    %162 = arith.addf %160, %161 : vector<8x128xf32>
    %cst_89 = arith.constant 0.000000e+00 : f32
    %163 = vector.broadcast %cst_89 : f32 to vector<8x128xf32>
    %164 = arith.maximumf %162, %163 : vector<8x128xf32>
    %165 = arith.truncf %164 : vector<8x128xf32> to vector<8x128xbf16>
    %c0_90 = arith.constant 0 : index
    %c0_91 = arith.constant 0 : index
    %166 = vector.load %arg1[%c0_90, %c0_91] : memref<8x128xf32, #tpu.memory_space<vmem>>, vector<8x128xf32>
    %167 = arith.truncf %166 : vector<8x128xf32> to vector<8x128xbf16>
    %c0_92 = arith.constant 0 : index
    %c0_93 = arith.constant 0 : index
    %168 = vector.load %arg10[%c0_92, %c0_93] : memref<128x128xbf16, #tpu.memory_space<vmem>>, vector<128x128xbf16>
    %cst_94 = arith.constant dense<0.000000e+00> : vector<8x128xf32>
    %169 = tpu.matmul %167, %168, %cst_94 {dimension_numbers = #tpu.dot_dimension_numbers<[1], [0], [0], [1], [0, 0, 1, 1], [], []>} : vector<8x128xbf16>, vector<128x128xbf16>, vector<8x128xf32> -> vector<8x128xf32>
    %c0_95 = arith.constant 0 : index
    %c0_96 = arith.constant 0 : index
    %170 = vector.load %arg11[%c0_95, %c0_96] : memref<128x128xbf16, #tpu.memory_space<vmem>>, vector<128x128xbf16>
    %cst_97 = arith.constant dense<0.000000e+00> : vector<8x128xf32>
    %171 = tpu.matmul %165, %170, %cst_97 {dimension_numbers = #tpu.dot_dimension_numbers<[1], [0], [0], [1], [0, 0, 1, 1], [], []>} : vector<8x128xbf16>, vector<128x128xbf16>, vector<8x128xf32> -> vector<8x128xf32>
    %172 = arith.addf %169, %171 : vector<8x128xf32>
    %c0_98 = arith.constant 0 : index
    %c0_99 = arith.constant 0 : index
    %173 = vector.load %arg12[%c0_98, %c0_99] : memref<1x128xf32, #tpu.memory_space<vmem>>, vector<1x128xf32>
    %174 = vector.broadcast %173 : vector<1x128xf32> to vector<8x128xf32>
    %175 = arith.addf %172, %174 : vector<8x128xf32>
    %cst_100 = arith.constant 0.000000e+00 : f32
    %176 = vector.broadcast %cst_100 : f32 to vector<8x128xf32>
    %177 = arith.maximumf %175, %176 : vector<8x128xf32>
    %178 = arith.truncf %177 : vector<8x128xf32> to vector<8x128xbf16>
    %c0_101 = arith.constant 0 : index
    %c0_102 = arith.constant 0 : index
    %179 = vector.load %arg13[%c0_101, %c0_102] : memref<4x64xf32, #tpu.memory_space<vmem>>, vector<1x64xf32>
    %180 = vector.broadcast %27 : vector<8x1xf32> to vector<8x64xf32>
    %181 = vector.broadcast %179 : vector<1x64xf32> to vector<8x64xf32>
    %182 = arith.mulf %180, %181 : vector<8x64xf32>
    %c1_103 = arith.constant 1 : index
    %c0_104 = arith.constant 0 : index
    %183 = vector.load %arg13[%c1_103, %c0_104] : memref<4x64xf32, #tpu.memory_space<vmem>>, vector<1x64xf32>
    %184 = vector.broadcast %29 : vector<8x1xf32> to vector<8x64xf32>
    %185 = vector.broadcast %183 : vector<1x64xf32> to vector<8x64xf32>
    %186 = arith.mulf %184, %185 : vector<8x64xf32>
    %187 = arith.addf %182, %186 : vector<8x64xf32>
    %c2_105 = arith.constant 2 : index
    %c0_106 = arith.constant 0 : index
    %188 = vector.load %arg13[%c2_105, %c0_106] : memref<4x64xf32, #tpu.memory_space<vmem>>, vector<1x64xf32>
    %189 = vector.broadcast %31 : vector<8x1xf32> to vector<8x64xf32>
    %190 = vector.broadcast %188 : vector<1x64xf32> to vector<8x64xf32>
    %191 = arith.mulf %189, %190 : vector<8x64xf32>
    %192 = arith.addf %187, %191 : vector<8x64xf32>
    %c3_107 = arith.constant 3 : index
    %c0_108 = arith.constant 0 : index
    %193 = vector.load %arg13[%c3_107, %c0_108] : memref<4x64xf32, #tpu.memory_space<vmem>>, vector<1x64xf32>
    %194 = vector.broadcast %33 : vector<8x1xf32> to vector<8x64xf32>
    %195 = vector.broadcast %193 : vector<1x64xf32> to vector<8x64xf32>
    %196 = arith.mulf %194, %195 : vector<8x64xf32>
    %197 = arith.addf %192, %196 : vector<8x64xf32>
    %c0_109 = arith.constant 0 : index
    %c0_110 = arith.constant 0 : index
    %198 = vector.load %arg14[%c0_109, %c0_110] : memref<1x64xf32, #tpu.memory_space<vmem>>, vector<1x64xf32>
    %199 = vector.broadcast %198 : vector<1x64xf32> to vector<8x64xf32>
    %200 = arith.addf %197, %199 : vector<8x64xf32>
    %cst_111 = arith.constant 0.000000e+00 : f32
    %201 = vector.broadcast %cst_111 : f32 to vector<8x64xf32>
    %202 = arith.maximumf %200, %201 : vector<8x64xf32>
    %c0_112 = arith.constant 0 : index
    %c0_113 = arith.constant 0 : index
    %203 = vector.load %arg15[%c0_112, %c0_113] : memref<128x192xbf16, #tpu.memory_space<vmem>>, vector<128x192xbf16>
    %cst_114 = arith.constant dense<0.000000e+00> : vector<8x192xf32>
    %204 = tpu.matmul %178, %203, %cst_114 {dimension_numbers = #tpu.dot_dimension_numbers<[1], [0], [0], [1], [0, 0, 1, 1], [], []>} : vector<8x128xbf16>, vector<128x192xbf16>, vector<8x192xf32> -> vector<8x192xf32>
    %205 = arith.truncf %202 : vector<8x64xf32> to vector<8x64xbf16>
    %c0_115 = arith.constant 0 : index
    %c0_116 = arith.constant 0 : index
    %206 = vector.load %arg16[%c0_115, %c0_116] : memref<64x192xbf16, #tpu.memory_space<vmem>>, vector<64x192xbf16>
    %cst_117 = arith.constant dense<0.000000e+00> : vector<8x192xf32>
    %207 = tpu.matmul %205, %206, %cst_117 {dimension_numbers = #tpu.dot_dimension_numbers<[1], [0], [0], [1], [0, 0, 1, 1], [], []>} : vector<8x64xbf16>, vector<64x192xbf16>, vector<8x192xf32> -> vector<8x192xf32>
    %208 = arith.addf %204, %207 : vector<8x192xf32>
    %c0_118 = arith.constant 0 : index
    %c0_119 = arith.constant 0 : index
    %209 = vector.load %arg17[%c0_118, %c0_119] : memref<1x192xf32, #tpu.memory_space<vmem>>, vector<1x192xf32>
    %210 = vector.broadcast %209 : vector<1x192xf32> to vector<8x192xf32>
    %211 = arith.addf %208, %210 : vector<8x192xf32>
    %cst_120 = arith.constant 0.000000e+00 : f32
    %212 = vector.broadcast %cst_120 : f32 to vector<8x192xf32>
    %213 = arith.maximumf %211, %212 : vector<8x192xf32>
    %214 = arith.truncf %213 : vector<8x192xf32> to vector<8x192xbf16>
    %c0_121 = arith.constant 0 : index
    %c0_122 = arith.constant 0 : index
    %215 = vector.load %arg18[%c0_121, %c0_122] : memref<192x64xbf16, #tpu.memory_space<vmem>>, vector<192x64xbf16>
    %cst_123 = arith.constant dense<0.000000e+00> : vector<8x64xf32>
    %216 = tpu.matmul %214, %215, %cst_123 {dimension_numbers = #tpu.dot_dimension_numbers<[1], [0], [0], [1], [0, 0, 1, 1], [], []>} : vector<8x192xbf16>, vector<192x64xbf16>, vector<8x64xf32> -> vector<8x64xf32>
    %c0_124 = arith.constant 0 : index
    %c0_125 = arith.constant 0 : index
    %217 = vector.load %arg19[%c0_124, %c0_125] : memref<1x64xf32, #tpu.memory_space<vmem>>, vector<1x64xf32>
    %218 = vector.broadcast %217 : vector<1x64xf32> to vector<8x64xf32>
    %219 = arith.addf %216, %218 : vector<8x64xf32>
    %cst_126 = arith.constant 0.000000e+00 : f32
    %220 = vector.broadcast %cst_126 : f32 to vector<8x64xf32>
    %221 = arith.maximumf %219, %220 : vector<8x64xf32>
    %222 = arith.truncf %221 : vector<8x64xf32> to vector<8x64xbf16>
    %c0_127 = arith.constant 0 : index
    %c0_128 = arith.constant 0 : index
    %223 = vector.load %arg20[%c0_127, %c0_128] : memref<64x4xbf16, #tpu.memory_space<vmem>>, vector<64x4xbf16>
    %cst_129 = arith.constant dense<0.000000e+00> : vector<8x4xf32>
    %224 = tpu.matmul %222, %223, %cst_129 {dimension_numbers = #tpu.dot_dimension_numbers<[1], [0], [0], [1], [0, 0, 1, 1], [], []>} : vector<8x64xbf16>, vector<64x4xbf16>, vector<8x4xf32> -> vector<8x4xf32>
    %c0_130 = arith.constant 0 : index
    %c0_131 = arith.constant 0 : index
    %225 = vector.load %arg21[%c0_130, %c0_131] : memref<1x4xf32, #tpu.memory_space<vmem>>, vector<1x4xf32>
    %226 = vector.broadcast %225 : vector<1x4xf32> to vector<8x4xf32>
    %227 = arith.addf %224, %226 : vector<8x4xf32>
    %228 = vector.extract_strided_slice %227 {offsets = [0, 0], sizes = [8, 1], strides = [1, 1]} : vector<8x4xf32> to vector<8x1xf32>
    %229 = arith.addf %228, %27 : vector<8x1xf32>
    %230 = vector.extract_strided_slice %227 {offsets = [0, 1], sizes = [8, 1], strides = [1, 1]} : vector<8x4xf32> to vector<8x1xf32>
    %231 = arith.addf %230, %29 : vector<8x1xf32>
    %232 = vector.extract_strided_slice %227 {offsets = [0, 2], sizes = [8, 1], strides = [1, 1]} : vector<8x4xf32> to vector<8x1xf32>
    %233 = arith.addf %232, %31 : vector<8x1xf32>
    %234 = vector.extract_strided_slice %227 {offsets = [0, 3], sizes = [8, 1], strides = [1, 1]} : vector<8x4xf32> to vector<8x1xf32>
    %235 = arith.addf %234, %33 : vector<8x1xf32>
    %236 = tpu.iota {dimensions = array<i32: 1>} : vector<8x4xi32>
    %237 = arith.mulf %229, %18 : vector<8x1xf32>
    %238 = arith.addf %237, %22 : vector<8x1xf32>
    %239 = arith.mulf %231, %19 : vector<8x1xf32>
    %240 = arith.addf %239, %25 : vector<8x1xf32>
    %241 = math.exp %233 : vector<8x1xf32>
    %242 = arith.mulf %241, %18 : vector<8x1xf32>
    %243 = math.exp %235 : vector<8x1xf32>
    %244 = arith.mulf %243, %19 : vector<8x1xf32>
    %c0_i32 = arith.constant 0 : i32
    %245 = vector.broadcast %c0_i32 : i32 to vector<8x4xi32>
    %246 = arith.cmpi eq, %236, %245 : vector<8x4xi32>
    %c1_i32 = arith.constant 1 : i32
    %247 = vector.broadcast %c1_i32 : i32 to vector<8x4xi32>
    %248 = arith.cmpi eq, %236, %247 : vector<8x4xi32>
    %c2_i32 = arith.constant 2 : i32
    %249 = vector.broadcast %c2_i32 : i32 to vector<8x4xi32>
    %250 = arith.cmpi eq, %236, %249 : vector<8x4xi32>
    %251 = vector.shape_cast %242 : vector<8x1xf32> to vector<8x1xf32>
    %252 = vector.broadcast %251 : vector<8x1xf32> to vector<8x4xf32>
    %253 = vector.shape_cast %244 : vector<8x1xf32> to vector<8x1xf32>
    %254 = vector.broadcast %253 : vector<8x1xf32> to vector<8x4xf32>
    %255 = arith.select %250, %252, %254 : vector<8x4xi1>, vector<8x4xf32>
    %256 = vector.shape_cast %240 : vector<8x1xf32> to vector<8x1xf32>
    %257 = vector.broadcast %256 : vector<8x1xf32> to vector<8x4xf32>
    %258 = arith.select %248, %257, %255 : vector<8x4xi1>, vector<8x4xf32>
    %259 = vector.shape_cast %238 : vector<8x1xf32> to vector<8x1xf32>
    %260 = vector.broadcast %259 : vector<8x1xf32> to vector<8x4xf32>
    %261 = arith.select %246, %260, %258 : vector<8x4xi1>, vector<8x4xf32>
    %c0_132 = arith.constant 0 : index
    %c0_133 = arith.constant 0 : index
    %262 = vector.load %arg22[%c0_132, %c0_133] : memref<8x4xf32, #tpu.memory_space<vmem>>, vector<8x4xf32>
    tpu.vector_store %arg22[%c0_132, %c0_133], %261 {strides = array<i32>} : memref<8x4xf32, #tpu.memory_space<vmem>>, vector<8x4xf32>,
    return
  }
}

</mosaic_0001>

<bundles_post_ra>
// kernel: _lambda_.1
= control target key start
LH: loop header
LB: loop body
LE: loop exit
PB: predicated region body
PF: predicated region fallthrough
CT: control target
= control target key end

     0   :  { %v10479_v0 = vmov 0   ;;  %vm536_vm0 = vcmask 785408   ;;  %vm2620_vm1 = vcmask 523264   ;;  %vm6363_vm2 = vmmov 0   ;;  %s10410_s4 = inlined_call_operand.vmem [shape: bf16[3,224,320], index: 4, kind: input, shape index: {}]   ;;  %s10411_s0 = inlined_call_operand.vmem [shape: f32[7,8,224], index: 0, kind: input, shape index: {}]   ;;  %s10412_s6 = inlined_call_operand.vmem [shape: bf16[3,320,192], index: 6, kind: input, shape index: {}]   ;;  %s10413_s5 = inlined_call_operand.vmem [shape: f32[1,320], index: 5, kind: input, shape index: {}]   ;;  %s10414_s8 = inlined_call_operand.vmem [shape: bf16[3,192,128], index: 8, kind: input, shape index: {}]   ;;  %s10415_s2 = inlined_call_operand.vmem [shape: f32[8,4], index: 2, kind: input, shape index: {}]   ;;  %s10416_s3 = inlined_call_operand.vmem [shape: f32[8,4], index: 3, kind: input, shape index: {}]   ;;  %s10417_s7 = inlined_call_operand.vmem [shape: f32[1,192], index: 7, kind: input, shape index: {}]   ;;  %s10418_s10 = inlined_call_operand.vmem [shape: bf16[128,128], index: 10, kind: input, shape index: {}]   ;;  %s10419_s11 = inlined_call_operand.vmem [shape: bf16[128,128], index: 11, kind: input, shape index: {}]   ;;  %s10420_s1 = inlined_call_operand.vmem [shape: f32[8,128], index: 1, kind: input, shape index: {}]   ;;  %s10421_s16 = inlined_call_operand.vmem [shape: bf16[64,192], index: 16, kind: input, shape index: {}]   ;;  %s10422_s15 = inlined_call_operand.vmem [shape: bf16[128,192], index: 15, kind: input, shape index: {}]   ;;  %s10423_s13 = inlined_call_operand.vmem [shape: f32[4,64], index: 13, kind: input, shape index: {}]   ;;  %s10424_s9 = inlined_call_operand.vmem [shape: f32[1,128], index: 9, kind: input, shape index: {}]   ;;  %s10425_s14 = inlined_call_operand.vmem [shape: f32[1,64], index: 14, kind: input, shape index: {}]   ;;  %s10426_s18 = inlined_call_operand.vmem [shape: bf16[192,64], index: 18, kind: input, shape index: {}]   ;;  %s10427_s12 = inlined_call_operand.vmem [shape: f32[1,128], index: 12, kind: input, shape index: {}]   ;;  %s10428_s20 = inlined_call_operand.vmem [shape: bf16[64,4], index: 20, kind: input, shape index: {}]   ;;  %s10429_s17 = inlined_call_operand.vmem [shape: f32[1,192], index: 17, kind: input, shape index: {}]   ;;  %s10430_s19 = inlined_call_operand.vmem [shape: f32[1,64], index: 19, kind: input, shape index: {}]   ;;  %s10431_s21 = inlined_call_operand.vmem [shape: f32[1,4], index: 21, kind: input, shape index: {}]   ;;  %s10432_s22 = inlined_call_operand.vmem [shape: f32[8,4], index: 22, kind: output, shape index: {}]  }
   0x1   :  { %10916 = sst [smem:[#allocation118_spill]] %s10410_s4  ;;  %581 = vmatprep.subr.bf16.mxu1 %v10479_v0  ;;  %5761 = vset.pattern.permute.xlu1 %v10479_v0  ;;  %vm5028_vm6 = vcmask 31744  }
   0x2   :  { %10917 = sst [smem:[#allocation119_spill]] %s10411_s0 }
   0x3   :  { %10918 = sst [smem:[#allocation120_spill]] %s10412_s6 }
   0x4   :  { %10919 = sst [smem:[#allocation121_spill]] %s10413_s5 }
   0x5   :  { %10920 = sst [smem:[#allocation122_spill]] %s10414_s8  ;;  %s6358_s8 = smov 126  }
   0x6   :  { %10921 = sst [smem:[#allocation123_spill]] %s10415_s2 }
   0x7   :  { %10922 = sst [smem:[#allocation124_spill]] %s10416_s3 }
   0x8   :  { %s10923_s29 = sld [smem:[#allocation118_spill]] }
   0x9   :  { %s10924_s5 = sld [smem:[#allocation119_spill]] }
   0xa   :  { %s11329_s24 = sld [smem:[#allocation121_spill]] }
   0xb   :  { %s11337_s27 = sld [smem:[#allocation120_spill]] }
   0xc   :  { %s11566_s30 = sld [smem:[#allocation123_spill]] }
   0xd   :  { %s11570_s2 = sld [smem:[#allocation122_spill]] }
   0xe   :  { %v6483_v1 = vld [vmem:[%s10923_s29 + $0x1fc] ss:$12 sps:$4 sm:$0xff]   ;;  %v6489_v2 = vld [vmem:[%s10923_s29 + $0x200] ss:$12 sps:$4 sm:$0xff]   ;;  %v6495_v3 = vld [vmem:[%s10923_s29 + $0x1f8] ss:$12 sps:$4 sm:$0xff]  }
   0xf   :  { %540 = vmatprep.subr.bf16.mxu0 %v6483_v1  ;;  %582 = vmatpush1.bf16.msra.mxu1 %v6489_v2  ;;  %v6501_v4 = vld [vmem:[%s10923_s29 + $0x1e4] ss:$12 sps:$4 sm:$0xff]   ;;  %v6508_v5 = vld [vmem:[%s10923_s29 + $0x1e8] ss:$12 sps:$4 sm:$0xff]   ;;  %v6513_v6 = vld [vmem:[%s10923_s29 + $0x1e0] ss:$12 sps:$4 sm:$0xff]  }
  0x10   :  { %541 = vmatpush1.bf16.msra.mxu0 %v6495_v3  ;;  %583 = vmatprep.subr.bf16.mxu1 %v10479_v0  ;;  %v6519_v7 = vld [vmem:[%s10923_s29 + $0x1cc] ss:$12 sps:$4 sm:$0xff]   ;;  %v6525_v8 = vld [vmem:[%s10923_s29 + $0x1d0] ss:$12 sps:$4 sm:$0xff]   ;;  %v6532_v9 = vld [vmem:[%s10923_s29 + $0x1c8] ss:$12 sps:$4 sm:$0xff]  }
  0x11   :  { %542 = vmatprep.subr.bf16.mxu0 %v6501_v4  ;;  %v6538_v10 = vld [vmem:[%s10923_s29 + $0x1b4] ss:$12 sps:$4 sm:$0xff]   ;;  %v6544_v11 = vld [vmem:[%s10923_s29 + $0x1b8] ss:$12 sps:$4 sm:$0xff]   ;;  %v6551_v12 = vld [vmem:[%s10923_s29 + $0x1b0] ss:$12 sps:$4 sm:$0xff]  }
  0x12   :  { %v6557_v13 = vld [vmem:[%s10923_s29 + $0x19c] ss:$12 sps:$4 sm:$0xff]   ;;  %v6563_v14 = vld [vmem:[%s10923_s29 + $0x1a0] ss:$12 sps:$4 sm:$0xff]   ;;  %v6570_v15 = vld [vmem:[%s10923_s29 + $0x198] ss:$12 sps:$4 sm:$0xff]  }
  0x13   :  { %584 = vmatpush1.bf16.msra.mxu1 %v6508_v5  ;;  %v6576_v16 = vld [vmem:[%s10923_s29 + $0x184] ss:$12 sps:$4 sm:$0xff]   ;;  %v6582_v17 = vld [vmem:[%s10923_s29 + $0x188] ss:$12 sps:$4 sm:$0xff]   ;;  %v6589_v18 = vld [vmem:[%s10923_s29 + $0x180] ss:$12 sps:$4 sm:$0xff]  }
  0x14   :  { %543 = vmatpush1.bf16.msra.mxu0 %v6513_v6  ;;  %585 = vmatprep.subr.bf16.mxu1 %v10479_v0  ;;  %v6595_v19 = vld [vmem:[%s10923_s29 + $0x16c] ss:$12 sps:$4 sm:$0xff]   ;;  %v6601_v20 = vld [vmem:[%s10923_s29 + $0x170] ss:$12 sps:$4 sm:$0xff]   ;;  %v6608_v21 = vld [vmem:[%s10923_s29 + $0x168] ss:$12 sps:$4 sm:$0xff]  }
  0x15   :  { %544 = vmatprep.subr.bf16.mxu0 %v6519_v7  ;;  %v6614_v22 = vld [vmem:[%s10923_s29 + $0x154] ss:$12 sps:$4 sm:$0xff]   ;;  %v6620_v23 = vld [vmem:[%s10923_s29 + $0x158] ss:$12 sps:$4 sm:$0xff]   ;;  %v6627_v24 = vld [vmem:[%s10923_s29 + $0x150] ss:$12 sps:$4 sm:$0xff]  }
  0x16   :  { %v6633_v25 = vld [vmem:[%s10923_s29 + $0x28c] ss:$12 sps:$4 sm:$0xff]   ;;  %v6639_v26 = vld [vmem:[%s10923_s29 + $0x290] ss:$12 sps:$4 sm:$0xff]   ;;  %v6646_v27 = vld [vmem:[%s10923_s29 + $0x288] ss:$12 sps:$4 sm:$0xff]  }
  0x17   :  { %586 = vmatpush1.bf16.msra.mxu1 %v6525_v8  ;;  %v5035_v28 = vld [vmem:[%s10924_s5 + $0x18] sm:$0xff]  ;;  %v6655_v29 = vld [vmem:[%s10923_s29 + $0x274] ss:$12 sps:$4 sm:$0xff]   ;;  %v6699_v36 = vld [vmem:[%s10923_s29 + $0x244] ss:$12 sps:$4 sm:$0xff]  }
  0x18   :  { %545 = vmatpush1.bf16.msra.mxu0 %v6532_v9  ;;  %587 = vmatprep.subr.bf16.mxu1 %v10479_v0  ;;  %v6657_v30 = vpack.c.bf16 %v5035_v28, %v5035_v28  ;;  %v6663_v31 = vld [vmem:[%s10923_s29 + $0x278] ss:$12 sps:$4 sm:$0xff]   ;;  %v6672_v32 = vld [vmem:[%s10923_s29 + $0x270] ss:$12 sps:$4 sm:$0xff]   ;;  %v6686_v34 = vld [vmem:[%s10923_s29 + $0x260] ss:$12 sps:$4 sm:$0xff]  }
  0x19   :  { %546 = vmatprep.subr.bf16.mxu0 %v6538_v10  ;;  %v6678_v33 = vld [vmem:[%s10923_s29 + $0x25c] ss:$12 sps:$4 sm:$0xff]   ;;  %v6693_v35 = vld [vmem:[%s10923_s29 + $0x258] ss:$12 sps:$4 sm:$0xff]   ;;  %v6712_v38 = vld [vmem:[%s10923_s29 + $0x240] ss:$12 sps:$4 sm:$0xff]  }
  0x1a   :  { %5200 = vmatprep.mubr.msk.bf16.mxu0 %vm536_vm0, %v6657_v30  ;;  %5201 = vmatprep.mubr.msk.bf16.mxu1 %vm536_vm0, %v6657_v30  ;;  %v6705_v37 = vld [vmem:[%s10923_s29 + $0x248] ss:$12 sps:$4 sm:$0xff]   ;;  %v6718_v39 = vld [vmem:[%s10923_s29 + $0x22c] ss:$12 sps:$4 sm:$0xff]   ;;  %v6724_v40 = vld [vmem:[%s10923_s29 + $0x230] ss:$12 sps:$4 sm:$0xff]  }
  0x1b   :  { %588 = vmatpush1.bf16.msra.mxu1 %v6544_v11  ;;  %v6731_v41 = vld [vmem:[%s10923_s29 + $0x228] ss:$12 sps:$4 sm:$0xff]   ;;  %v6743_v43 = vld [vmem:[%s10923_s29 + $0x218] ss:$12 sps:$4 sm:$0xff]   ;;  %v6753_v45 = vld [vmem:[%s10923_s29 + $0x210] ss:$12 sps:$4 sm:$0xff]  }
  0x1c   :  { %547 = vmatpush1.bf16.msra.mxu0 %v6551_v12  ;;  %589 = vmatprep.subr.bf16.mxu1 %v10479_v0  ;;  %v6737_v42 = vld [vmem:[%s10923_s29 + $0x214] ss:$12 sps:$4 sm:$0xff]   ;;  %v6759_v46 = vld [vmem:[%s10923_s29 + $0xac] ss:$12 sps:$4 sm:$0xff]   ;;  %v6767_v48 = vld [vmem:[%s10923_s29 + $0xb0] ss:$12 sps:$4 sm:$0xff]  }
  0x1d   :  { %548 = vmatprep.subr.bf16.mxu0 %v6557_v13  ;;  %v5034_v44 = vld [vmem:[%s10924_s5 + $0x10] sm:$0xff]  ;;  %v6788_v51 = vld [vmem:[%s10923_s29 + $0x98] ss:$12 sps:$4 sm:$0xff]   ;;  %v6801_v53 = vld [vmem:[%s10923_s29 + $0x7c] ss:$12 sps:$4 sm:$0xff]  }
  0x1e   :  { %v6761_v47 = vpack.c.bf16 %v5034_v44, %v5034_v44  ;;  %v6774_v49 = vld [vmem:[%s10923_s29 + $0xa8] ss:$12 sps:$4 sm:$0xff]   ;;  %v6795_v52 = vld [vmem:[%s10923_s29 + $0x90] ss:$12 sps:$4 sm:$0xff]   ;;  %v6807_v54 = vld [vmem:[%s10923_s29 + $0x80] ss:$12 sps:$4 sm:$0xff]  }
  0x1f   :  { %590 = vmatpush1.bf16.msra.mxu1 %v6563_v14  ;;  %v6780_v50 = vld [vmem:[%s10923_s29 + $0x94] ss:$12 sps:$4 sm:$0xff]   ;;  %v6814_v55 = vld [vmem:[%s10923_s29 + $0x78] ss:$12 sps:$4 sm:$0xff]   ;;  %v108_v57 = vld [vmem:[%s10924_s5 + $0x8] sm:$0xff] }
  0x20   :  { %549 = vmatpush1.bf16.msra.mxu0 %v6570_v15  ;;  %591 = vmatprep.subr.bf16.mxu1 %v10479_v0  ;;  %10925 = vst [vmem:[#allocation2_spill] sm:$0xff] %v6761_v47  ;;  %v6820_v56 = vld [vmem:[%s10923_s29 + $0x64] ss:$12 sps:$4 sm:$0xff]   ;;  %v6829_v58 = vld [vmem:[%s10923_s29 + $0x68] ss:$12 sps:$4 sm:$0xff]   ;;  %v110_v59 = vpack.c.bf16 %v108_v57, %v108_v57 }
  0x21   :  { %550 = vmatprep.subr.bf16.mxu0 %v6576_v16  ;;  %v6836_v60 = vld [vmem:[%s10923_s29 + $0x60] ss:$12 sps:$4 sm:$0xff]   ;;  %v6850_v62 = vld [vmem:[%s10923_s29 + $0x50] ss:$12 sps:$4 sm:$0xff]   ;;  %v6857_v63 = vld [vmem:[%s10923_s29 + $0x48] ss:$12 sps:$4 sm:$0xff]  }
  0x22   :  { %v6842_v61 = vld [vmem:[%s10923_s29 + $0x4c] ss:$12 sps:$4 sm:$0xff]   ;;  %10927 = vst [vmem:[#allocation4_spill] sm:$0xff] %v6850_v62  ;;  %10928 = vst [vmem:[#allocation5_spill] sm:$0xff] %v6857_v63  ;;  %v6863_v28 = vld [vmem:[%s10923_s29 + $0x34] ss:$12 sps:$4 sm:$0xff]  }
  0x23   :  { %592 = vmatpush1.bf16.msra.mxu1 %v6582_v17  ;;  %10926 = vst [vmem:[#allocation3_spill] sm:$0xff] %v6842_v61  ;;  %10929 = vst [vmem:[#allocation6_spill] sm:$0xff] %v6863_v28  ;;  %v6869_v44 = vld [vmem:[%s10923_s29 + $0x38] ss:$12 sps:$4 sm:$0xff]   ;;  %v6876_v57 = vld [vmem:[%s10923_s29 + $0x30] ss:$12 sps:$4 sm:$0xff]  }
  0x24   :  { %551 = vmatpush1.bf16.msra.mxu0 %v6589_v18  ;;  %593 = vmatprep.subr.bf16.mxu1 %v10479_v0  ;;  %10930 = vst [vmem:[#allocation7_spill] sm:$0xff] %v6869_v44  ;;  %10931 = vst [vmem:[#allocation8_spill] sm:$0xff] %v6876_v57 }
  0x25   :  { %552 = vmatprep.subr.bf16.mxu0 %v6595_v19 }
  0x27   :  { %594 = vmatpush1.bf16.msra.mxu1 %v6601_v20 }
  0x28   :  { %553 = vmatpush1.bf16.msra.mxu0 %v6608_v21  ;;  %595 = vmatprep.subr.bf16.mxu1 %v10479_v0 }
  0x29   :  { %554 = vmatprep.subr.bf16.mxu0 %v6614_v22 }
  0x2b   :  { %596 = vmatpush1.bf16.msra.mxu1 %v6620_v23 }
  0x2c   :  { %555 = vmatpush1.bf16.msra.mxu0 %v6627_v24  ;;  %601 = vmatprep.subr.bf16.mxu1 %v10479_v0 }
  0x2d   :  { %560 = vmatprep.subr.bf16.mxu0 %v6633_v25 }
  0x2f   :  { %602 = vmatpush2.bf16.msra.mxu1 %v6639_v26 }
  0x30   :  { %561 = vmatpush2.bf16.msra.mxu0 %v6646_v27  ;;  %603 = vmatprep.subr.bf16.mxu1 %v10479_v0 }
  0x31   :  { %562 = vmatprep.subr.bf16.mxu0 %v6655_v29 }
  0x33   :  { %604 = vmatpush2.bf16.msra.mxu1 %v6663_v31 }
  0x34   :  { %563 = vmatpush2.bf16.msra.mxu0 %v6672_v32  ;;  %605 = vmatprep.subr.bf16.mxu1 %v10479_v0 }
  0x35   :  { %564 = vmatprep.subr.bf16.mxu0 %v6678_v33 }
  0x37   :  { %606 = vmatpush2.bf16.msra.mxu1 %v6686_v34 }
  0x38   :  { %565 = vmatpush2.bf16.msra.mxu0 %v6693_v35  ;;  %607 = vmatprep.subr.bf16.mxu1 %v10479_v0 }
  0x39   :  { %566 = vmatprep.subr.bf16.mxu0 %v6699_v36 }
  0x3b   :  { %608 = vmatpush2.bf16.msra.mxu1 %v6705_v37 }
  0x3c   :  { %567 = vmatpush2.bf16.msra.mxu0 %v6712_v38  ;;  %609 = vmatprep.subr.bf16.mxu1 %v10479_v0 }
  0x3d   :  { %568 = vmatprep.subr.bf16.mxu0 %v6718_v39 }
  0x3f   :  { %610 = vmatpush2.bf16.msra.mxu1 %v6724_v40 }
  0x40   :  { %569 = vmatpush2.bf16.msra.mxu0 %v6731_v41  ;;  %611 = vmatprep.subr.bf16.mxu1 %v10479_v0 }
  0x41   :  { %570 = vmatprep.subr.bf16.mxu0 %v6737_v42 }
  0x43   :  { %612 = vmatpush2.bf16.msra.mxu1 %v6743_v43 }
  0x44   :  { %571 = vmatpush2.bf16.msra.mxu0 %v6753_v45  ;;  %889 = vmatprep.subr.bf16.mxu1 %v10479_v0 }
  0x45   :  { %848 = vmatprep.subr.bf16.mxu0 %v6759_v46 }
  0x46   :  { %614 = vmatmul.mubr.bf16.vlgmr.msra.gmra.mxu1 %v6761_v47 }
  0x47   :  { %573 = vmatmul.mubr.bf16.vlgmr.msra.gmra.mxu0 %v6761_v47  ;;  %890 = vmatpush1.bf16.msra.mxu1 %v6767_v48  ;;  %v6888_v47 = vld [vmem:[%s10923_s29 + $0x20] ss:$12 sps:$4 sm:$0xff]  }
  0x48   :  { %849 = vmatpush1.bf16.msra.mxu0 %v6774_v49  ;;  %891 = vmatprep.subr.bf16.mxu1 %v10479_v0  ;;  %10933 = vst [vmem:[#allocation10_spill] sm:$0xff] %v6888_v47 }
  0x49   :  { %850 = vmatprep.subr.bf16.mxu0 %v6780_v50  ;;  %5245 = vmatprep.mubr.msk.bf16.mxu1 %vm536_vm0, %v110_v59 }
  0x4a   :  { %5244 = vmatprep.mubr.msk.bf16.mxu0 %vm536_vm0, %v110_v59  ;;  %v6882_v59 = vld [vmem:[%s10923_s29 + $0x1c] ss:$12 sps:$4 sm:$0xff]  }
  0x4b   :  { %892 = vmatpush1.bf16.msra.mxu1 %v6788_v51  ;;  %10932 = vst [vmem:[#allocation9_spill] sm:$0xff] %v6882_v59 }
  0x4c   :  { %851 = vmatpush1.bf16.msra.mxu0 %v6795_v52  ;;  %893 = vmatprep.subr.bf16.mxu1 %v10479_v0 }
  0x4d   :  { %852 = vmatprep.subr.bf16.mxu0 %v6801_v53 }
  0x4f   :  { %894 = vmatpush1.bf16.msra.mxu1 %v6807_v54 }
  0x50   :  { %853 = vmatpush1.bf16.msra.mxu0 %v6814_v55  ;;  %895 = vmatprep.subr.bf16.mxu1 %v10479_v0 }
  0x51   :  { %854 = vmatprep.subr.bf16.mxu0 %v6820_v56 }
  0x53   :  { %896 = vmatpush1.bf16.msra.mxu1 %v6829_v58 }
  0x54   :  { %855 = vmatpush1.bf16.msra.mxu0 %v6836_v60  ;;  %897 = vmatprep.subr.bf16.mxu1 %v10479_v0 }
  0x55   :  { %856 = vmatprep.subr.bf16.mxu0 %v6842_v61  ;;  %v5037_v61 = vld [vmem:[%s10924_s5 + $0x28] sm:$0xff] }
  0x57   :  { %898 = vmatpush1.bf16.msra.mxu1 %v6850_v62 }
  0x58   :  { %857 = vmatpush1.bf16.msra.mxu0 %v6857_v63  ;;  %899 = vmatprep.subr.bf16.mxu1 %v10479_v0  ;;  %v10955_v63 = vmov 0  }
  0x59   :  { %858 = vmatprep.subr.bf16.mxu0 %v6863_v28  ;;  %v6895_v28 = vld [vmem:[%s10923_s29 + $0x18] ss:$12 sps:$4 sm:$0xff]  }
  0x5a   :  { %10934 = vst [vmem:[#allocation11_spill] sm:$0xff] %v6895_v28 }
  0x5b   :  { %900 = vmatpush1.bf16.msra.mxu1 %v6869_v44  ;;  %v6901_v44 = vld [vmem:[%s10923_s29 + $0x4] ss:$12 sps:$4 sm:$0xff]  }
  0x5c   :  { %859 = vmatpush1.bf16.msra.mxu0 %v6876_v57  ;;  %901 = vmatprep.subr.bf16.mxu1 %v10479_v0  ;;  %10935 = vst [vmem:[#allocation12_spill] sm:$0xff] %v6901_v44  ;;  %v6907_v57 = vld [vmem:[%s10923_s29 + $0x8] ss:$12 sps:$4 sm:$0xff]  }
  0x5d   :  { %860 = vmatprep.subr.bf16.mxu0 %v6882_v59  ;;  %10936 = vst [vmem:[#allocation13_spill] sm:$0xff] %v6907_v57  ;;  %v6914_v59 = vld [vmem:[%s10923_s29] ss:$12 sps:$4 sm:$0xff]  }
  0x5e   :  { %10937 = vst [vmem:[#allocation14_spill] sm:$0xff] %v6914_v59 }
  0x5f   :  { %902 = vmatpush1.bf16.msra.mxu1 %v6888_v47  ;;  %v6920_v47 = vld [vmem:[%s10923_s29 + $0x13c] ss:$12 sps:$4 sm:$0xff]  }
  0x60   :  { %861 = vmatpush1.bf16.msra.mxu0 %v6895_v28  ;;  %903 = vmatprep.subr.bf16.mxu1 %v10479_v0  ;;  %10938 = vst [vmem:[#allocation15_spill] sm:$0xff] %v6920_v47  ;;  %v6926_v28 = vld [vmem:[%s10923_s29 + $0x140] ss:$12 sps:$4 sm:$0xff]  }
  0x61   :  { %862 = vmatprep.subr.bf16.mxu0 %v6901_v44  ;;  %10939 = vst [vmem:[#allocation16_spill] sm:$0xff] %v6926_v28  ;;  %v6933_v44 = vld [vmem:[%s10923_s29 + $0x138] ss:$12 sps:$4 sm:$0xff]  }
  0x62   :  { %10940 = vst [vmem:[#allocation17_spill] sm:$0xff] %v6933_v44 }
  0x63   :  { %904 = vmatpush1.bf16.msra.mxu1 %v6907_v57  ;;  %v6939_v57 = vld [vmem:[%s10923_s29 + $0x124] ss:$12 sps:$4 sm:$0xff]  }
  0x64   :  { %863 = vmatpush1.bf16.msra.mxu0 %v6914_v59  ;;  %909 = vmatprep.subr.bf16.mxu1 %v10479_v0  ;;  %10941 = vst [vmem:[#allocation18_spill] sm:$0xff] %v6939_v57  ;;  %v6945_v59 = vld [vmem:[%s10923_s29 + $0x128] ss:$12 sps:$4 sm:$0xff]  }
  0x65   :  { %868 = vmatprep.subr.bf16.mxu0 %v6920_v47  ;;  %10942 = vst [vmem:[#allocation19_spill] sm:$0xff] %v6945_v59  ;;  %v6952_v47 = vld [vmem:[%s10923_s29 + $0x120] ss:$12 sps:$4 sm:$0xff]  }
  0x66   :  { %10943 = vst [vmem:[#allocation20_spill] sm:$0xff] %v6952_v47 }
  0x67   :  { %910 = vmatpush2.bf16.msra.mxu1 %v6926_v28  ;;  %v6958_v28 = vld [vmem:[%s10923_s29 + $0x10c] ss:$12 sps:$4 sm:$0xff]  }
  0x68   :  { %869 = vmatpush2.bf16.msra.mxu0 %v6933_v44  ;;  %911 = vmatprep.subr.bf16.mxu1 %v10479_v0  ;;  %10944 = vst [vmem:[#allocation21_spill] sm:$0xff] %v6958_v28  ;;  %v6964_v44 = vld [vmem:[%s10923_s29 + $0x110] ss:$12 sps:$4 sm:$0xff]  }
  0x69   :  { %870 = vmatprep.subr.bf16.mxu0 %v6939_v57  ;;  %10945 = vst [vmem:[#allocation22_spill] sm:$0xff] %v6964_v44  ;;  %v6971_v57 = vld [vmem:[%s10923_s29 + $0x108] ss:$12 sps:$4 sm:$0xff]  }
  0x6a   :  { %10946 = vst [vmem:[#allocation23_spill] sm:$0xff] %v6971_v57 }
  0x6b   :  { %912 = vmatpush2.bf16.msra.mxu1 %v6945_v59  ;;  %v6977_v59 = vld [vmem:[%s10923_s29 + $0xf4] ss:$12 sps:$4 sm:$0xff]  }
  0x6c   :  { %871 = vmatpush2.bf16.msra.mxu0 %v6952_v47  ;;  %913 = vmatprep.subr.bf16.mxu1 %v10479_v0  ;;  %10947 = vst [vmem:[#allocation24_spill] sm:$0xff] %v6977_v59  ;;  %v6983_v47 = vld [vmem:[%s10923_s29 + $0xf8] ss:$12 sps:$4 sm:$0xff]  }
  0x6d   :  { %872 = vmatprep.subr.bf16.mxu0 %v6958_v28  ;;  %10948 = vst [vmem:[#allocation25_spill] sm:$0xff] %v6983_v47  ;;  %v6990_v28 = vld [vmem:[%s10923_s29 + $0xf0] ss:$12 sps:$4 sm:$0xff]  }
  0x6e   :  { %10949 = vst [vmem:[#allocation26_spill] sm:$0xff] %v6990_v28 }
  0x6f   :  { %914 = vmatpush2.bf16.msra.mxu1 %v6964_v44  ;;  %v6996_v44 = vld [vmem:[%s10923_s29 + $0xdc] ss:$12 sps:$4 sm:$0xff]  }
  0x70   :  { %873 = vmatpush2.bf16.msra.mxu0 %v6971_v57  ;;  %915 = vmatprep.subr.bf16.mxu1 %v10479_v0  ;;  %10950 = vst [vmem:[#allocation27_spill] sm:$0xff] %v6996_v44  ;;  %v7002_v57 = vld [vmem:[%s10923_s29 + $0xe0] ss:$12 sps:$4 sm:$0xff]  }
  0x71   :  { %874 = vmatprep.subr.bf16.mxu0 %v6977_v59  ;;  %10951 = vst [vmem:[#allocation28_spill] sm:$0xff] %v7002_v57  ;;  %v7009_v59 = vld [vmem:[%s10923_s29 + $0xd8] ss:$12 sps:$4 sm:$0xff]  }
  0x72   :  { %10952 = vst [vmem:[#allocation29_spill] sm:$0xff] %v7009_v59 }
  0x73   :  { %916 = vmatpush2.bf16.msra.mxu1 %v6983_v47  ;;  %v7015_v47 = vld [vmem:[%s10923_s29 + $0xc4] ss:$12 sps:$4 sm:$0xff]  }
  0x74   :  { %875 = vmatpush2.bf16.msra.mxu0 %v6990_v28  ;;  %917 = vmatprep.subr.bf16.mxu1 %v10479_v0  ;;  %10953 = vst [vmem:[#allocation30_spill] sm:$0xff] %v7015_v47  ;;  %v7021_v28 = vld [vmem:[%s10923_s29 + $0xc8] ss:$12 sps:$4 sm:$0xff]   ;;  %v107_v0 = vld [vmem:[%s10924_s5] sm:$0xff] }
  0x75   :  { %876 = vmatprep.subr.bf16.mxu0 %v6996_v44  ;;  %10954 = vst [vmem:[#allocation31_spill] sm:$0xff] %v7021_v28  ;;  %v7031_v44 = vld [vmem:[%s10923_s29 + $0xc0] ss:$12 sps:$4 sm:$0xff]   ;;  %v109_v62 = vpack.c.bf16 %v107_v0, %v107_v0 }
  0x76   :  { %10956 = vst [vmem:[#allocation32_spill] sm:$0xff] %v7031_v44  ;;  %v7059_v0 = vld [vmem:[%s10923_s29 + $0x334] ss:$12 sps:$4 sm:$0xff]  }
  0x77   :  { %918 = vmatpush2.bf16.msra.mxu1 %v7002_v57  ;;  %v7037_v57 = vld [vmem:[%s10923_s29 + $0x34c] ss:$12 sps:$4 sm:$0xff]   ;;  %10959 = vst [vmem:[#allocation35_spill] sm:$0xff] %v7059_v0 }
  0x78   :  { %877 = vmatpush2.bf16.msra.mxu0 %v7009_v59  ;;  %919 = vmatprep.subr.bf16.mxu1 %v10955_v63  ;;  %10957 = vst [vmem:[#allocation33_spill] sm:$0xff] %v7037_v57  ;;  %v7046_v59 = vld [vmem:[%s10923_s29 + $0x350] ss:$12 sps:$4 sm:$0xff]  }
  0x79   :  { %878 = vmatprep.subr.bf16.mxu0 %v7015_v47  ;;  %v7053_v47 = vld [vmem:[%s10923_s29 + $0x348] ss:$12 sps:$4 sm:$0xff]  }
  0x7a   :  { %10958 = vst [vmem:[#allocation34_spill] sm:$0xff] %v7053_v47 }
  0x7b   :  { %920 = vmatpush2.bf16.msra.mxu1 %v7021_v28  ;;  %v7061_v28 = vpack.c.bf16 %v5037_v61, %v5037_v61  ;;  %v7080_v61 = vld [vmem:[%s10923_s29 + $0x31c] ss:$12 sps:$4 sm:$0xff]  }
  0x7c   :  { %879 = vmatpush2.bf16.msra.mxu0 %v7031_v44  ;;  %1197 = vmatprep.subr.bf16.mxu1 %v10955_v63  ;;  %v7067_v44 = vld [vmem:[%s10923_s29 + $0x338] ss:$12 sps:$4 sm:$0xff]   ;;  %10962 = vst [vmem:[#allocation38_spill] sm:$0xff] %v7080_v61 }
  0x7d   :  { %1156 = vmatprep.subr.bf16.mxu0 %v7037_v57  ;;  %10960 = vst [vmem:[#allocation36_spill] sm:$0xff] %v7067_v44  ;;  %v7074_v57 = vld [vmem:[%s10923_s29 + $0x330] ss:$12 sps:$4 sm:$0xff]  }
  0x7e   :  { %922 = vmatmul.mubr.bf16.vlgmr.msra.gmra.mxu1 %v109_v62  ;;  %10961 = vst [vmem:[#allocation37_spill] sm:$0xff] %v7074_v57 }
  0x7f   :  { %881 = vmatmul.mubr.bf16.vlgmr.msra.gmra.mxu0 %v109_v62  ;;  %1198 = vmatpush1.bf16.msra.mxu1 %v7046_v59  ;;  %v7090_v62 = vld [vmem:[%s10923_s29 + $0x320] ss:$12 sps:$4 sm:$0xff]  }
  0x80   :  { %1157 = vmatpush1.bf16.msra.mxu0 %v7053_v47  ;;  %1199 = vmatprep.subr.bf16.mxu1 %v10955_v63  ;;  %10963 = vst [vmem:[#allocation39_spill] sm:$0xff] %v7090_v62  ;;  %v5036_v47 = vld [vmem:[%s10924_s5 + $0x20] sm:$0xff] }
  0x81   :  { %1158 = vmatprep.subr.bf16.mxu0 %v7059_v0  ;;  %5289 = vmatprep.mubr.msk.bf16.mxu1 %vm536_vm0, %v7061_v28  ;;  %v7097_v0 = vld [vmem:[%s10923_s29 + $0x318] ss:$12 sps:$4 sm:$0xff]  }
  0x82   :  { %5288 = vmatprep.mubr.msk.bf16.mxu0 %vm536_vm0, %v7061_v28  ;;  %10964 = vst [vmem:[#allocation40_spill] sm:$0xff] %v7097_v0 }
  0x83   :  { %1200 = vmatpush1.bf16.msra.mxu1 %v7067_v44  ;;  %v7103_v44 = vld [vmem:[%s10923_s29 + $0x304] ss:$12 sps:$4 sm:$0xff]  }
  0x84   :  { %1159 = vmatpush1.bf16.msra.mxu0 %v7074_v57  ;;  %1201 = vmatprep.subr.bf16.mxu1 %v10955_v63  ;;  %10965 = vst [vmem:[#allocation41_spill] sm:$0xff] %v7103_v44  ;;  %v7109_v57 = vld [vmem:[%s10923_s29 + $0x308] ss:$12 sps:$4 sm:$0xff]  }
  0x85   :  { %1160 = vmatprep.subr.bf16.mxu0 %v7080_v61  ;;  %10966 = vst [vmem:[#allocation42_spill] sm:$0xff] %v7109_v57  ;;  %v7116_v61 = vld [vmem:[%s10923_s29 + $0x300] ss:$12 sps:$4 sm:$0xff]  }
  0x86   :  { %10967 = vst [vmem:[#allocation43_spill] sm:$0xff] %v7116_v61 }
  0x87   :  { %1202 = vmatpush1.bf16.msra.mxu1 %v7090_v62  ;;  %v7122_v62 = vld [vmem:[%s10923_s29 + $0x2ec] ss:$12 sps:$4 sm:$0xff]  }
  0x88   :  { %1161 = vmatpush1.bf16.msra.mxu0 %v7097_v0  ;;  %1203 = vmatprep.subr.bf16.mxu1 %v10955_v63  ;;  %10968 = vst [vmem:[#allocation44_spill] sm:$0xff] %v7122_v62  ;;  %v7128_v0 = vld [vmem:[%s10923_s29 + $0x2f0] ss:$12 sps:$4 sm:$0xff]  }
  0x89   :  { %1162 = vmatprep.subr.bf16.mxu0 %v7103_v44  ;;  %10969 = vst [vmem:[#allocation45_spill] sm:$0xff] %v7128_v0  ;;  %v7135_v44 = vld [vmem:[%s10923_s29 + $0x2e8] ss:$12 sps:$4 sm:$0xff]  }
  0x8a   :  { %10970 = vst [vmem:[#allocation46_spill] sm:$0xff] %v7135_v44 }
  0x8b   :  { %1204 = vmatpush1.bf16.msra.mxu1 %v7109_v57  ;;  %v7141_v57 = vld [vmem:[%s10923_s29 + $0x2d4] ss:$12 sps:$4 sm:$0xff]  }
  0x8c   :  { %1163 = vmatpush1.bf16.msra.mxu0 %v7116_v61  ;;  %1205 = vmatprep.subr.bf16.mxu1 %v10955_v63  ;;  %10971 = vst [vmem:[#allocation47_spill] sm:$0xff] %v7141_v57  ;;  %v7147_v61 = vld [vmem:[%s10923_s29 + $0x2d8] ss:$12 sps:$4 sm:$0xff]  }
  0x8d   :  { %1164 = vmatprep.subr.bf16.mxu0 %v7122_v62  ;;  %10972 = vst [vmem:[#allocation48_spill] sm:$0xff] %v7147_v61  ;;  %v7154_v62 = vld [vmem:[%s10923_s29 + $0x2d0] ss:$12 sps:$4 sm:$0xff]  }
  0x8e   :  { %10973 = vst [vmem:[#allocation49_spill] sm:$0xff] %v7154_v62 }
  0x8f   :  { %1206 = vmatpush1.bf16.msra.mxu1 %v7128_v0  ;;  %v7160_v0 = vld [vmem:[%s10923_s29 + $0x2bc] ss:$12 sps:$4 sm:$0xff]  }
  0x90   :  { %1165 = vmatpush1.bf16.msra.mxu0 %v7135_v44  ;;  %1207 = vmatprep.subr.bf16.mxu1 %v10955_v63  ;;  %10974 = vst [vmem:[#allocation50_spill] sm:$0xff] %v7160_v0  ;;  %v7166_v44 = vld [vmem:[%s10923_s29 + $0x2c0] ss:$12 sps:$4 sm:$0xff]  }
  0x91   :  { %1166 = vmatprep.subr.bf16.mxu0 %v7141_v57  ;;  %10975 = vst [vmem:[#allocation51_spill] sm:$0xff] %v7166_v44  ;;  %v7173_v57 = vld [vmem:[%s10923_s29 + $0x2b8] ss:$12 sps:$4 sm:$0xff]  }
  0x92   :  { %10976 = vst [vmem:[#allocation52_spill] sm:$0xff] %v7173_v57 }
  0x93   :  { %1208 = vmatpush1.bf16.msra.mxu1 %v7147_v61  ;;  %v7179_v61 = vld [vmem:[%s10923_s29 + $0x2a4] ss:$12 sps:$4 sm:$0xff]  }
  0x94   :  { %1167 = vmatpush1.bf16.msra.mxu0 %v7154_v62  ;;  %1209 = vmatprep.subr.bf16.mxu1 %v10955_v63  ;;  %10977 = vst [vmem:[#allocation53_spill] sm:$0xff] %v7179_v61  ;;  %v7185_v62 = vld [vmem:[%s10923_s29 + $0x2a8] ss:$12 sps:$4 sm:$0xff]  }
  0x95   :  { %1168 = vmatprep.subr.bf16.mxu0 %v7160_v0  ;;  %10978 = vst [vmem:[#allocation54_spill] sm:$0xff] %v7185_v62  ;;  %v7192_v0 = vld [vmem:[%s10923_s29 + $0x2a0] ss:$12 sps:$4 sm:$0xff]  }
  0x96   :  { %10979 = vst [vmem:[#allocation55_spill] sm:$0xff] %v7192_v0 }
  0x97   :  { %1210 = vmatpush1.bf16.msra.mxu1 %v7166_v44  ;;  %v7198_v44 = vld [vmem:[%s10923_s29 + $0x3dc] ss:$12 sps:$4 sm:$0xff]  }
  0x98   :  { %1169 = vmatpush1.bf16.msra.mxu0 %v7173_v57  ;;  %1211 = vmatprep.subr.bf16.mxu1 %v10955_v63  ;;  %10980 = vst [vmem:[#allocation56_spill] sm:$0xff] %v7198_v44  ;;  %v7204_v57 = vld [vmem:[%s10923_s29 + $0x3e0] ss:$12 sps:$4 sm:$0xff]  }
  0x99   :  { %1170 = vmatprep.subr.bf16.mxu0 %v7179_v61  ;;  %10981 = vst [vmem:[#allocation57_spill] sm:$0xff] %v7204_v57  ;;  %v7211_v61 = vld [vmem:[%s10923_s29 + $0x3d8] ss:$12 sps:$4 sm:$0xff]  }
  0x9a   :  { %10982 = vst [vmem:[#allocation58_spill] sm:$0xff] %v7211_v61 }
  0x9b   :  { %1212 = vmatpush1.bf16.msra.mxu1 %v7185_v62  ;;  %v7217_v62 = vld [vmem:[%s10923_s29 + $0x3c4] ss:$12 sps:$4 sm:$0xff]  }
  0x9c   :  { %1171 = vmatpush1.bf16.msra.mxu0 %v7192_v0  ;;  %1217 = vmatprep.subr.bf16.mxu1 %v10955_v63  ;;  %10983 = vst [vmem:[#allocation59_spill] sm:$0xff] %v7217_v62  ;;  %v7223_v0 = vld [vmem:[%s10923_s29 + $0x3c8] ss:$12 sps:$4 sm:$0xff]  }
  0x9d   :  { %1176 = vmatprep.subr.bf16.mxu0 %v7198_v44  ;;  %10984 = vst [vmem:[#allocation60_spill] sm:$0xff] %v7223_v0  ;;  %v7230_v44 = vld [vmem:[%s10923_s29 + $0x3c0] ss:$12 sps:$4 sm:$0xff]  }
  0x9e   :  { %10985 = vst [vmem:[#allocation61_spill] sm:$0xff] %v7230_v44 }
  0x9f   :  { %1218 = vmatpush2.bf16.msra.mxu1 %v7204_v57  ;;  %v7236_v57 = vld [vmem:[%s10923_s29 + $0x3ac] ss:$12 sps:$4 sm:$0xff]  }
  0xa0   :  { %1177 = vmatpush2.bf16.msra.mxu0 %v7211_v61  ;;  %1219 = vmatprep.subr.bf16.mxu1 %v10955_v63  ;;  %10986 = vst [vmem:[#allocation62_spill] sm:$0xff] %v7236_v57  ;;  %v7242_v61 = vld [vmem:[%s10923_s29 + $0x3b0] ss:$12 sps:$4 sm:$0xff]  }
  0xa1   :  { %1178 = vmatprep.subr.bf16.mxu0 %v7217_v62  ;;  %10987 = vst [vmem:[#allocation63_spill] sm:$0xff] %v7242_v61  ;;  %v7249_v62 = vld [vmem:[%s10923_s29 + $0x3a8] ss:$12 sps:$4 sm:$0xff]  }
  0xa2   :  { %10988 = vst [vmem:[#allocation64_spill] sm:$0xff] %v7249_v62 }
  0xa3   :  { %1220 = vmatpush2.bf16.msra.mxu1 %v7223_v0  ;;  %v7255_v0 = vld [vmem:[%s10923_s29 + $0x394] ss:$12 sps:$4 sm:$0xff]  }
  0xa4   :  { %1179 = vmatpush2.bf16.msra.mxu0 %v7230_v44  ;;  %1221 = vmatprep.subr.bf16.mxu1 %v10955_v63  ;;  %10989 = vst [vmem:[#allocation65_spill] sm:$0xff] %v7255_v0  ;;  %v7261_v44 = vld [vmem:[%s10923_s29 + $0x398] ss:$12 sps:$4 sm:$0xff]  }
  0xa5   :  { %1180 = vmatprep.subr.bf16.mxu0 %v7236_v57  ;;  %10990 = vst [vmem:[#allocation66_spill] sm:$0xff] %v7261_v44  ;;  %v7268_v57 = vld [vmem:[%s10923_s29 + $0x390] ss:$12 sps:$4 sm:$0xff]  }
  0xa6   :  { %10991 = vst [vmem:[#allocation67_spill] sm:$0xff] %v7268_v57 }
  0xa7   :  { %1222 = vmatpush2.bf16.msra.mxu1 %v7242_v61  ;;  %v7274_v61 = vld [vmem:[%s10923_s29 + $0x37c] ss:$12 sps:$4 sm:$0xff]  }
  0xa8   :  { %1181 = vmatpush2.bf16.msra.mxu0 %v7249_v62  ;;  %1223 = vmatprep.subr.bf16.mxu1 %v10955_v63  ;;  %10992 = vst [vmem:[#allocation68_spill] sm:$0xff] %v7274_v61  ;;  %v7280_v62 = vld [vmem:[%s10923_s29 + $0x380] ss:$12 sps:$4 sm:$0xff]  }
  0xa9   :  { %1182 = vmatprep.subr.bf16.mxu0 %v7255_v0  ;;  %10993 = vst [vmem:[#allocation69_spill] sm:$0xff] %v7280_v62  ;;  %v7287_v0 = vld [vmem:[%s10923_s29 + $0x378] ss:$12 sps:$4 sm:$0xff]  }
  0xaa   :  { %10994 = vst [vmem:[#allocation70_spill] sm:$0xff] %v7287_v0 }
  0xab   :  { %1224 = vmatpush2.bf16.msra.mxu1 %v7261_v44  ;;  %v7293_v44 = vld [vmem:[%s10923_s29 + $0x364] ss:$12 sps:$4 sm:$0xff]  }
  0xac   :  { %1183 = vmatpush2.bf16.msra.mxu0 %v7268_v57  ;;  %1225 = vmatprep.subr.bf16.mxu1 %v10955_v63  ;;  %10995 = vst [vmem:[#allocation71_spill] sm:$0xff] %v7293_v44  ;;  %v7299_v57 = vld [vmem:[%s10923_s29 + $0x368] ss:$12 sps:$4 sm:$0xff]  }
  0xad   :  { %1184 = vmatprep.subr.bf16.mxu0 %v7274_v61  ;;  %10996 = vst [vmem:[#allocation72_spill] sm:$0xff] %v7299_v57  ;;  %v7309_v61 = vld [vmem:[%s10923_s29 + $0x360] ss:$12 sps:$4 sm:$0xff]  }
  0xae   :  { %10997 = vst [vmem:[#allocation73_spill] sm:$0xff] %v7309_v61 }
  0xaf   :  { %1226 = vmatpush2.bf16.msra.mxu1 %v7280_v62  ;;  %v7312_v62 = vpack.c.bf16 %v5036_v47, %v5036_v47  ;;  %v11033_v47 = vld [vmem:[#allocation36_spill] sm:$0xff] }
  0xb0   :  { %1185 = vmatpush2.bf16.msra.mxu0 %v7287_v0  ;;  %1227 = vmatprep.subr.bf16.mxu1 %v10955_v63 }
  0xb1   :  { %1186 = vmatprep.subr.bf16.mxu0 %v7293_v44 }
  0xb3   :  { %1228 = vmatpush2.bf16.msra.mxu1 %v7299_v57 }
  0xb4   :  { %1187 = vmatpush2.bf16.msra.mxu0 %v7309_v61  ;;  %1306 = vmatprep.subr.bf16.mxu1 %v10955_v63 }
  0xb5   :  { %1265 = vmatprep.subr.bf16.mxu0 %v6483_v1  ;;  %v10998_v1 = vld [vmem:[#allocation3_spill] sm:$0xff] }
  0xb6   :  { %1230 = vmatmul.mubr.bf16.vlgmr.msra.gmra.mxu1 %v7312_v62 }
  0xb7   :  { %1189 = vmatmul.mubr.bf16.vlgmr.msra.gmra.mxu0 %v7312_v62  ;;  %1307 = vmatpush1.bf16.msra.mxu1 %v6489_v2  ;;  %v10999_v2 = vld [vmem:[#allocation4_spill] sm:$0xff] }
  0xb8   :  { %1266 = vmatpush1.bf16.msra.mxu0 %v6495_v3  ;;  %1308 = vmatprep.subr.bf16.mxu1 %v10955_v63  ;;  %v11000_v3 = vld [vmem:[#allocation5_spill] sm:$0xff] }
  0xb9   :  { %1267 = vmatprep.subr.bf16.mxu0 %v6501_v4  ;;  %5290 = vmatprep.mubr.msk.bf16.mxu0 %vm536_vm0, %v7061_v28  ;;  %v11001_v4 = vld [vmem:[#allocation6_spill] sm:$0xff] }
  0xba   :  { %5291 = vmatprep.mubr.msk.bf16.mxu1 %vm536_vm0, %v7061_v28 }
  0xbb   :  { %1309 = vmatpush1.bf16.msra.mxu1 %v6508_v5  ;;  %v11002_v5 = vld [vmem:[#allocation7_spill] sm:$0xff] }
  0xbc   :  { %1268 = vmatpush1.bf16.msra.mxu0 %v6513_v6  ;;  %1310 = vmatprep.subr.bf16.mxu1 %v10955_v63  ;;  %v11003_v6 = vld [vmem:[#allocation8_spill] sm:$0xff] }
  0xbd   :  { %1269 = vmatprep.subr.bf16.mxu0 %v6519_v7  ;;  %v11004_v7 = vld [vmem:[#allocation9_spill] sm:$0xff] }
  0xbf   :  { %1311 = vmatpush1.bf16.msra.mxu1 %v6525_v8 }
  0xc0   :  { %1270 = vmatpush1.bf16.msra.mxu0 %v6532_v9  ;;  %1312 = vmatprep.subr.bf16.mxu1 %v10955_v63 }
  0xc1   :  { %1271 = vmatprep.subr.bf16.mxu0 %v6538_v10  ;;  %v11005_v10 = vld [vmem:[#allocation10_spill] sm:$0xff] }
  0xc3   :  { %1313 = vmatpush1.bf16.msra.mxu1 %v6544_v11  ;;  %v11006_v11 = vld [vmem:[#allocation11_spill] sm:$0xff] }
  0xc4   :  { %1272 = vmatpush1.bf16.msra.mxu0 %v6551_v12  ;;  %1314 = vmatprep.subr.bf16.mxu1 %v10955_v63 }
  0xc5   :  { %1273 = vmatprep.subr.bf16.mxu0 %v6557_v13 }
  0xc7   :  { %1315 = vmatpush1.bf16.msra.mxu1 %v6563_v14  ;;  %v11007_v14 = vld [vmem:[#allocation12_spill] sm:$0xff] }
  0xc8   :  { %1274 = vmatpush1.bf16.msra.mxu0 %v6570_v15  ;;  %1316 = vmatprep.subr.bf16.mxu1 %v10955_v63 }
  0xc9   :  { %1275 = vmatprep.subr.bf16.mxu0 %v6576_v16 }
  0xcb   :  { %1317 = vmatpush1.bf16.msra.mxu1 %v6582_v17  ;;  %v11008_v17 = vld [vmem:[#allocation13_spill] sm:$0xff] }
  0xcc   :  { %1276 = vmatpush1.bf16.msra.mxu0 %v6589_v18  ;;  %1318 = vmatprep.subr.bf16.mxu1 %v10955_v63  ;;  %v11009_v18 = vld [vmem:[#allocation14_spill] sm:$0xff] }
  0xcd   :  { %1277 = vmatprep.subr.bf16.mxu0 %v6595_v19 }
  0xcf   :  { %1319 = vmatpush1.bf16.msra.mxu1 %v6601_v20 }
  0xd0   :  { %1278 = vmatpush1.bf16.msra.mxu0 %v6608_v21  ;;  %1320 = vmatprep.subr.bf16.mxu1 %v10955_v63  ;;  %v11010_v21 = vld [vmem:[#allocation15_spill] sm:$0xff] }
  0xd1   :  { %1279 = vmatprep.subr.bf16.mxu0 %v6614_v22  ;;  %v11011_v22 = vld [vmem:[#allocation16_spill] sm:$0xff] }
  0xd3   :  { %1321 = vmatpush1.bf16.msra.mxu1 %v6620_v23  ;;  %v11012_v23 = vld [vmem:[#allocation17_spill] sm:$0xff] }
  0xd4   :  { %1280 = vmatpush1.bf16.msra.mxu0 %v6627_v24  ;;  %1326 = vmatprep.subr.bf16.mxu1 %v10955_v63  ;;  %v11013_v24 = vld [vmem:[#allocation18_spill] sm:$0xff] }
  0xd5   :  { %1285 = vmatprep.subr.bf16.mxu0 %v6633_v25  ;;  %v11014_v25 = vld [vmem:[#allocation19_spill] sm:$0xff] }
  0xd7   :  { %1327 = vmatpush2.bf16.msra.mxu1 %v6639_v26  ;;  %v11015_v26 = vld [vmem:[#allocation20_spill] sm:$0xff] }
  0xd8   :  { %1286 = vmatpush2.bf16.msra.mxu0 %v6646_v27  ;;  %1328 = vmatprep.subr.bf16.mxu1 %v10955_v63  ;;  %v11016_v27 = vld [vmem:[#allocation21_spill] sm:$0xff] }
  0xd9   :  { %1287 = vmatprep.subr.bf16.mxu0 %v6655_v29  ;;  %v11017_v29 = vld [vmem:[#allocation22_spill] sm:$0xff] }
  0xdb   :  { %1329 = vmatpush2.bf16.msra.mxu1 %v6663_v31  ;;  %v11019_v31 = vld [vmem:[#allocation24_spill] sm:$0xff] }
  0xdc   :  { %1288 = vmatpush2.bf16.msra.mxu0 %v6672_v32  ;;  %1330 = vmatprep.subr.bf16.mxu1 %v10955_v63  ;;  %v11020_v32 = vld [vmem:[#allocation25_spill] sm:$0xff] }
  0xdd   :  { %1289 = vmatprep.subr.bf16.mxu0 %v6678_v33  ;;  %v11021_v33 = vld [vmem:[#allocation26_spill] sm:$0xff] }
  0xdf   :  { %1331 = vmatpush2.bf16.msra.mxu1 %v6686_v34  ;;  %v11022_v34 = vld [vmem:[#allocation27_spill] sm:$0xff] }
  0xe0   :  { %1290 = vmatpush2.bf16.msra.mxu0 %v6693_v35  ;;  %1332 = vmatprep.subr.bf16.mxu1 %v10955_v63  ;;  %v11023_v35 = vld [vmem:[#allocation28_spill] sm:$0xff] }
  0xe1   :  { %1291 = vmatprep.subr.bf16.mxu0 %v6699_v36  ;;  %v11024_v36 = vld [vmem:[#allocation29_spill] sm:$0xff] }
  0xe3   :  { %1333 = vmatpush2.bf16.msra.mxu1 %v6705_v37  ;;  %v11025_v37 = vld [vmem:[#allocation30_spill] sm:$0xff] }
  0xe4   :  { %1292 = vmatpush2.bf16.msra.mxu0 %v6712_v38  ;;  %1334 = vmatprep.subr.bf16.mxu1 %v10955_v63  ;;  %v5039_v38 = vld [vmem:[%s10924_s5 + $0x38] sm:$0xff] }
  0xe5   :  { %1293 = vmatprep.subr.bf16.mxu0 %v6718_v39  ;;  %v11026_v39 = vld [vmem:[#allocation31_spill] sm:$0xff] }
  0xe7   :  { %1335 = vmatpush2.bf16.msra.mxu1 %v6724_v40  ;;  %v11027_v40 = vld [vmem:[#allocation32_spill] sm:$0xff] }
  0xe8   :  { %1294 = vmatpush2.bf16.msra.mxu0 %v6731_v41  ;;  %1336 = vmatprep.subr.bf16.mxu1 %v10955_v63  ;;  %v11028_v41 = vld [vmem:[#allocation33_spill] sm:$0xff] }
  0xe9   :  { %1295 = vmatprep.subr.bf16.mxu0 %v6737_v42  ;;  %v7451_v42 = vpack.c.bf16 %v5039_v38, %v5039_v38 }
  0xeb   :  { %1337 = vmatpush2.bf16.msra.mxu1 %v6743_v43  ;;  %11029 = vst [vmem:[#allocation3_spill] sm:$0xff] %v7451_v42  ;;  %v11030_v43 = vld [vmem:[#allocation2_spill] sm:$0xff] }
  0xec   :  { %1296 = vmatpush2.bf16.msra.mxu0 %v6753_v45  ;;  %1387 = vmatprep.subr.bf16.mxu1 %v10955_v63  ;;  %v11031_v45 = vld [vmem:[#allocation34_spill] sm:$0xff] }
  0xed   :  { %1346 = vmatprep.subr.bf16.mxu0 %v6759_v46  ;;  %v11032_v46 = vld [vmem:[#allocation35_spill] sm:$0xff] }
  0xee   :  { %1339 = vmatmul.mubr.bf16.vlgmr.msra.gmra.mxu1 %v7312_v62 }
  0xef   :  { %1298 = vmatmul.mubr.bf16.vlgmr.msra.gmra.mxu0 %v7312_v62  ;;  %1388 = vmatpush1.bf16.msra.mxu1 %v6767_v48  ;;  %v11034_v48 = vld [vmem:[#allocation37_spill] sm:$0xff] }
  0xf0   :  { %1347 = vmatpush1.bf16.msra.mxu0 %v6774_v49  ;;  %1389 = vmatprep.subr.bf16.mxu1 %v10955_v63  ;;  %v11035_v49 = vld [vmem:[#allocation38_spill] sm:$0xff] }
  0xf1   :  { %1348 = vmatprep.subr.bf16.mxu0 %v6780_v50  ;;  %5293 = vmatprep.mubr.msk.bf16.mxu1 %vm536_vm0, %v6657_v30  ;;  %v11036_v50 = vld [vmem:[#allocation39_spill] sm:$0xff] }
  0xf2   :  { %5292 = vmatprep.mubr.msk.bf16.mxu0 %vm536_vm0, %v6657_v30  ;;  %v11018_v30 = vld [vmem:[#allocation23_spill] sm:$0xff] }
  0xf3   :  { %1390 = vmatpush1.bf16.msra.mxu1 %v6788_v51  ;;  %v11037_v51 = vld [vmem:[#allocation40_spill] sm:$0xff] }
  0xf4   :  { %1349 = vmatpush1.bf16.msra.mxu0 %v6795_v52  ;;  %1391 = vmatprep.subr.bf16.mxu1 %v10955_v63  ;;  %v11038_v52 = vld [vmem:[#allocation41_spill] sm:$0xff] }
  0xf5   :  { %1350 = vmatprep.subr.bf16.mxu0 %v6801_v53  ;;  %v11039_v53 = vld [vmem:[#allocation42_spill] sm:$0xff] }
  0xf7   :  { %1392 = vmatpush1.bf16.msra.mxu1 %v6807_v54  ;;  %v11040_v54 = vld [vmem:[#allocation43_spill] sm:$0xff] }
  0xf8   :  { %1351 = vmatpush1.bf16.msra.mxu0 %v6814_v55  ;;  %1393 = vmatprep.subr.bf16.mxu1 %v10955_v63  ;;  %v11041_v55 = vld [vmem:[#allocation44_spill] sm:$0xff] }
  0xf9   :  { %1352 = vmatprep.subr.bf16.mxu0 %v6820_v56  ;;  %v11042_v56 = vld [vmem:[#allocation45_spill] sm:$0xff] }
  0xfb   :  { %1394 = vmatpush1.bf16.msra.mxu1 %v6829_v58  ;;  %v11043_v58 = vld [vmem:[#allocation46_spill] sm:$0xff] }
  0xfc   :  { %1353 = vmatpush1.bf16.msra.mxu0 %v6836_v60  ;;  %1395 = vmatprep.subr.bf16.mxu1 %v10955_v63  ;;  %v11044_v60 = vld [vmem:[#allocation47_spill] sm:$0xff] }
  0xfd   :  { %1354 = vmatprep.subr.bf16.mxu0 %v10998_v1  ;;  %v11045_v1 = vld [vmem:[#allocation48_spill] sm:$0xff] }
  0xff   :  { %1396 = vmatpush1.bf16.msra.mxu1 %v10999_v2  ;;  %v11046_v2 = vld [vmem:[#allocation49_spill] sm:$0xff] }
 0x100   :  { %1355 = vmatpush1.bf16.msra.mxu0 %v11000_v3  ;;  %1397 = vmatprep.subr.bf16.mxu1 %v10955_v63  ;;  %v11047_v3 = vld [vmem:[#allocation50_spill] sm:$0xff] }
 0x101   :  { %1356 = vmatprep.subr.bf16.mxu0 %v11001_v4 }
 0x103   :  { %1398 = vmatpush1.bf16.msra.mxu1 %v11002_v5 }
 0x104   :  { %1357 = vmatpush1.bf16.msra.mxu0 %v11003_v6  ;;  %1399 = vmatprep.subr.bf16.mxu1 %v10955_v63 }
 0x105   :  { %1358 = vmatprep.subr.bf16.mxu0 %v11004_v7 }
 0x106   :  { %v7410_v8 = vpop.f32.mrf.mxu1 }
 0x107   :  { %v7412_v9 = vpop.f32.mrf.mxu0  ;;  %1400 = vmatpush1.bf16.msra.mxu1 %v11005_v10 }
 0x108   :  { %1359 = vmatpush1.bf16.msra.mxu0 %v11006_v11  ;;  %1401 = vmatprep.subr.bf16.mxu1 %v10955_v63  ;;  %v617_v12 = vpop.f32.mrf.mxu1 }
 0x109   :  { %v7417_v13 = vpop.f32.mrf.mxu0  ;;  %1360 = vmatprep.subr.bf16.mxu0 %v11007_v14 }
 0x10a   :  { %v618_v15 = vpop.f32.mrf.mxu1 }
 0x10b   :  { %v578_v16 = vpop.f32.mrf.mxu0  ;;  %1402 = vmatpush1.bf16.msra.mxu1 %v11008_v17  ;;  %v11048_v15 = vld [vmem:[#allocation51_spill] sm:$0xff] }
 0x10c   :  { %1361 = vmatpush1.bf16.msra.mxu0 %v11009_v18  ;;  %1407 = vmatprep.subr.bf16.mxu1 %v10955_v63  ;;  %v619_v19 = vpop.f32.mrf.mxu1 }
 0x10d   :  { %v579_v20 = vpop.f32.mrf.mxu0  ;;  %1366 = vmatprep.subr.bf16.mxu0 %v11010_v21  ;;  %v11049_v19 = vld [vmem:[#allocation52_spill] sm:$0xff] }
 0x10f   :  { %1408 = vmatpush2.bf16.msra.mxu1 %v11011_v22 }
 0x110   :  { %1367 = vmatpush2.bf16.msra.mxu0 %v11012_v23  ;;  %1409 = vmatprep.subr.bf16.mxu1 %v10955_v63 }
 0x111   :  { %1368 = vmatprep.subr.bf16.mxu0 %v11013_v24 }
 0x113   :  { %1410 = vmatpush2.bf16.msra.mxu1 %v11014_v25 }
 0x114   :  { %1369 = vmatpush2.bf16.msra.mxu0 %v11015_v26  ;;  %1411 = vmatprep.subr.bf16.mxu1 %v10955_v63 }
 0x115   :  { %1370 = vmatprep.subr.bf16.mxu0 %v11016_v27 }
 0x117   :  { %1412 = vmatpush2.bf16.msra.mxu1 %v11017_v29 }
 0x118   :  { %1371 = vmatpush2.bf16.msra.mxu0 %v11018_v30  ;;  %1413 = vmatprep.subr.bf16.mxu1 %v10955_v63 }
 0x119   :  { %1372 = vmatprep.subr.bf16.mxu0 %v11019_v31 }
 0x11b   :  { %1414 = vmatpush2.bf16.msra.mxu1 %v11020_v32 }
 0x11c   :  { %1373 = vmatpush2.bf16.msra.mxu0 %v11021_v33  ;;  %1415 = vmatprep.subr.bf16.mxu1 %v10955_v63 }
 0x11d   :  { %1374 = vmatprep.subr.bf16.mxu0 %v11022_v34 }
 0x11f   :  { %1416 = vmatpush2.bf16.msra.mxu1 %v11023_v35 }
 0x120   :  { %1375 = vmatpush2.bf16.msra.mxu0 %v11024_v36  ;;  %1417 = vmatprep.subr.bf16.mxu1 %v10955_v63 }
 0x121   :  { %1376 = vmatprep.subr.bf16.mxu0 %v11025_v37 }
 0x123   :  { %1418 = vmatpush2.bf16.msra.mxu1 %v11026_v39 }
 0x124   :  { %1377 = vmatpush2.bf16.msra.mxu0 %v11027_v40  ;;  %1471 = vmatprep.subr.bf16.mxu1 %v10955_v63 }
 0x125   :  { %1430 = vmatprep.subr.bf16.mxu0 %v11028_v41 }
 0x126   :  { %1420 = vmatmul.mubr.bf16.vlgmr.msra.gmra.mxu1 %v11030_v43 }
 0x127   :  { %1379 = vmatmul.mubr.bf16.vlgmr.msra.gmra.mxu0 %v11030_v43  ;;  %1472 = vmatpush1.bf16.msra.mxu1 %v7046_v59  ;;  %v11050_v43 = vld [vmem:[#allocation53_spill] sm:$0xff] }
 0x128   :  { %1431 = vmatpush1.bf16.msra.mxu0 %v11031_v45  ;;  %1473 = vmatprep.subr.bf16.mxu1 %v10955_v63 }
 0x129   :  { %1432 = vmatprep.subr.bf16.mxu0 %v11032_v46  ;;  %5295 = vmatprep.mubr.msk.bf16.mxu1 %vm536_vm0, %v7451_v42 }
 0x12a   :  { %5294 = vmatprep.mubr.msk.bf16.mxu0 %vm536_vm0, %v7451_v42 }
 0x12b   :  { %1474 = vmatpush1.bf16.msra.mxu1 %v11033_v47 }
 0x12c   :  { %1433 = vmatpush1.bf16.msra.mxu0 %v11034_v48  ;;  %1475 = vmatprep.subr.bf16.mxu1 %v10955_v63 }
 0x12d   :  { %1434 = vmatprep.subr.bf16.mxu0 %v11035_v49 }
 0x12f   :  { %1476 = vmatpush1.bf16.msra.mxu1 %v11036_v50 }
 0x130   :  { %1435 = vmatpush1.bf16.msra.mxu0 %v11037_v51  ;;  %1477 = vmatprep.subr.bf16.mxu1 %v10955_v63 }
 0x131   :  { %1436 = vmatprep.subr.bf16.mxu0 %v11038_v52 }
 0x133   :  { %1478 = vmatpush1.bf16.msra.mxu1 %v11039_v53 }
 0x134   :  { %1437 = vmatpush1.bf16.msra.mxu0 %v11040_v54  ;;  %1479 = vmatprep.subr.bf16.mxu1 %v10955_v63 }
 0x135   :  { %1438 = vmatprep.subr.bf16.mxu0 %v11041_v55 }
 0x137   :  { %1480 = vmatpush1.bf16.msra.mxu1 %v11042_v56 }
 0x138   :  { %1439 = vmatpush1.bf16.msra.mxu0 %v11043_v58  ;;  %1481 = vmatprep.subr.bf16.mxu1 %v10955_v63 }
 0x139   :  { %1440 = vmatprep.subr.bf16.mxu0 %v11044_v60 }
 0x13b   :  { %1482 = vmatpush1.bf16.msra.mxu1 %v11045_v1  ;;  %v11052_v1 = vld [vmem:[#allocation55_spill] sm:$0xff] }
 0x13c   :  { %1441 = vmatpush1.bf16.msra.mxu0 %v11046_v2  ;;  %1483 = vmatprep.subr.bf16.mxu1 %v10955_v63 }
 0x13d   :  { %1442 = vmatprep.subr.bf16.mxu0 %v11047_v3 }
 0x13e   :  { %v923_v4 = vpop.f32.mrf.mxu1 }
 0x13f   :  { %v7484_v5 = vadd.f32 %v923_v4, %v7410_v8  ;;  %v882_v12 = vpop.f32.mrf.mxu0  ;;  %1484 = vmatpush1.bf16.msra.mxu1 %v11048_v15  ;;  %v11051_v4 = vld [vmem:[#allocation54_spill] sm:$0xff]  ;;  %v11054_v15 = vld [vmem:[#allocation57_spill] sm:$0xff] }
 0x140   :  { %v7488_v16 = vadd.f32 %v882_v12, %v7412_v9  ;;  %1443 = vmatpush1.bf16.msra.mxu0 %v11049_v19  ;;  %1485 = vmatprep.subr.bf16.mxu1 %v10955_v63  ;;  %v925_v20 = vpop.f32.mrf.mxu1  ;;  %v11053_v19 = vld [vmem:[#allocation56_spill] sm:$0xff] }
 0x141   :  { %v884_v38 = vpop.f32.mrf.mxu0  ;;  %1444 = vmatprep.subr.bf16.mxu0 %v11050_v43  ;;  %v11055_v20 = vld [vmem:[#allocation58_spill] sm:$0xff] }
 0x142   :  { %v7494_v3 = vadd.f32 %v884_v38, %v7417_v13  ;;  %v926_v2 = vpop.f32.mrf.mxu1  ;;  %v11056_v13 = vld [vmem:[#allocation59_spill] sm:$0xff]  ;;  %v11058_v38 = vld [vmem:[#allocation61_spill] sm:$0xff] }
 0x143   :  { %v886_v8 = vpop.f32.mrf.mxu0  ;;  %1486 = vmatpush1.bf16.msra.mxu1 %v11051_v4  ;;  %v11057_v2 = vld [vmem:[#allocation60_spill] sm:$0xff] }
 0x144   :  { %1445 = vmatpush1.bf16.msra.mxu0 %v11052_v1  ;;  %1491 = vmatprep.subr.bf16.mxu1 %v10955_v63  ;;  %v927_v9 = vpop.f32.mrf.mxu1  ;;  %v11059_v8 = vld [vmem:[#allocation62_spill] sm:$0xff] }
 0x145   :  { %v887_v12 = vpop.f32.mrf.mxu0  ;;  %1450 = vmatprep.subr.bf16.mxu0 %v11053_v19  ;;  %v11060_v9 = vld [vmem:[#allocation63_spill] sm:$0xff] }
 0x146   :  { %v11061_v12 = vld [vmem:[#allocation64_spill] sm:$0xff]  ;;  %v11064_v19 = vld [vmem:[#allocation67_spill] sm:$0xff] }
 0x147   :  { %1492 = vmatpush2.bf16.msra.mxu1 %v11054_v15  ;;  %v11062_v15 = vld [vmem:[#allocation65_spill] sm:$0xff] }
 0x148   :  { %1451 = vmatpush2.bf16.msra.mxu0 %v11055_v20  ;;  %1493 = vmatprep.subr.bf16.mxu1 %v10955_v63  ;;  %v11063_v20 = vld [vmem:[#allocation66_spill] sm:$0xff] }
 0x149   :  { %1452 = vmatprep.subr.bf16.mxu0 %v11056_v13 }
 0x14b   :  { %1494 = vmatpush2.bf16.msra.mxu1 %v11057_v2  ;;  %v11065_v2 = vld [vmem:[#allocation68_spill] sm:$0xff] }
 0x14c   :  { %1453 = vmatpush2.bf16.msra.mxu0 %v11058_v38  ;;  %1495 = vmatprep.subr.bf16.mxu1 %v10955_v63  ;;  %v11066_v38 = vld [vmem:[#allocation69_spill] sm:$0xff] }
 0x14d   :  { %1454 = vmatprep.subr.bf16.mxu0 %v11059_v8 }
 0x14f   :  { %1496 = vmatpush2.bf16.msra.mxu1 %v11060_v9  ;;  %v5038_v9 = vld [vmem:[%s10924_s5 + $0x30] sm:$0xff] }
 0x150   :  { %1455 = vmatpush2.bf16.msra.mxu0 %v11061_v12  ;;  %1497 = vmatprep.subr.bf16.mxu1 %v10955_v63 }
 0x151   :  { %1456 = vmatprep.subr.bf16.mxu0 %v11062_v15  ;;  %v7523_v15 = vpack.c.bf16 %v5038_v9, %v5038_v9  ;;  %v7539_v9 = vld [vmem:[%s10923_s29 + $0x200] ss:$12 sps:$4 sm:$0xff]  }
 0x152   :  { %11069 = vst [vmem:[#allocation6_spill] sm:$0xff] %v7539_v9 }
 0x153   :  { %1498 = vmatpush2.bf16.msra.mxu1 %v11063_v20  ;;  %11067 = vst [vmem:[#allocation4_spill] sm:$0xff] %v7523_v15 }
 0x154   :  { %1457 = vmatpush2.bf16.msra.mxu0 %v11064_v19  ;;  %1499 = vmatprep.subr.bf16.mxu1 %v10955_v63 }
 0x155   :  { %1458 = vmatprep.subr.bf16.mxu0 %v11065_v2 }
 0x157   :  { %1500 = vmatpush2.bf16.msra.mxu1 %v11066_v38  ;;  %v7531_v38 = vld [vmem:[%s10923_s29 + $0x1fc] ss:$12 sps:$4 sm:$0xff]  }
 0x158   :  { %1459 = vmatpush2.bf16.msra.mxu0 %v7287_v0  ;;  %1501 = vmatprep.subr.bf16.mxu1 %v10955_v63  ;;  %11068 = vst [vmem:[#allocation5_spill] sm:$0xff] %v7531_v38  ;;  %v7669_v0 = vld [vmem:[%s10923_s29 + $0x168] ss:$12 sps:$4 sm:$0xff]  }
 0x159   :  { %1460 = vmatprep.subr.bf16.mxu0 %v7293_v44  ;;  %v7660_v44 = vld [vmem:[%s10923_s29 + $0x170] ss:$12 sps:$4 sm:$0xff]   ;;  %11088 = vst [vmem:[#allocation25_spill] sm:$0xff] %v7669_v0 }
 0x15b   :  { %1502 = vmatpush2.bf16.msra.mxu1 %v7299_v57 }
 0x15c   :  { %1461 = vmatpush2.bf16.msra.mxu0 %v7309_v61  ;;  %1564 = vmatprep.subr.bf16.mxu1 %v10955_v63  ;;  %v7545_v61 = vld [vmem:[%s10923_s29 + $0x1f8] ss:$12 sps:$4 sm:$0xff]  }
 0x15d   :  { %1523 = vmatprep.subr.bf16.mxu0 %v7531_v38  ;;  %11070 = vst [vmem:[#allocation7_spill] sm:$0xff] %v7545_v61  ;;  %v7552_v38 = vld [vmem:[%s10923_s29 + $0x1e4] ss:$12 sps:$4 sm:$0xff]  }
 0x15e   :  { %1504 = vmatmul.mubr.bf16.vlgmr.msra.gmra.mxu1 %v7523_v15  ;;  %11071 = vst [vmem:[#allocation8_spill] sm:$0xff] %v7552_v38 }
 0x15f   :  { %1463 = vmatmul.mubr.bf16.vlgmr.msra.gmra.mxu0 %v7523_v15  ;;  %1565 = vmatpush1.bf16.msra.mxu1 %v7539_v9  ;;  %v7562_v9 = vld [vmem:[%s10923_s29 + $0x1e8] ss:$12 sps:$4 sm:$0xff]  }
 0x160   :  { %1524 = vmatpush1.bf16.msra.mxu0 %v7545_v61  ;;  %1566 = vmatprep.subr.bf16.mxu1 %v10955_v63  ;;  %11072 = vst [vmem:[#allocation9_spill] sm:$0xff] %v7562_v9  ;;  %v7568_v61 = vld [vmem:[%s10923_s29 + $0x1e0] ss:$12 sps:$4 sm:$0xff]  }
 0x161   :  { %1525 = vmatprep.subr.bf16.mxu0 %v7552_v38  ;;  %5296 = vmatprep.mubr.msk.bf16.mxu0 %vm536_vm0, %v7451_v42  ;;  %11073 = vst [vmem:[#allocation10_spill] sm:$0xff] %v7568_v61 }
 0x162   :  { %5297 = vmatprep.mubr.msk.bf16.mxu1 %vm536_vm0, %v7451_v42  ;;  %v7575_v42 = vld [vmem:[%s10923_s29 + $0x1cc] ss:$12 sps:$4 sm:$0xff]  }
 0x163   :  { %1567 = vmatpush1.bf16.msra.mxu1 %v7562_v9  ;;  %11074 = vst [vmem:[#allocation11_spill] sm:$0xff] %v7575_v42  ;;  %v7581_v9 = vld [vmem:[%s10923_s29 + $0x1d0] ss:$12 sps:$4 sm:$0xff]  }
 0x164   :  { %1526 = vmatpush1.bf16.msra.mxu0 %v7568_v61  ;;  %1568 = vmatprep.subr.bf16.mxu1 %v10955_v63  ;;  %11075 = vst [vmem:[#allocation12_spill] sm:$0xff] %v7581_v9  ;;  %v7587_v61 = vld [vmem:[%s10923_s29 + $0x1c8] ss:$12 sps:$4 sm:$0xff]  }
 0x165   :  { %1527 = vmatprep.subr.bf16.mxu0 %v7575_v42  ;;  %11076 = vst [vmem:[#allocation13_spill] sm:$0xff] %v7587_v61  ;;  %v7594_v42 = vld [vmem:[%s10923_s29 + $0x1b4] ss:$12 sps:$4 sm:$0xff]  }
 0x166   :  { %11077 = vst [vmem:[#allocation14_spill] sm:$0xff] %v7594_v42 }
 0x167   :  { %1569 = vmatpush1.bf16.msra.mxu1 %v7581_v9  ;;  %v7600_v9 = vld [vmem:[%s10923_s29 + $0x1b8] ss:$12 sps:$4 sm:$0xff]  }
 0x168   :  { %1528 = vmatpush1.bf16.msra.mxu0 %v7587_v61  ;;  %1570 = vmatprep.subr.bf16.mxu1 %v10955_v63  ;;  %11078 = vst [vmem:[#allocation15_spill] sm:$0xff] %v7600_v9  ;;  %v7606_v61 = vld [vmem:[%s10923_s29 + $0x1b0] ss:$12 sps:$4 sm:$0xff]  }
 0x169   :  { %1529 = vmatprep.subr.bf16.mxu0 %v7594_v42  ;;  %11079 = vst [vmem:[#allocation16_spill] sm:$0xff] %v7606_v61  ;;  %v7613_v42 = vld [vmem:[%s10923_s29 + $0x19c] ss:$12 sps:$4 sm:$0xff]  }
 0x16a   :  { %11080 = vst [vmem:[#allocation17_spill] sm:$0xff] %v7613_v42 }
 0x16b   :  { %1571 = vmatpush1.bf16.msra.mxu1 %v7600_v9  ;;  %v7619_v9 = vld [vmem:[%s10923_s29 + $0x1a0] ss:$12 sps:$4 sm:$0xff]  }
 0x16c   :  { %1530 = vmatpush1.bf16.msra.mxu0 %v7606_v61  ;;  %1572 = vmatprep.subr.bf16.mxu1 %v10955_v63  ;;  %11081 = vst [vmem:[#allocation18_spill] sm:$0xff] %v7619_v9  ;;  %v7625_v61 = vld [vmem:[%s10923_s29 + $0x198] ss:$12 sps:$4 sm:$0xff]  }
 0x16d   :  { %1531 = vmatprep.subr.bf16.mxu0 %v7613_v42  ;;  %11082 = vst [vmem:[#allocation19_spill] sm:$0xff] %v7625_v61  ;;  %v7632_v42 = vld [vmem:[%s10923_s29 + $0x184] ss:$12 sps:$4 sm:$0xff]  }
 0x16e   :  { %11083 = vst [vmem:[#allocation20_spill] sm:$0xff] %v7632_v42 }
 0x16f   :  { %1573 = vmatpush1.bf16.msra.mxu1 %v7619_v9  ;;  %v7638_v9 = vld [vmem:[%s10923_s29 + $0x188] ss:$12 sps:$4 sm:$0xff]  }
 0x170   :  { %1532 = vmatpush1.bf16.msra.mxu0 %v7625_v61  ;;  %1574 = vmatprep.subr.bf16.mxu1 %v10955_v63  ;;  %11084 = vst [vmem:[#allocation21_spill] sm:$0xff] %v7638_v9  ;;  %v7644_v61 = vld [vmem:[%s10923_s29 + $0x180] ss:$12 sps:$4 sm:$0xff]  }
 0x171   :  { %1533 = vmatprep.subr.bf16.mxu0 %v7632_v42  ;;  %11085 = vst [vmem:[#allocation22_spill] sm:$0xff] %v7644_v61  ;;  %v7651_v42 = vld [vmem:[%s10923_s29 + $0x16c] ss:$12 sps:$4 sm:$0xff]  }
 0x173   :  { %1575 = vmatpush1.bf16.msra.mxu1 %v7638_v9 }
 0x174   :  { %1534 = vmatpush1.bf16.msra.mxu0 %v7644_v61  ;;  %1576 = vmatprep.subr.bf16.mxu1 %v10955_v63 }
 0x175   :  { %1535 = vmatprep.subr.bf16.mxu0 %v7651_v42 }
 0x176   :  { %v1231_v38 = vpop.f32.mrf.mxu1 }
 0x177   :  { %v7655_v57 = vadd.f32 %v1231_v38, %v7484_v5  ;;  %v1190_v9 = vpop.f32.mrf.mxu0  ;;  %1577 = vmatpush1.bf16.msra.mxu1 %v7660_v44 }
 0x178   :  { %v7664_v61 = vadd.f32 %v1190_v9, %v7488_v16  ;;  %1536 = vmatpush1.bf16.msra.mxu0 %v7669_v0  ;;  %1578 = vmatprep.subr.bf16.mxu1 %v10955_v63  ;;  %v1233_v5 = vpop.f32.mrf.mxu1  ;;  %v7685_v0 = vld [vmem:[%s10923_s29 + $0x158] ss:$12 sps:$4 sm:$0xff]  }
 0x179   :  { %11086 = vst [vmem:[#allocation23_spill] sm:$0xff] %v7655_v57  ;;  %v1192_v38 = vpop.f32.mrf.mxu0  ;;  %v7676_v57 = vld [vmem:[%s10923_s29 + $0x154] ss:$12 sps:$4 sm:$0xff]   ;;  %v7691_v5 = vld [vmem:[%s10923_s29 + $0x150] ss:$12 sps:$4 sm:$0xff]  }
 0x17a   :  { %11087 = vst [vmem:[#allocation24_spill] sm:$0xff] %v7664_v61  ;;  %1537 = vmatprep.subr.bf16.mxu0 %v7676_v57  ;;  %v7680_v16 = vadd.f32 %v1192_v38, %v7494_v3  ;;  %v1234_v9 = vpop.f32.mrf.mxu1 }
 0x17b   :  { %v1194_v61 = vpop.f32.mrf.mxu0  ;;  %1579 = vmatpush1.bf16.msra.mxu1 %v7685_v0  ;;  %v7704_v9 = vld [vmem:[%s10923_s29 + $0x290] ss:$12 sps:$4 sm:$0xff]  }
 0x17c   :  { %11089 = vst [vmem:[#allocation26_spill] sm:$0xff] %v7680_v16  ;;  %1538 = vmatpush1.bf16.msra.mxu0 %v7691_v5  ;;  %1584 = vmatprep.subr.bf16.mxu1 %v10955_v63  ;;  %v1235_v3 = vpop.f32.mrf.mxu1  ;;  %v7698_v61 = vld [vmem:[%s10923_s29 + $0x28c] ss:$12 sps:$4 sm:$0xff]   ;;  %11090 = vst [vmem:[#allocation27_spill] sm:$0xff] %v7704_v9  ;;  %v7710_v16 = vld [vmem:[%s10923_s29 + $0x288] ss:$12 sps:$4 sm:$0xff]  }
 0x17d   :  { %v1195_v38 = vpop.f32.mrf.mxu0  ;;  %1543 = vmatprep.subr.bf16.mxu0 %v7698_v61  ;;  %11091 = vst [vmem:[#allocation28_spill] sm:$0xff] %v7710_v16  ;;  %v7717_v3 = vld [vmem:[%s10923_s29 + $0x274] ss:$12 sps:$4 sm:$0xff]  }
 0x17e   :  { %11092 = vst [vmem:[#allocation29_spill] sm:$0xff] %v7717_v3  ;;  %v7723_v38 = vld [vmem:[%s10923_s29 + $0x278] ss:$12 sps:$4 sm:$0xff]  }
 0x17f   :  { %1585 = vmatpush2.bf16.msra.mxu1 %v7704_v9  ;;  %11093 = vst [vmem:[#allocation30_spill] sm:$0xff] %v7723_v38 }
 0x180   :  { %1544 = vmatpush2.bf16.msra.mxu0 %v7710_v16  ;;  %1586 = vmatprep.subr.bf16.mxu1 %v10955_v63  ;;  %v7729_v16 = vld [vmem:[%s10923_s29 + $0x270] ss:$12 sps:$4 sm:$0xff]  }
 0x181   :  { %1545 = vmatprep.subr.bf16.mxu0 %v7717_v3  ;;  %11094 = vst [vmem:[#allocation31_spill] sm:$0xff] %v7729_v16  ;;  %v7736_v3 = vld [vmem:[%s10923_s29 + $0x25c] ss:$12 sps:$4 sm:$0xff]  }
 0x182   :  { %11095 = vst [vmem:[#allocation32_spill] sm:$0xff] %v7736_v3 }
 0x183   :  { %1587 = vmatpush2.bf16.msra.mxu1 %v7723_v38  ;;  %v7742_v38 = vld [vmem:[%s10923_s29 + $0x260] ss:$12 sps:$4 sm:$0xff]  }
 0x184   :  { %1546 = vmatpush2.bf16.msra.mxu0 %v7729_v16  ;;  %1588 = vmatprep.subr.bf16.mxu1 %v10955_v63  ;;  %11096 = vst [vmem:[#allocation33_spill] sm:$0xff] %v7742_v38  ;;  %v7748_v16 = vld [vmem:[%s10923_s29 + $0x258] ss:$12 sps:$4 sm:$0xff]  }
 0x185   :  { %1547 = vmatprep.subr.bf16.mxu0 %v7736_v3  ;;  %11097 = vst [vmem:[#allocation2_spill] sm:$0xff] %v7748_v16  ;;  %v7755_v3 = vld [vmem:[%s10923_s29 + $0x244] ss:$12 sps:$4 sm:$0xff]  }
 0x186   :  { %11098 = vst [vmem:[#allocation34_spill] sm:$0xff] %v7755_v3 }
 0x187   :  { %1589 = vmatpush2.bf16.msra.mxu1 %v7742_v38  ;;  %v7761_v38 = vld [vmem:[%s10923_s29 + $0x248] ss:$12 sps:$4 sm:$0xff]  }
 0x188   :  { %1548 = vmatpush2.bf16.msra.mxu0 %v7748_v16  ;;  %1590 = vmatprep.subr.bf16.mxu1 %v10955_v63  ;;  %11099 = vst [vmem:[#allocation35_spill] sm:$0xff] %v7761_v38  ;;  %v7767_v16 = vld [vmem:[%s10923_s29 + $0x240] ss:$12 sps:$4 sm:$0xff]  }
 0x189   :  { %1549 = vmatprep.subr.bf16.mxu0 %v7755_v3  ;;  %11100 = vst [vmem:[#allocation36_spill] sm:$0xff] %v7767_v16  ;;  %v7774_v3 = vld [vmem:[%s10923_s29 + $0x22c] ss:$12 sps:$4 sm:$0xff]  }
 0x18a   :  { %11101 = vst [vmem:[#allocation37_spill] sm:$0xff] %v7774_v3 }
 0x18b   :  { %1591 = vmatpush2.bf16.msra.mxu1 %v7761_v38  ;;  %v7780_v38 = vld [vmem:[%s10923_s29 + $0x230] ss:$12 sps:$4 sm:$0xff]  }
 0x18c   :  { %1550 = vmatpush2.bf16.msra.mxu0 %v7767_v16  ;;  %1592 = vmatprep.subr.bf16.mxu1 %v10955_v63  ;;  %11102 = vst [vmem:[#allocation38_spill] sm:$0xff] %v7780_v38  ;;  %v7786_v16 = vld [vmem:[%s10923_s29 + $0x228] ss:$12 sps:$4 sm:$0xff]  }
 0x18d   :  { %1551 = vmatprep.subr.bf16.mxu0 %v7774_v3  ;;  %11103 = vst [vmem:[#allocation39_spill] sm:$0xff] %v7786_v16  ;;  %v7793_v3 = vld [vmem:[%s10923_s29 + $0x214] ss:$12 sps:$4 sm:$0xff]  }
 0x18e   :  { %11104 = vst [vmem:[#allocation40_spill] sm:$0xff] %v7793_v3 }
 0x18f   :  { %1593 = vmatpush2.bf16.msra.mxu1 %v7780_v38  ;;  %v7799_v38 = vld [vmem:[%s10923_s29 + $0x218] ss:$12 sps:$4 sm:$0xff]  }
 0x190   :  { %1552 = vmatpush2.bf16.msra.mxu0 %v7786_v16  ;;  %1594 = vmatprep.subr.bf16.mxu1 %v10955_v63  ;;  %11105 = vst [vmem:[#allocation41_spill] sm:$0xff] %v7799_v38  ;;  %v7805_v16 = vld [vmem:[%s10923_s29 + $0x210] ss:$12 sps:$4 sm:$0xff]  }
 0x191   :  { %1553 = vmatprep.subr.bf16.mxu0 %v7793_v3  ;;  %11106 = vst [vmem:[#allocation42_spill] sm:$0xff] %v7805_v16  ;;  %v7812_v3 = vld [vmem:[%s10923_s29 + $0xac] ss:$12 sps:$4 sm:$0xff]  }
 0x192   :  { %11107 = vst [vmem:[#allocation43_spill] sm:$0xff] %v7812_v3 }
 0x193   :  { %1595 = vmatpush2.bf16.msra.mxu1 %v7799_v38  ;;  %v7820_v38 = vld [vmem:[%s10923_s29 + $0xb0] ss:$12 sps:$4 sm:$0xff]  }
 0x194   :  { %1554 = vmatpush2.bf16.msra.mxu0 %v7805_v16  ;;  %1645 = vmatprep.subr.bf16.mxu1 %v10955_v63  ;;  %11108 = vst [vmem:[#allocation44_spill] sm:$0xff] %v7820_v38  ;;  %v7826_v16 = vld [vmem:[%s10923_s29 + $0xa8] ss:$12 sps:$4 sm:$0xff]  }
 0x195   :  { %1604 = vmatprep.subr.bf16.mxu0 %v7812_v3  ;;  %11109 = vst [vmem:[#allocation45_spill] sm:$0xff] %v7826_v16 }
 0x196   :  { %1597 = vmatmul.mubr.bf16.vlgmr.msra.gmra.mxu1 %v7523_v15 }
 0x197   :  { %1556 = vmatmul.mubr.bf16.vlgmr.msra.gmra.mxu0 %v7523_v15  ;;  %1646 = vmatpush1.bf16.msra.mxu1 %v7820_v38  ;;  %v7833_v15 = vld [vmem:[%s10923_s29 + $0x94] ss:$12 sps:$4 sm:$0xff]   ;;  %v7843_v38 = vld [vmem:[%s10923_s29 + $0x98] ss:$12 sps:$4 sm:$0xff]  }
 0x198   :  { %1605 = vmatpush1.bf16.msra.mxu0 %v7826_v16  ;;  %1647 = vmatprep.subr.bf16.mxu1 %v10955_v63  ;;  %11110 = vst [vmem:[#allocation46_spill] sm:$0xff] %v7833_v15  ;;  %11111 = vst [vmem:[#allocation47_spill] sm:$0xff] %v7843_v38  ;;  %v7849_v16 = vld [vmem:[%s10923_s29 + $0x90] ss:$12 sps:$4 sm:$0xff]  }
 0x199   :  { %1606 = vmatprep.subr.bf16.mxu0 %v7833_v15  ;;  %5299 = vmatprep.mubr.msk.bf16.mxu1 %vm536_vm0, %v7061_v28  ;;  %11112 = vst [vmem:[#allocation53_spill] sm:$0xff] %v7849_v16 }
 0x19a   :  { %5298 = vmatprep.mubr.msk.bf16.mxu0 %vm536_vm0, %v7061_v28  ;;  %v7856_v28 = vld [vmem:[%s10923_s29 + $0x7c] ss:$12 sps:$4 sm:$0xff]  }
 0x19b   :  { %1648 = vmatpush1.bf16.msra.mxu1 %v7843_v38  ;;  %11113 = vst [vmem:[#allocation54_spill] sm:$0xff] %v7856_v28  ;;  %v7862_v38 = vld [vmem:[%s10923_s29 + $0x80] ss:$12 sps:$4 sm:$0xff]  }
 0x19c   :  { %1607 = vmatpush1.bf16.msra.mxu0 %v7849_v16  ;;  %1649 = vmatprep.subr.bf16.mxu1 %v10955_v63  ;;  %11114 = vst [vmem:[#allocation55_spill] sm:$0xff] %v7862_v38  ;;  %v7868_v16 = vld [vmem:[%s10923_s29 + $0x78] ss:$12 sps:$4 sm:$0xff]  }
 0x19d   :  { %1608 = vmatprep.subr.bf16.mxu0 %v7856_v28  ;;  %11115 = vst [vmem:[#allocation59_spill] sm:$0xff] %v7868_v16  ;;  %v7875_v28 = vld [vmem:[%s10923_s29 + $0x64] ss:$12 sps:$4 sm:$0xff]  }
 0x19e   :  { %11116 = vst [vmem:[#allocation62_spill] sm:$0xff] %v7875_v28 }
 0x19f   :  { %1650 = vmatpush1.bf16.msra.mxu1 %v7862_v38  ;;  %v7881_v38 = vld [vmem:[%s10923_s29 + $0x68] ss:$12 sps:$4 sm:$0xff]  }
 0x1a0   :  { %1609 = vmatpush1.bf16.msra.mxu0 %v7868_v16  ;;  %1651 = vmatprep.subr.bf16.mxu1 %v10955_v63  ;;  %11117 = vst [vmem:[#allocation64_spill] sm:$0xff] %v7881_v38  ;;  %v7887_v16 = vld [vmem:[%s10923_s29 + $0x60] ss:$12 sps:$4 sm:$0xff]  }
 0x1a1   :  { %1610 = vmatprep.subr.bf16.mxu0 %v7875_v28  ;;  %11118 = vst [vmem:[#allocation66_spill] sm:$0xff] %v7887_v16  ;;  %v7894_v28 = vld [vmem:[%s10923_s29 + $0x4c] ss:$12 sps:$4 sm:$0xff]  }
 0x1a2   :  { %11119 = vst [vmem:[#allocation67_spill] sm:$0xff] %v7894_v28 }
 0x1a3   :  { %1652 = vmatpush1.bf16.msra.mxu1 %v7881_v38  ;;  %v7900_v38 = vld [vmem:[%s10923_s29 + $0x50] ss:$12 sps:$4 sm:$0xff]  }
 0x1a4   :  { %1611 = vmatpush1.bf16.msra.mxu0 %v7887_v16  ;;  %1653 = vmatprep.subr.bf16.mxu1 %v10955_v63  ;;  %11120 = vst [vmem:[#allocation68_spill] sm:$0xff] %v7900_v38  ;;  %v7906_v16 = vld [vmem:[%s10923_s29 + $0x48] ss:$12 sps:$4 sm:$0xff]  }
 0x1a5   :  { %1612 = vmatprep.subr.bf16.mxu0 %v7894_v28  ;;  %11121 = vst [vmem:[#allocation74_spill] sm:$0xff] %v7906_v16  ;;  %v7913_v28 = vld [vmem:[%s10923_s29 + $0x34] ss:$12 sps:$4 sm:$0xff]  }
 0x1a6   :  { %11122 = vst [vmem:[#allocation75_spill] sm:$0xff] %v7913_v28 }
 0x1a7   :  { %1654 = vmatpush1.bf16.msra.mxu1 %v7900_v38  ;;  %v7919_v38 = vld [vmem:[%s10923_s29 + $0x38] ss:$12 sps:$4 sm:$0xff]  }
 0x1a8   :  { %1613 = vmatpush1.bf16.msra.mxu0 %v7906_v16  ;;  %1655 = vmatprep.subr.bf16.mxu1 %v10955_v63  ;;  %11123 = vst [vmem:[#allocation76_spill] sm:$0xff] %v7919_v38 }
 0x1a9   :  { %1614 = vmatprep.subr.bf16.mxu0 %v7913_v28 }
 0x1ab   :  { %1656 = vmatpush1.bf16.msra.mxu1 %v7919_v38 }
 0x1ac   :  { %1615 = vmatpush1.bf16.msra.mxu0 %v11003_v6  ;;  %1657 = vmatprep.subr.bf16.mxu1 %v10955_v63 }
 0x1ad   :  { %1616 = vmatprep.subr.bf16.mxu0 %v11004_v7 }
 0x1ae   :  { %v7925_v16 = vpop.f32.mrf.mxu1 }
 0x1af   :  { %v7927_v15 = vpop.f32.mrf.mxu0  ;;  %1658 = vmatpush1.bf16.msra.mxu1 %v11005_v10  ;;  %v5041_v10 = vld [vmem:[%s10924_s5 + $0x48] sm:$0xff] }
 0x1b0   :  { %1617 = vmatpush1.bf16.msra.mxu0 %v11006_v11  ;;  %1659 = vmatprep.subr.bf16.mxu1 %v10955_v63  ;;  %v1342_v28 = vpop.f32.mrf.mxu1  ;;  %v7966_v11 = vpack.c.bf16 %v5041_v10, %v5041_v10 }
 0x1b1   :  { %v7932_v3 = vpop.f32.mrf.mxu0  ;;  %1618 = vmatprep.subr.bf16.mxu0 %v11007_v14  ;;  %v11126_v14 = vld [vmem:[#allocation50_spill] sm:$0xff]  ;;  %v11162_v28 = vld [vmem:[#allocation25_spill] sm:$0xff] }
 0x1b2   :  { %v1343_v6 = vpop.f32.mrf.mxu1 }
 0x1b3   :  { %v1303_v38 = vpop.f32.mrf.mxu0  ;;  %1660 = vmatpush1.bf16.msra.mxu1 %v11008_v17 }
 0x1b4   :  { %1619 = vmatpush1.bf16.msra.mxu0 %v11009_v18  ;;  %1665 = vmatprep.subr.bf16.mxu1 %v10955_v63  ;;  %v1344_v7 = vpop.f32.mrf.mxu1 }
 0x1b5   :  { %v1304_v9 = vpop.f32.mrf.mxu0  ;;  %1624 = vmatprep.subr.bf16.mxu0 %v11010_v21 }
 0x1b7   :  { %1666 = vmatpush2.bf16.msra.mxu1 %v11011_v22  ;;  %v11127_v22 = vld [vmem:[#allocation51_spill] sm:$0xff] }
 0x1b8   :  { %1625 = vmatpush2.bf16.msra.mxu0 %v11012_v23  ;;  %1667 = vmatprep.subr.bf16.mxu1 %v10955_v63 }
 0x1b9   :  { %1626 = vmatprep.subr.bf16.mxu0 %v11013_v24  ;;  %v11128_v24 = vld [vmem:[#allocation52_spill] sm:$0xff] }
 0x1bb   :  { %1668 = vmatpush2.bf16.msra.mxu1 %v11014_v25 }
 0x1bc   :  { %1627 = vmatpush2.bf16.msra.mxu0 %v11015_v26  ;;  %1669 = vmatprep.subr.bf16.mxu1 %v10955_v63 }
 0x1bd   :  { %1628 = vmatprep.subr.bf16.mxu0 %v11016_v27 }
 0x1bf   :  { %1670 = vmatpush2.bf16.msra.mxu1 %v11017_v29 }
 0x1c0   :  { %1629 = vmatpush2.bf16.msra.mxu0 %v11018_v30  ;;  %1671 = vmatprep.subr.bf16.mxu1 %v10955_v63 }
 0x1c1   :  { %1630 = vmatprep.subr.bf16.mxu0 %v11019_v31 }
 0x1c3   :  { %1672 = vmatpush2.bf16.msra.mxu1 %v11020_v32 }
 0x1c4   :  { %1631 = vmatpush2.bf16.msra.mxu0 %v11021_v33  ;;  %1673 = vmatprep.subr.bf16.mxu1 %v10955_v63  ;;  %v11129_v33 = vld [vmem:[#allocation56_spill] sm:$0xff] }
 0x1c5   :  { %1632 = vmatprep.subr.bf16.mxu0 %v11022_v34  ;;  %v11130_v34 = vld [vmem:[#allocation57_spill] sm:$0xff] }
 0x1c7   :  { %1674 = vmatpush2.bf16.msra.mxu1 %v11023_v35  ;;  %v11131_v35 = vld [vmem:[#allocation58_spill] sm:$0xff] }
 0x1c8   :  { %1633 = vmatpush2.bf16.msra.mxu0 %v11024_v36  ;;  %1675 = vmatprep.subr.bf16.mxu1 %v10955_v63  ;;  %v11132_v36 = vld [vmem:[#allocation60_spill] sm:$0xff] }
 0x1c9   :  { %1634 = vmatprep.subr.bf16.mxu0 %v11025_v37  ;;  %v11133_v37 = vld [vmem:[#allocation61_spill] sm:$0xff] }
 0x1cb   :  { %1676 = vmatpush2.bf16.msra.mxu1 %v11026_v39  ;;  %v11134_v39 = vld [vmem:[#allocation63_spill] sm:$0xff] }
 0x1cc   :  { %1635 = vmatpush2.bf16.msra.mxu0 %v11027_v40  ;;  %1729 = vmatprep.subr.bf16.mxu1 %v10955_v63  ;;  %v11135_v40 = vld [vmem:[#allocation65_spill] sm:$0xff] }
 0x1cd   :  { %1688 = vmatprep.subr.bf16.mxu0 %v11028_v41  ;;  %v11136_v41 = vld [vmem:[#allocation69_spill] sm:$0xff] }
 0x1ce   :  { %1678 = vmatmul.mubr.bf16.vlgmr.msra.gmra.mxu1 %v7312_v62 }
 0x1cf   :  { %1637 = vmatmul.mubr.bf16.vlgmr.msra.gmra.mxu0 %v7312_v62  ;;  %1730 = vmatpush1.bf16.msra.mxu1 %v7046_v59  ;;  %v11124_v59 = vld [vmem:[#allocation48_spill] sm:$0xff]  ;;  %v11125_v62 = vld [vmem:[#allocation49_spill] sm:$0xff] }
 0x1d0   :  { %1689 = vmatpush1.bf16.msra.mxu0 %v11031_v45  ;;  %1731 = vmatprep.subr.bf16.mxu1 %v10955_v63  ;;  %v5040_v45 = vld [vmem:[%s10924_s5 + $0x40] sm:$0xff] }
 0x1d1   :  { %1690 = vmatprep.subr.bf16.mxu0 %v11032_v46  ;;  %5301 = vmatprep.mubr.msk.bf16.mxu1 %vm536_vm0, %v7966_v11  ;;  %v11137_v46 = vld [vmem:[#allocation70_spill] sm:$0xff] }
 0x1d2   :  { %5300 = vmatprep.mubr.msk.bf16.mxu0 %vm536_vm0, %v7966_v11 }
 0x1d3   :  { %1732 = vmatpush1.bf16.msra.mxu1 %v11033_v47  ;;  %v11138_v47 = vld [vmem:[#allocation71_spill] sm:$0xff] }
 0x1d4   :  { %1691 = vmatpush1.bf16.msra.mxu0 %v11034_v48  ;;  %1733 = vmatprep.subr.bf16.mxu1 %v10955_v63  ;;  %v8038_v48 = vpack.c.bf16 %v5040_v45, %v5040_v45  ;;  %v11184_v45 = vld [vmem:[#allocation46_spill] sm:$0xff] }
 0x1d5   :  { %1692 = vmatprep.subr.bf16.mxu0 %v11035_v49  ;;  %v11140_v49 = vld [vmem:[#allocation72_spill] sm:$0xff] }
 0x1d6   :  { %11139 = vst [vmem:[#allocation48_spill] sm:$0xff] %v8038_v48 }
 0x1d7   :  { %1734 = vmatpush1.bf16.msra.mxu1 %v11036_v50  ;;  %v11141_v50 = vld [vmem:[#allocation73_spill] sm:$0xff] }
 0x1d8   :  { %1693 = vmatpush1.bf16.msra.mxu0 %v11037_v51  ;;  %1735 = vmatprep.subr.bf16.mxu1 %v10955_v63  ;;  %v11142_v51 = vld [vmem:[#allocation5_spill] sm:$0xff] }
 0x1d9   :  { %1694 = vmatprep.subr.bf16.mxu0 %v11038_v52  ;;  %v11143_v52 = vld [vmem:[#allocation6_spill] sm:$0xff] }
 0x1db   :  { %1736 = vmatpush1.bf16.msra.mxu1 %v11039_v53  ;;  %v11144_v53 = vld [vmem:[#allocation7_spill] sm:$0xff] }
 0x1dc   :  { %1695 = vmatpush1.bf16.msra.mxu0 %v11040_v54  ;;  %1737 = vmatprep.subr.bf16.mxu1 %v10955_v63  ;;  %v11145_v54 = vld [vmem:[#allocation8_spill] sm:$0xff] }
 0x1dd   :  { %1696 = vmatprep.subr.bf16.mxu0 %v11041_v55  ;;  %v11146_v55 = vld [vmem:[#allocation9_spill] sm:$0xff] }
 0x1df   :  { %1738 = vmatpush1.bf16.msra.mxu1 %v11042_v56  ;;  %v11147_v56 = vld [vmem:[#allocation10_spill] sm:$0xff] }
 0x1e0   :  { %1697 = vmatpush1.bf16.msra.mxu0 %v11043_v58  ;;  %1739 = vmatprep.subr.bf16.mxu1 %v10955_v63  ;;  %v11148_v58 = vld [vmem:[#allocation11_spill] sm:$0xff] }
 0x1e1   :  { %1698 = vmatprep.subr.bf16.mxu0 %v11044_v60  ;;  %v11149_v60 = vld [vmem:[#allocation12_spill] sm:$0xff] }
 0x1e3   :  { %1740 = vmatpush1.bf16.msra.mxu1 %v11124_v59 }
 0x1e4   :  { %1699 = vmatpush1.bf16.msra.mxu0 %v11125_v62  ;;  %1741 = vmatprep.subr.bf16.mxu1 %v10955_v63 }
 0x1e5   :  { %1700 = vmatprep.subr.bf16.mxu0 %v11126_v14 }
 0x1e6   :  { %v1421_v17 = vpop.f32.mrf.mxu1 }
 0x1e7   :  { %v7999_v18 = vadd.f32 %v1421_v17, %v7925_v16  ;;  %v1380_v21 = vpop.f32.mrf.mxu0  ;;  %1742 = vmatpush1.bf16.msra.mxu1 %v11127_v22  ;;  %v11166_v22 = vld [vmem:[#allocation29_spill] sm:$0xff] }
 0x1e8   :  { %v8003_v23 = vadd.f32 %v1380_v21, %v7927_v15  ;;  %1701 = vmatpush1.bf16.msra.mxu0 %v11128_v24  ;;  %1743 = vmatprep.subr.bf16.mxu1 %v10955_v63  ;;  %v1423_v25 = vpop.f32.mrf.mxu1  ;;  %v11151_v15 = vld [vmem:[#allocation14_spill] sm:$0xff]  ;;  %v11165_v21 = vld [vmem:[#allocation28_spill] sm:$0xff]  ;;  %v11168_v24 = vld [vmem:[#allocation31_spill] sm:$0xff] }
 0x1e9   :  { %v1382_v26 = vpop.f32.mrf.mxu0  ;;  %1702 = vmatprep.subr.bf16.mxu0 %v11050_v43  ;;  %v11153_v43 = vld [vmem:[#allocation16_spill] sm:$0xff] }
 0x1ea   :  { %v8009_v27 = vadd.f32 %v1382_v26, %v7932_v3  ;;  %v1424_v29 = vpop.f32.mrf.mxu1  ;;  %v11169_v25 = vld [vmem:[#allocation32_spill] sm:$0xff]  ;;  %v11170_v26 = vld [vmem:[#allocation33_spill] sm:$0xff] }
 0x1eb   :  { %v1384_v30 = vpop.f32.mrf.mxu0  ;;  %1744 = vmatpush1.bf16.msra.mxu1 %v11051_v4  ;;  %v11154_v4 = vld [vmem:[#allocation17_spill] sm:$0xff]  ;;  %v11172_v29 = vld [vmem:[#allocation34_spill] sm:$0xff] }
 0x1ec   :  { %1703 = vmatpush1.bf16.msra.mxu0 %v11052_v1  ;;  %1749 = vmatprep.subr.bf16.mxu1 %v10955_v63  ;;  %v1425_v31 = vpop.f32.mrf.mxu1  ;;  %v11150_v1 = vld [vmem:[#allocation13_spill] sm:$0xff]  ;;  %v11173_v30 = vld [vmem:[#allocation35_spill] sm:$0xff] }
 0x1ed   :  { %v1385_v32 = vpop.f32.mrf.mxu0  ;;  %1708 = vmatprep.subr.bf16.mxu0 %v11129_v33  ;;  %v11174_v31 = vld [vmem:[#allocation36_spill] sm:$0xff]  ;;  %v11176_v33 = vld [vmem:[#allocation38_spill] sm:$0xff] }
 0x1ee   :  { %v11175_v32 = vld [vmem:[#allocation37_spill] sm:$0xff] }
 0x1ef   :  { %1750 = vmatpush2.bf16.msra.mxu1 %v11130_v34  ;;  %v11177_v34 = vld [vmem:[#allocation39_spill] sm:$0xff] }
 0x1f0   :  { %1709 = vmatpush2.bf16.msra.mxu0 %v11131_v35  ;;  %1751 = vmatprep.subr.bf16.mxu1 %v10955_v63  ;;  %v11178_v35 = vld [vmem:[#allocation40_spill] sm:$0xff] }
 0x1f1   :  { %1710 = vmatprep.subr.bf16.mxu0 %v11056_v13  ;;  %v11156_v13 = vld [vmem:[#allocation19_spill] sm:$0xff] }
 0x1f3   :  { %1752 = vmatpush2.bf16.msra.mxu1 %v11132_v36  ;;  %v11179_v36 = vld [vmem:[#allocation41_spill] sm:$0xff] }
 0x1f4   :  { %1711 = vmatpush2.bf16.msra.mxu0 %v11133_v37  ;;  %1753 = vmatprep.subr.bf16.mxu1 %v10955_v63  ;;  %v11180_v37 = vld [vmem:[#allocation42_spill] sm:$0xff] }
 0x1f5   :  { %1712 = vmatprep.subr.bf16.mxu0 %v11059_v8  ;;  %v11158_v8 = vld [vmem:[#allocation21_spill] sm:$0xff] }
 0x1f7   :  { %1754 = vmatpush2.bf16.msra.mxu1 %v11134_v39  ;;  %v11181_v39 = vld [vmem:[#allocation43_spill] sm:$0xff] }
 0x1f8   :  { %1713 = vmatpush2.bf16.msra.mxu0 %v11061_v12  ;;  %1755 = vmatprep.subr.bf16.mxu1 %v10955_v63  ;;  %v11159_v12 = vld [vmem:[#allocation22_spill] sm:$0xff] }
 0x1f9   :  { %1714 = vmatprep.subr.bf16.mxu0 %v11135_v40  ;;  %v11182_v40 = vld [vmem:[#allocation44_spill] sm:$0xff] }
 0x1fb   :  { %1756 = vmatpush2.bf16.msra.mxu1 %v11063_v20  ;;  %v11155_v20 = vld [vmem:[#allocation18_spill] sm:$0xff] }
 0x1fc   :  { %1715 = vmatpush2.bf16.msra.mxu0 %v11064_v19  ;;  %1757 = vmatprep.subr.bf16.mxu1 %v10955_v63  ;;  %v11152_v19 = vld [vmem:[#allocation15_spill] sm:$0xff] }
 0x1fd   :  { %1716 = vmatprep.subr.bf16.mxu0 %v11065_v2  ;;  %v11157_v2 = vld [vmem:[#allocation20_spill] sm:$0xff] }
 0x1ff   :  { %1758 = vmatpush2.bf16.msra.mxu1 %v11136_v41  ;;  %v11183_v41 = vld [vmem:[#allocation45_spill] sm:$0xff] }
 0x200   :  { %1717 = vmatpush2.bf16.msra.mxu0 %v11137_v46  ;;  %1759 = vmatprep.subr.bf16.mxu1 %v10955_v63  ;;  %v11185_v46 = vld [vmem:[#allocation3_spill] sm:$0xff] }
 0x201   :  { %1718 = vmatprep.subr.bf16.mxu0 %v11138_v47  ;;  %v11186_v47 = vld [vmem:[#allocation47_spill] sm:$0xff] }
 0x203   :  { %1760 = vmatpush2.bf16.msra.mxu1 %v11140_v49  ;;  %v11187_v49 = vld [vmem:[#allocation53_spill] sm:$0xff] }
 0x204   :  { %1719 = vmatpush2.bf16.msra.mxu0 %v11141_v50  ;;  %1822 = vmatprep.subr.bf16.mxu1 %v10955_v63  ;;  %v11188_v50 = vld [vmem:[#allocation54_spill] sm:$0xff] }
 0x205   :  { %1781 = vmatprep.subr.bf16.mxu0 %v11142_v51 }
 0x206   :  { %1762 = vmatmul.mubr.bf16.vlgmr.msra.gmra.mxu1 %v8038_v48 }
 0x207   :  { %1721 = vmatmul.mubr.bf16.vlgmr.msra.gmra.mxu0 %v8038_v48  ;;  %1823 = vmatpush1.bf16.msra.mxu1 %v11143_v52 }
 0x208   :  { %1782 = vmatpush1.bf16.msra.mxu0 %v11144_v53  ;;  %1824 = vmatprep.subr.bf16.mxu1 %v10955_v63 }
 0x209   :  { %1783 = vmatprep.subr.bf16.mxu0 %v11145_v54  ;;  %5302 = vmatprep.mubr.msk.bf16.mxu0 %vm536_vm0, %v7966_v11 }
 0x20a   :  { %5303 = vmatprep.mubr.msk.bf16.mxu1 %vm536_vm0, %v7966_v11 }
 0x20b   :  { %1825 = vmatpush1.bf16.msra.mxu1 %v11146_v55 }
 0x20c   :  { %1784 = vmatpush1.bf16.msra.mxu0 %v11147_v56  ;;  %1826 = vmatprep.subr.bf16.mxu1 %v10955_v63 }
 0x20d   :  { %1785 = vmatprep.subr.bf16.mxu0 %v11148_v58 }
 0x20f   :  { %1827 = vmatpush1.bf16.msra.mxu1 %v11149_v60 }
 0x210   :  { %1786 = vmatpush1.bf16.msra.mxu0 %v11150_v1  ;;  %1828 = vmatprep.subr.bf16.mxu1 %v10955_v63 }
 0x211   :  { %1787 = vmatprep.subr.bf16.mxu0 %v11151_v15 }
 0x213   :  { %1829 = vmatpush1.bf16.msra.mxu1 %v11152_v19 }
 0x214   :  { %1788 = vmatpush1.bf16.msra.mxu0 %v11153_v43  ;;  %1830 = vmatprep.subr.bf16.mxu1 %v10955_v63 }
 0x215   :  { %1789 = vmatprep.subr.bf16.mxu0 %v11154_v4 }
 0x217   :  { %1831 = vmatpush1.bf16.msra.mxu1 %v11155_v20 }
 0x218   :  { %1790 = vmatpush1.bf16.msra.mxu0 %v11156_v13  ;;  %1832 = vmatprep.subr.bf16.mxu1 %v10955_v63 }
 0x219   :  { %1791 = vmatprep.subr.bf16.mxu0 %v11157_v2 }
 0x21b   :  { %1833 = vmatpush1.bf16.msra.mxu1 %v11158_v8 }
 0x21c   :  { %1792 = vmatpush1.bf16.msra.mxu0 %v11159_v12  ;;  %1834 = vmatprep.subr.bf16.mxu1 %v10955_v63 }
 0x21d   :  { %1793 = vmatprep.subr.bf16.mxu0 %v7651_v42 }
 0x21e   :  { %v1505_v16 = vpop.f32.mrf.mxu1 }
 0x21f   :  { %v8075_v9 = vadd.f32 %v1505_v16, %v7999_v18  ;;  %v1464_v3 = vpop.f32.mrf.mxu0  ;;  %1835 = vmatpush1.bf16.msra.mxu1 %v7660_v44  ;;  %v11164_v18 = vld [vmem:[#allocation27_spill] sm:$0xff] }
 0x220   :  { %v8079_v38 = vadd.f32 %v1464_v3, %v8003_v23  ;;  %1794 = vmatpush1.bf16.msra.mxu0 %v11162_v28  ;;  %1836 = vmatprep.subr.bf16.mxu1 %v10955_v63  ;;  %v1507_v6 = vpop.f32.mrf.mxu1  ;;  %v11167_v23 = vld [vmem:[#allocation30_spill] sm:$0xff]  ;;  %v11189_v16 = vld [vmem:[#allocation55_spill] sm:$0xff] }
 0x221   :  { %11160 = vst [vmem:[#allocation49_spill] sm:$0xff] %v8075_v9  ;;  %v1466_v7 = vpop.f32.mrf.mxu0  ;;  %1795 = vmatprep.subr.bf16.mxu0 %v7676_v57  ;;  %v11190_v3 = vld [vmem:[#allocation59_spill] sm:$0xff]  ;;  %v11191_v6 = vld [vmem:[#allocation62_spill] sm:$0xff]  ;;  %v8145_v9 = vld [vmem:[%s10923_s29 + $0x30] ss:$12 sps:$4 sm:$0xff]  }
 0x222   :  { %11161 = vst [vmem:[#allocation50_spill] sm:$0xff] %v8079_v38  ;;  %v8085_v10 = vadd.f32 %v1466_v7, %v8009_v27  ;;  %v1508_v59 = vpop.f32.mrf.mxu1  ;;  %v11171_v27 = vld [vmem:[#allocation2_spill] sm:$0xff]  ;;  %v11192_v7 = vld [vmem:[#allocation64_spill] sm:$0xff]  ;;  %11199 = vst [vmem:[#allocation52_spill] sm:$0xff] %v8145_v9 }
 0x223   :  { %v1468_v62 = vpop.f32.mrf.mxu0  ;;  %1837 = vmatpush1.bf16.msra.mxu1 %v7685_v0  ;;  %v11193_v59 = vld [vmem:[#allocation66_spill] sm:$0xff]  ;;  %v11198_v38 = vld [vmem:[#allocation76_spill] sm:$0xff] }
 0x224   :  { %11163 = vst [vmem:[#allocation51_spill] sm:$0xff] %v8085_v10  ;;  %1796 = vmatpush1.bf16.msra.mxu0 %v7691_v5  ;;  %1842 = vmatprep.subr.bf16.mxu1 %v10955_v63  ;;  %v1509_v14 = vpop.f32.mrf.mxu1  ;;  %v11194_v62 = vld [vmem:[#allocation67_spill] sm:$0xff] }
 0x225   :  { %v1469_v17 = vpop.f32.mrf.mxu0  ;;  %1801 = vmatprep.subr.bf16.mxu0 %v7698_v61  ;;  %v11195_v14 = vld [vmem:[#allocation68_spill] sm:$0xff]  ;;  %v8152_v10 = vld [vmem:[%s10923_s29 + $0x1c] ss:$12 sps:$4 sm:$0xff]  }
 0x226   :  { %v11196_v17 = vld [vmem:[#allocation74_spill] sm:$0xff]  ;;  %11200 = vst [vmem:[#allocation56_spill] sm:$0xff] %v8152_v10 }
 0x227   :  { %1843 = vmatpush2.bf16.msra.mxu1 %v11164_v18 }
 0x228   :  { %1802 = vmatpush2.bf16.msra.mxu0 %v11165_v21  ;;  %1844 = vmatprep.subr.bf16.mxu1 %v10955_v63 }
 0x229   :  { %1803 = vmatprep.subr.bf16.mxu0 %v11166_v22 }
 0x22b   :  { %1845 = vmatpush2.bf16.msra.mxu1 %v11167_v23 }
 0x22c   :  { %1804 = vmatpush2.bf16.msra.mxu0 %v11168_v24  ;;  %1846 = vmatprep.subr.bf16.mxu1 %v10955_v63 }
 0x22d   :  { %1805 = vmatprep.subr.bf16.mxu0 %v11169_v25 }
 0x22f   :  { %1847 = vmatpush2.bf16.msra.mxu1 %v11170_v26 }
 0x230   :  { %1806 = vmatpush2.bf16.msra.mxu0 %v11171_v27  ;;  %1848 = vmatprep.subr.bf16.mxu1 %v10955_v63 }
 0x231   :  { %1807 = vmatprep.subr.bf16.mxu0 %v11172_v29 }
 0x233   :  { %1849 = vmatpush2.bf16.msra.mxu1 %v11173_v30 }
 0x234   :  { %1808 = vmatpush2.bf16.msra.mxu0 %v11174_v31  ;;  %1850 = vmatprep.subr.bf16.mxu1 %v10955_v63 }
 0x235   :  { %1809 = vmatprep.subr.bf16.mxu0 %v11175_v32 }
 0x237   :  { %1851 = vmatpush2.bf16.msra.mxu1 %v11176_v33 }
 0x238   :  { %1810 = vmatpush2.bf16.msra.mxu0 %v11177_v34  ;;  %1852 = vmatprep.subr.bf16.mxu1 %v10955_v63 }
 0x239   :  { %1811 = vmatprep.subr.bf16.mxu0 %v11178_v35 }
 0x23b   :  { %1853 = vmatpush2.bf16.msra.mxu1 %v11179_v36 }
 0x23c   :  { %1812 = vmatpush2.bf16.msra.mxu0 %v11180_v37  ;;  %1903 = vmatprep.subr.bf16.mxu1 %v10955_v63 }
 0x23d   :  { %1862 = vmatprep.subr.bf16.mxu0 %v11181_v39 }
 0x23e   :  { %1855 = vmatmul.mubr.bf16.vlgmr.msra.gmra.mxu1 %v8038_v48 }
 0x23f   :  { %1814 = vmatmul.mubr.bf16.vlgmr.msra.gmra.mxu0 %v8038_v48  ;;  %1904 = vmatpush1.bf16.msra.mxu1 %v11182_v40 }
 0x240   :  { %1863 = vmatpush1.bf16.msra.mxu0 %v11183_v41  ;;  %1905 = vmatprep.subr.bf16.mxu1 %v10955_v63 }
 0x241   :  { %1864 = vmatprep.subr.bf16.mxu0 %v11184_v45  ;;  %5305 = vmatprep.mubr.msk.bf16.mxu1 %vm536_vm0, %v11185_v46 }
 0x242   :  { %5304 = vmatprep.mubr.msk.bf16.mxu0 %vm536_vm0, %v11185_v46  ;;  %v11197_v46 = vld [vmem:[#allocation75_spill] sm:$0xff] }
 0x243   :  { %1906 = vmatpush1.bf16.msra.mxu1 %v11186_v47 }
 0x244   :  { %1865 = vmatpush1.bf16.msra.mxu0 %v11187_v49  ;;  %1907 = vmatprep.subr.bf16.mxu1 %v10955_v63 }
 0x245   :  { %1866 = vmatprep.subr.bf16.mxu0 %v11188_v50 }
 0x247   :  { %1908 = vmatpush1.bf16.msra.mxu1 %v11189_v16 }
 0x248   :  { %1867 = vmatpush1.bf16.msra.mxu0 %v11190_v3  ;;  %1909 = vmatprep.subr.bf16.mxu1 %v10955_v63 }
 0x249   :  { %1868 = vmatprep.subr.bf16.mxu0 %v11191_v6  ;;  %v8453_v6 = vld [vmem:[%s10923_s29 + $0x2b8] ss:$12 sps:$4 sm:$0xff]  }
 0x24a   :  { %11245 = vst [vmem:[#allocation39_spill] sm:$0xff] %v8453_v6 }
 0x24b   :  { %1910 = vmatpush1.bf16.msra.mxu1 %v11192_v7  ;;  %v8444_v7 = vld [vmem:[%s10923_s29 + $0x2c0] ss:$12 sps:$4 sm:$0xff]  }
 0x24c   :  { %1869 = vmatpush1.bf16.msra.mxu0 %v11193_v59  ;;  %1911 = vmatprep.subr.bf16.mxu1 %v10955_v63  ;;  %v8183_v59 = vld [vmem:[%s10923_s29 + $0x8] ss:$12 sps:$4 sm:$0xff]   ;;  %11244 = vst [vmem:[#allocation38_spill] sm:$0xff] %v8444_v7 }
 0x24d   :  { %1870 = vmatprep.subr.bf16.mxu0 %v11194_v62  ;;  %11204 = vst [vmem:[#allocation61_spill] sm:$0xff] %v8183_v59 }
 0x24f   :  { %1912 = vmatpush1.bf16.msra.mxu1 %v11195_v14  ;;  %v8177_v14 = vld [vmem:[%s10923_s29 + $0x4] ss:$12 sps:$4 sm:$0xff]  }
 0x250   :  { %1871 = vmatpush1.bf16.msra.mxu0 %v11196_v17  ;;  %1913 = vmatprep.subr.bf16.mxu1 %v10955_v63  ;;  %11203 = vst [vmem:[#allocation60_spill] sm:$0xff] %v8177_v14 }
 0x251   :  { %1872 = vmatprep.subr.bf16.mxu0 %v11197_v46 }
 0x253   :  { %1914 = vmatpush1.bf16.msra.mxu1 %v11198_v38  ;;  %v8162_v38 = vld [vmem:[%s10923_s29 + $0x20] ss:$12 sps:$4 sm:$0xff]  }
 0x254   :  { %1873 = vmatpush1.bf16.msra.mxu0 %v8145_v9  ;;  %1915 = vmatprep.subr.bf16.mxu1 %v10955_v63  ;;  %11201 = vst [vmem:[#allocation57_spill] sm:$0xff] %v8162_v38  ;;  %v8168_v9 = vld [vmem:[%s10923_s29 + $0x18] ss:$12 sps:$4 sm:$0xff]  }
 0x255   :  { %1874 = vmatprep.subr.bf16.mxu0 %v8152_v10  ;;  %11202 = vst [vmem:[#allocation58_spill] sm:$0xff] %v8168_v9 }
 0x256   :  { %v8155_v48 = vpop.f32.mrf.mxu1 }
 0x257   :  { %v8157_v46 = vpop.f32.mrf.mxu0  ;;  %1916 = vmatpush1.bf16.msra.mxu1 %v8162_v38 }
 0x258   :  { %1875 = vmatpush1.bf16.msra.mxu0 %v8168_v9  ;;  %1917 = vmatprep.subr.bf16.mxu1 %v10955_v63  ;;  %v1600_v10 = vpop.f32.mrf.mxu1 }
 0x259   :  { %v8172_v17 = vpop.f32.mrf.mxu0  ;;  %1876 = vmatprep.subr.bf16.mxu0 %v8177_v14  ;;  %v8189_v10 = vld [vmem:[%s10923_s29] ss:$12 sps:$4 sm:$0xff]  }
 0x25a   :  { %v1601_v38 = vpop.f32.mrf.mxu1  ;;  %11205 = vst [vmem:[#allocation63_spill] sm:$0xff] %v8189_v10 }
 0x25b   :  { %v1561_v62 = vpop.f32.mrf.mxu0  ;;  %1918 = vmatpush1.bf16.msra.mxu1 %v8183_v59  ;;  %v8196_v38 = vld [vmem:[%s10923_s29 + $0x13c] ss:$12 sps:$4 sm:$0xff]   ;;  %v11225_v59 = vld [vmem:[#allocation4_spill] sm:$0xff] }
 0x25c   :  { %1877 = vmatpush1.bf16.msra.mxu0 %v8189_v10  ;;  %1923 = vmatprep.subr.bf16.mxu1 %v10955_v63  ;;  %v1602_v9 = vpop.f32.mrf.mxu1  ;;  %11206 = vst [vmem:[#allocation65_spill] sm:$0xff] %v8196_v38  ;;  %v8202_v62 = vld [vmem:[%s10923_s29 + $0x140] ss:$12 sps:$4 sm:$0xff]   ;;  %v8208_v10 = vld [vmem:[%s10923_s29 + $0x138] ss:$12 sps:$4 sm:$0xff]  }
 0x25d   :  { %v1562_v14 = vpop.f32.mrf.mxu0  ;;  %1882 = vmatprep.subr.bf16.mxu0 %v8196_v38  ;;  %11207 = vst [vmem:[#allocation69_spill] sm:$0xff] %v8202_v62  ;;  %11208 = vst [vmem:[#allocation70_spill] sm:$0xff] %v8208_v10  ;;  %v8215_v9 = vld [vmem:[%s10923_s29 + $0x124] ss:$12 sps:$4 sm:$0xff]  }
 0x25e   :  { %11209 = vst [vmem:[#allocation71_spill] sm:$0xff] %v8215_v9  ;;  %v8221_v14 = vld [vmem:[%s10923_s29 + $0x128] ss:$12 sps:$4 sm:$0xff]  }
 0x25f   :  { %1924 = vmatpush2.bf16.msra.mxu1 %v8202_v62  ;;  %11210 = vst [vmem:[#allocation72_spill] sm:$0xff] %v8221_v14  ;;  %v8300_v62 = vld [vmem:[%s10923_s29 + $0xc8] ss:$12 sps:$4 sm:$0xff]  }
 0x260   :  { %1883 = vmatpush2.bf16.msra.mxu0 %v8208_v10  ;;  %1925 = vmatprep.subr.bf16.mxu1 %v10955_v63  ;;  %v8227_v10 = vld [vmem:[%s10923_s29 + $0x120] ss:$12 sps:$4 sm:$0xff]   ;;  %11222 = vst [vmem:[#allocation15_spill] sm:$0xff] %v8300_v62 }
 0x261   :  { %1884 = vmatprep.subr.bf16.mxu0 %v8215_v9  ;;  %11211 = vst [vmem:[#allocation73_spill] sm:$0xff] %v8227_v10  ;;  %v8234_v9 = vld [vmem:[%s10923_s29 + $0x10c] ss:$12 sps:$4 sm:$0xff]  }
 0x262   :  { %11212 = vst [vmem:[#allocation5_spill] sm:$0xff] %v8234_v9 }
 0x263   :  { %1926 = vmatpush2.bf16.msra.mxu1 %v8221_v14  ;;  %v8240_v14 = vld [vmem:[%s10923_s29 + $0x110] ss:$12 sps:$4 sm:$0xff]  }
 0x264   :  { %1885 = vmatpush2.bf16.msra.mxu0 %v8227_v10  ;;  %1927 = vmatprep.subr.bf16.mxu1 %v10955_v63  ;;  %11213 = vst [vmem:[#allocation6_spill] sm:$0xff] %v8240_v14  ;;  %v8246_v10 = vld [vmem:[%s10923_s29 + $0x108] ss:$12 sps:$4 sm:$0xff]  }
 0x265   :  { %1886 = vmatprep.subr.bf16.mxu0 %v8234_v9  ;;  %11214 = vst [vmem:[#allocation7_spill] sm:$0xff] %v8246_v10  ;;  %v8253_v9 = vld [vmem:[%s10923_s29 + $0xf4] ss:$12 sps:$4 sm:$0xff]  }
 0x266   :  { %11215 = vst [vmem:[#allocation8_spill] sm:$0xff] %v8253_v9 }
 0x267   :  { %1928 = vmatpush2.bf16.msra.mxu1 %v8240_v14  ;;  %v8259_v14 = vld [vmem:[%s10923_s29 + $0xf8] ss:$12 sps:$4 sm:$0xff]  }
 0x268   :  { %1887 = vmatpush2.bf16.msra.mxu0 %v8246_v10  ;;  %1929 = vmatprep.subr.bf16.mxu1 %v10955_v63  ;;  %11216 = vst [vmem:[#allocation9_spill] sm:$0xff] %v8259_v14  ;;  %v8265_v10 = vld [vmem:[%s10923_s29 + $0xf0] ss:$12 sps:$4 sm:$0xff]  }
 0x269   :  { %1888 = vmatprep.subr.bf16.mxu0 %v8253_v9  ;;  %11217 = vst [vmem:[#allocation10_spill] sm:$0xff] %v8265_v10  ;;  %v8272_v9 = vld [vmem:[%s10923_s29 + $0xdc] ss:$12 sps:$4 sm:$0xff]  }
 0x26a   :  { %11218 = vst [vmem:[#allocation11_spill] sm:$0xff] %v8272_v9 }
 0x26b   :  { %1930 = vmatpush2.bf16.msra.mxu1 %v8259_v14  ;;  %v8278_v14 = vld [vmem:[%s10923_s29 + $0xe0] ss:$12 sps:$4 sm:$0xff]  }
 0x26c   :  { %1889 = vmatpush2.bf16.msra.mxu0 %v8265_v10  ;;  %1931 = vmatprep.subr.bf16.mxu1 %v10955_v63  ;;  %11219 = vst [vmem:[#allocation12_spill] sm:$0xff] %v8278_v14  ;;  %v8284_v10 = vld [vmem:[%s10923_s29 + $0xd8] ss:$12 sps:$4 sm:$0xff]  }
 0x26d   :  { %1890 = vmatprep.subr.bf16.mxu0 %v8272_v9  ;;  %11220 = vst [vmem:[#allocation13_spill] sm:$0xff] %v8284_v10  ;;  %v8291_v9 = vld [vmem:[%s10923_s29 + $0xc4] ss:$12 sps:$4 sm:$0xff]  }
 0x26e   :  { %11221 = vst [vmem:[#allocation14_spill] sm:$0xff] %v8291_v9 }
 0x26f   :  { %1932 = vmatpush2.bf16.msra.mxu1 %v8278_v14  ;;  %v5043_v14 = vld [vmem:[%s10924_s5 + $0x58] sm:$0xff] }
 0x270   :  { %1891 = vmatpush2.bf16.msra.mxu0 %v8284_v10  ;;  %1933 = vmatprep.subr.bf16.mxu1 %v10955_v63  ;;  %v8306_v10 = vld [vmem:[%s10923_s29 + $0xc0] ss:$12 sps:$4 sm:$0xff]   ;;  %v8316_v38 = vpack.c.bf16 %v5043_v14, %v5043_v14  ;;  %v8346_v14 = vld [vmem:[%s10923_s29 + $0x338] ss:$12 sps:$4 sm:$0xff]  }
 0x271   :  { %1892 = vmatprep.subr.bf16.mxu0 %v8291_v9  ;;  %11223 = vst [vmem:[#allocation16_spill] sm:$0xff] %v8306_v10  ;;  %v8313_v9 = vld [vmem:[%s10923_s29 + $0x34c] ss:$12 sps:$4 sm:$0xff]   ;;  %11229 = vst [vmem:[#allocation21_spill] sm:$0xff] %v8346_v14 }
 0x272   :  { %11224 = vst [vmem:[#allocation17_spill] sm:$0xff] %v8313_v9 }
 0x273   :  { %1934 = vmatpush2.bf16.msra.mxu1 %v8300_v62  ;;  %v8323_v62 = vld [vmem:[%s10923_s29 + $0x350] ss:$12 sps:$4 sm:$0xff]  }
 0x274   :  { %1893 = vmatpush2.bf16.msra.mxu0 %v8306_v10  ;;  %1987 = vmatprep.subr.bf16.mxu1 %v10955_v63  ;;  %11226 = vst [vmem:[#allocation18_spill] sm:$0xff] %v8323_v62  ;;  %v8329_v10 = vld [vmem:[%s10923_s29 + $0x348] ss:$12 sps:$4 sm:$0xff]  }
 0x275   :  { %1946 = vmatprep.subr.bf16.mxu0 %v8313_v9  ;;  %11227 = vst [vmem:[#allocation19_spill] sm:$0xff] %v8329_v10 }
 0x276   :  { %1936 = vmatmul.mubr.bf16.vlgmr.msra.gmra.mxu1 %v11225_v59 }
 0x277   :  { %1895 = vmatmul.mubr.bf16.vlgmr.msra.gmra.mxu0 %v11225_v59  ;;  %1988 = vmatpush1.bf16.msra.mxu1 %v8323_v62  ;;  %v8336_v59 = vld [vmem:[%s10923_s29 + $0x334] ss:$12 sps:$4 sm:$0xff]  }
 0x278   :  { %1947 = vmatpush1.bf16.msra.mxu0 %v8329_v10  ;;  %1989 = vmatprep.subr.bf16.mxu1 %v10955_v63  ;;  %11228 = vst [vmem:[#allocation20_spill] sm:$0xff] %v8336_v59  ;;  %v8352_v10 = vld [vmem:[%s10923_s29 + $0x330] ss:$12 sps:$4 sm:$0xff]  }
 0x279   :  { %1948 = vmatprep.subr.bf16.mxu0 %v8336_v59  ;;  %5307 = vmatprep.mubr.msk.bf16.mxu1 %vm536_vm0, %v8316_v38  ;;  %11230 = vst [vmem:[#allocation22_spill] sm:$0xff] %v8352_v10  ;;  %v8359_v59 = vld [vmem:[%s10923_s29 + $0x31c] ss:$12 sps:$4 sm:$0xff]  }
 0x27a   :  { %5306 = vmatprep.mubr.msk.bf16.mxu0 %vm536_vm0, %v8316_v38  ;;  %11231 = vst [vmem:[#allocation25_spill] sm:$0xff] %v8359_v59 }
 0x27b   :  { %1990 = vmatpush1.bf16.msra.mxu1 %v8346_v14  ;;  %v8365_v14 = vld [vmem:[%s10923_s29 + $0x320] ss:$12 sps:$4 sm:$0xff]  }
 0x27c   :  { %1949 = vmatpush1.bf16.msra.mxu0 %v8352_v10  ;;  %1991 = vmatprep.subr.bf16.mxu1 %v10955_v63  ;;  %11232 = vst [vmem:[#allocation27_spill] sm:$0xff] %v8365_v14  ;;  %v8371_v10 = vld [vmem:[%s10923_s29 + $0x318] ss:$12 sps:$4 sm:$0xff]  }
 0x27d   :  { %1950 = vmatprep.subr.bf16.mxu0 %v8359_v59  ;;  %11233 = vst [vmem:[#allocation28_spill] sm:$0xff] %v8371_v10  ;;  %v8378_v59 = vld [vmem:[%s10923_s29 + $0x304] ss:$12 sps:$4 sm:$0xff]  }
 0x27e   :  { %11234 = vst [vmem:[#allocation29_spill] sm:$0xff] %v8378_v59 }
 0x27f   :  { %1992 = vmatpush1.bf16.msra.mxu1 %v8365_v14  ;;  %v8384_v14 = vld [vmem:[%s10923_s29 + $0x308] ss:$12 sps:$4 sm:$0xff]  }
 0x280   :  { %1951 = vmatpush1.bf16.msra.mxu0 %v8371_v10  ;;  %1993 = vmatprep.subr.bf16.mxu1 %v10955_v63  ;;  %11235 = vst [vmem:[#allocation30_spill] sm:$0xff] %v8384_v14  ;;  %v8390_v10 = vld [vmem:[%s10923_s29 + $0x300] ss:$12 sps:$4 sm:$0xff]  }
 0x281   :  { %1952 = vmatprep.subr.bf16.mxu0 %v8378_v59  ;;  %11236 = vst [vmem:[#allocation31_spill] sm:$0xff] %v8390_v10  ;;  %v8397_v59 = vld [vmem:[%s10923_s29 + $0x2ec] ss:$12 sps:$4 sm:$0xff]  }
 0x282   :  { %11237 = vst [vmem:[#allocation32_spill] sm:$0xff] %v8397_v59 }
 0x283   :  { %1994 = vmatpush1.bf16.msra.mxu1 %v8384_v14  ;;  %v8403_v14 = vld [vmem:[%s10923_s29 + $0x2f0] ss:$12 sps:$4 sm:$0xff]  }
 0x284   :  { %1953 = vmatpush1.bf16.msra.mxu0 %v8390_v10  ;;  %1995 = vmatprep.subr.bf16.mxu1 %v10955_v63  ;;  %11238 = vst [vmem:[#allocation33_spill] sm:$0xff] %v8403_v14  ;;  %v8409_v10 = vld [vmem:[%s10923_s29 + $0x2e8] ss:$12 sps:$4 sm:$0xff]  }
 0x285   :  { %1954 = vmatprep.subr.bf16.mxu0 %v8397_v59  ;;  %11239 = vst [vmem:[#allocation2_spill] sm:$0xff] %v8409_v10  ;;  %v8416_v59 = vld [vmem:[%s10923_s29 + $0x2d4] ss:$12 sps:$4 sm:$0xff]  }
 0x286   :  { %11240 = vst [vmem:[#allocation34_spill] sm:$0xff] %v8416_v59 }
 0x287   :  { %1996 = vmatpush1.bf16.msra.mxu1 %v8403_v14  ;;  %v8422_v14 = vld [vmem:[%s10923_s29 + $0x2d8] ss:$12 sps:$4 sm:$0xff]  }
 0x288   :  { %1955 = vmatpush1.bf16.msra.mxu0 %v8409_v10  ;;  %1997 = vmatprep.subr.bf16.mxu1 %v10955_v63  ;;  %11241 = vst [vmem:[#allocation35_spill] sm:$0xff] %v8422_v14  ;;  %v8428_v10 = vld [vmem:[%s10923_s29 + $0x2d0] ss:$12 sps:$4 sm:$0xff]  }
 0x289   :  { %1956 = vmatprep.subr.bf16.mxu0 %v8416_v59  ;;  %11242 = vst [vmem:[#allocation36_spill] sm:$0xff] %v8428_v10  ;;  %v8435_v59 = vld [vmem:[%s10923_s29 + $0x2bc] ss:$12 sps:$4 sm:$0xff]  }
 0x28a   :  { %11243 = vst [vmem:[#allocation37_spill] sm:$0xff] %v8435_v59 }
 0x28b   :  { %1998 = vmatpush1.bf16.msra.mxu1 %v8422_v14 }
 0x28c   :  { %1957 = vmatpush1.bf16.msra.mxu0 %v8428_v10  ;;  %1999 = vmatprep.subr.bf16.mxu1 %v10955_v63 }
 0x28d   :  { %1958 = vmatprep.subr.bf16.mxu0 %v8435_v59  ;;  %v8460_v59 = vld [vmem:[%s10923_s29 + $0x2a4] ss:$12 sps:$4 sm:$0xff]  }
 0x28e   :  { %v1679_v62 = vpop.f32.mrf.mxu1 }
 0x28f   :  { %v8439_v9 = vadd.f32 %v1679_v62, %v8155_v48  ;;  %v1638_v14 = vpop.f32.mrf.mxu0  ;;  %2000 = vmatpush1.bf16.msra.mxu1 %v8444_v7 }
 0x290   :  { %v8448_v10 = vadd.f32 %v1638_v14, %v8157_v46  ;;  %1959 = vmatpush1.bf16.msra.mxu0 %v8453_v6  ;;  %2001 = vmatprep.subr.bf16.mxu1 %v10955_v63  ;;  %v1681_v48 = vpop.f32.mrf.mxu1  ;;  %v8469_v6 = vld [vmem:[%s10923_s29 + $0x2a8] ss:$12 sps:$4 sm:$0xff]  }
 0x291   :  { %v1640_v62 = vpop.f32.mrf.mxu0  ;;  %1960 = vmatprep.subr.bf16.mxu0 %v8460_v59  ;;  %v8475_v48 = vld [vmem:[%s10923_s29 + $0x2a0] ss:$12 sps:$4 sm:$0xff]  }
 0x292   :  { %v8464_v46 = vadd.f32 %v1640_v62, %v8172_v17  ;;  %v1682_v14 = vpop.f32.mrf.mxu1  ;;  %11246 = vst [vmem:[#allocation40_spill] sm:$0xff] %v8475_v48 }
 0x293   :  { %v1642_v7 = vpop.f32.mrf.mxu0  ;;  %2002 = vmatpush1.bf16.msra.mxu1 %v8469_v6  ;;  %v8488_v14 = vld [vmem:[%s10923_s29 + $0x3e0] ss:$12 sps:$4 sm:$0xff]  }
 0x294   :  { %1961 = vmatpush1.bf16.msra.mxu0 %v8475_v48  ;;  %2007 = vmatprep.subr.bf16.mxu1 %v10955_v63  ;;  %v1683_v17 = vpop.f32.mrf.mxu1  ;;  %v8482_v7 = vld [vmem:[%s10923_s29 + $0x3dc] ss:$12 sps:$4 sm:$0xff]   ;;  %11248 = vst [vmem:[#allocation42_spill] sm:$0xff] %v8488_v14  ;;  %v8494_v48 = vld [vmem:[%s10923_s29 + $0x3d8] ss:$12 sps:$4 sm:$0xff]  }
 0x295   :  { %v1643_v62 = vpop.f32.mrf.mxu0  ;;  %11247 = vst [vmem:[#allocation41_spill] sm:$0xff] %v8482_v7  ;;  %1966 = vmatprep.subr.bf16.mxu0 %v8482_v7  ;;  %11249 = vst [vmem:[#allocation43_spill] sm:$0xff] %v8494_v48  ;;  %v8501_v17 = vld [vmem:[%s10923_s29 + $0x3c4] ss:$12 sps:$4 sm:$0xff]   ;;  %v8588_v7 = vld [vmem:[%s10923_s29 + $0x368] ss:$12 sps:$4 sm:$0xff]  }
 0x296   :  { %11250 = vst [vmem:[#allocation44_spill] sm:$0xff] %v8501_v17  ;;  %v8507_v62 = vld [vmem:[%s10923_s29 + $0x3c8] ss:$12 sps:$4 sm:$0xff]  }
 0x297   :  { %2008 = vmatpush2.bf16.msra.mxu1 %v8488_v14  ;;  %11251 = vst [vmem:[#allocation45_spill] sm:$0xff] %v8507_v62  ;;  %v8573_v14 = vld [vmem:[%s10923_s29 + $0x378] ss:$12 sps:$4 sm:$0xff]  }
 0x298   :  { %1967 = vmatpush2.bf16.msra.mxu0 %v8494_v48  ;;  %2009 = vmatprep.subr.bf16.mxu1 %v10955_v63  ;;  %v8513_v48 = vld [vmem:[%s10923_s29 + $0x3c0] ss:$12 sps:$4 sm:$0xff]   ;;  %11261 = vst [vmem:[#allocation78_spill] sm:$0xff] %v8573_v14 }
 0x299   :  { %1968 = vmatprep.subr.bf16.mxu0 %v8501_v17  ;;  %11252 = vst [vmem:[#allocation46_spill] sm:$0xff] %v8513_v48  ;;  %v8520_v17 = vld [vmem:[%s10923_s29 + $0x3ac] ss:$12 sps:$4 sm:$0xff]  }
 0x29a   :  { %11253 = vst [vmem:[#allocation3_spill] sm:$0xff] %v8520_v17 }
 0x29b   :  { %2010 = vmatpush2.bf16.msra.mxu1 %v8507_v62  ;;  %v8526_v62 = vld [vmem:[%s10923_s29 + $0x3b0] ss:$12 sps:$4 sm:$0xff]  }
 0x29c   :  { %1969 = vmatpush2.bf16.msra.mxu0 %v8513_v48  ;;  %2011 = vmatprep.subr.bf16.mxu1 %v10955_v63  ;;  %11254 = vst [vmem:[#allocation47_spill] sm:$0xff] %v8526_v62  ;;  %v8532_v48 = vld [vmem:[%s10923_s29 + $0x3a8] ss:$12 sps:$4 sm:$0xff]  }
 0x29d   :  { %1970 = vmatprep.subr.bf16.mxu0 %v8520_v17  ;;  %11255 = vst [vmem:[#allocation53_spill] sm:$0xff] %v8532_v48  ;;  %v8539_v17 = vld [vmem:[%s10923_s29 + $0x394] ss:$12 sps:$4 sm:$0xff]  }
 0x29e   :  { %11256 = vst [vmem:[#allocation54_spill] sm:$0xff] %v8539_v17 }
 0x29f   :  { %2012 = vmatpush2.bf16.msra.mxu1 %v8526_v62  ;;  %v8545_v62 = vld [vmem:[%s10923_s29 + $0x398] ss:$12 sps:$4 sm:$0xff]  }
 0x2a0   :  { %1971 = vmatpush2.bf16.msra.mxu0 %v8532_v48  ;;  %2013 = vmatprep.subr.bf16.mxu1 %v10955_v63  ;;  %11257 = vst [vmem:[#allocation55_spill] sm:$0xff] %v8545_v62  ;;  %v8551_v48 = vld [vmem:[%s10923_s29 + $0x390] ss:$12 sps:$4 sm:$0xff]  }
 0x2a1   :  { %1972 = vmatprep.subr.bf16.mxu0 %v8539_v17  ;;  %11258 = vst [vmem:[#allocation59_spill] sm:$0xff] %v8551_v48  ;;  %v8558_v17 = vld [vmem:[%s10923_s29 + $0x37c] ss:$12 sps:$4 sm:$0xff]  }
 0x2a2   :  { %11259 = vst [vmem:[#allocation4_spill] sm:$0xff] %v8558_v17 }
 0x2a3   :  { %2014 = vmatpush2.bf16.msra.mxu1 %v8545_v62  ;;  %v8564_v62 = vld [vmem:[%s10923_s29 + $0x380] ss:$12 sps:$4 sm:$0xff]  }
 0x2a4   :  { %1973 = vmatpush2.bf16.msra.mxu0 %v8551_v48  ;;  %2015 = vmatprep.subr.bf16.mxu1 %v10955_v63  ;;  %11260 = vst [vmem:[#allocation77_spill] sm:$0xff] %v8564_v62  ;;  %v5042_v48 = vld [vmem:[%s10924_s5 + $0x50] sm:$0xff] }
 0x2a5   :  { %1974 = vmatprep.subr.bf16.mxu0 %v8558_v17  ;;  %v8580_v17 = vld [vmem:[%s10923_s29 + $0x364] ss:$12 sps:$4 sm:$0xff]  }
 0x2a7   :  { %2016 = vmatpush2.bf16.msra.mxu1 %v8564_v62  ;;  %v8583_v62 = vpack.c.bf16 %v5042_v48, %v5042_v48  ;;  %v11297_v48 = vld [vmem:[#allocation18_spill] sm:$0xff] }
 0x2a8   :  { %1975 = vmatpush2.bf16.msra.mxu0 %v8573_v14  ;;  %2017 = vmatprep.subr.bf16.mxu1 %v10955_v63  ;;  %v8594_v14 = vld [vmem:[%s10923_s29 + $0x360] ss:$12 sps:$4 sm:$0xff]   ;;  %s11567_s29 = sld [smem:[#allocation124_spill]] }
 0x2a9   :  { %1976 = vmatprep.subr.bf16.mxu0 %v8580_v17 }
 0x2ab   :  { %2018 = vmatpush2.bf16.msra.mxu1 %v8588_v7 }
 0x2ac   :  { %1977 = vmatpush2.bf16.msra.mxu0 %v8594_v14  ;;  %2080 = vmatprep.subr.bf16.mxu1 %v10955_v63 }
 0x2ad   :  { %2039 = vmatprep.subr.bf16.mxu0 %v11142_v51 }
 0x2ae   :  { %2020 = vmatmul.mubr.bf16.vlgmr.msra.gmra.mxu1 %v8583_v62 }
 0x2af   :  { %1979 = vmatmul.mubr.bf16.vlgmr.msra.gmra.mxu0 %v8583_v62  ;;  %2081 = vmatpush1.bf16.msra.mxu1 %v11143_v52 }
 0x2b0   :  { %2040 = vmatpush1.bf16.msra.mxu0 %v11144_v53  ;;  %2082 = vmatprep.subr.bf16.mxu1 %v10955_v63 }
 0x2b1   :  { %2041 = vmatprep.subr.bf16.mxu0 %v11145_v54  ;;  %5308 = vmatprep.mubr.msk.bf16.mxu0 %vm536_vm0, %v8316_v38 }
 0x2b2   :  { %5309 = vmatprep.mubr.msk.bf16.mxu1 %vm536_vm0, %v8316_v38  ;;  %v11295_v38 = vld [vmem:[#allocation17_spill] sm:$0xff] }
 0x2b3   :  { %2083 = vmatpush1.bf16.msra.mxu1 %v11146_v55 }
 0x2b4   :  { %2042 = vmatpush1.bf16.msra.mxu0 %v11147_v56  ;;  %2084 = vmatprep.subr.bf16.mxu1 %v10955_v63 }
 0x2b5   :  { %2043 = vmatprep.subr.bf16.mxu0 %v11148_v58 }
 0x2b7   :  { %2085 = vmatpush1.bf16.msra.mxu1 %v11149_v60 }
 0x2b8   :  { %2044 = vmatpush1.bf16.msra.mxu0 %v11150_v1  ;;  %2086 = vmatprep.subr.bf16.mxu1 %v10955_v63 }
 0x2b9   :  { %2045 = vmatprep.subr.bf16.mxu0 %v11151_v15  ;;  %v11267_v15 = vld [vmem:[#allocation74_spill] sm:$0xff] }
 0x2bb   :  { %2087 = vmatpush1.bf16.msra.mxu1 %v11152_v19  ;;  %v11268_v19 = vld [vmem:[#allocation75_spill] sm:$0xff] }
 0x2bc   :  { %2046 = vmatpush1.bf16.msra.mxu0 %v11153_v43  ;;  %2088 = vmatprep.subr.bf16.mxu1 %v10955_v63  ;;  %v11269_v43 = vld [vmem:[#allocation76_spill] sm:$0xff] }
 0x2bd   :  { %2047 = vmatprep.subr.bf16.mxu0 %v11154_v4  ;;  %v11270_v4 = vld [vmem:[#allocation52_spill] sm:$0xff] }
 0x2bf   :  { %2089 = vmatpush1.bf16.msra.mxu1 %v11155_v20  ;;  %v11271_v20 = vld [vmem:[#allocation56_spill] sm:$0xff] }
 0x2c0   :  { %2048 = vmatpush1.bf16.msra.mxu0 %v11156_v13  ;;  %2090 = vmatprep.subr.bf16.mxu1 %v10955_v63 }
 0x2c1   :  { %2049 = vmatprep.subr.bf16.mxu0 %v11157_v2 }
 0x2c3   :  { %2091 = vmatpush1.bf16.msra.mxu1 %v11158_v8  ;;  %v11272_v8 = vld [vmem:[#allocation57_spill] sm:$0xff] }
 0x2c4   :  { %2050 = vmatpush1.bf16.msra.mxu0 %v11159_v12  ;;  %2092 = vmatprep.subr.bf16.mxu1 %v10955_v63  ;;  %v11273_v12 = vld [vmem:[#allocation58_spill] sm:$0xff] }
 0x2c5   :  { %2051 = vmatprep.subr.bf16.mxu0 %v7651_v42 }
 0x2c6   :  { %v1763_v51 = vpop.f32.mrf.mxu1 }
 0x2c7   :  { %v8630_v52 = vadd.f32 %v1763_v51, %v8439_v9  ;;  %v1722_v53 = vpop.f32.mrf.mxu0  ;;  %2093 = vmatpush1.bf16.msra.mxu1 %v7660_v44  ;;  %v11299_v51 = vld [vmem:[#allocation20_spill] sm:$0xff] }
 0x2c8   :  { %v8634_v54 = vadd.f32 %v1722_v53, %v8448_v10  ;;  %2052 = vmatpush1.bf16.msra.mxu0 %v11162_v28  ;;  %2094 = vmatprep.subr.bf16.mxu1 %v10955_v63  ;;  %v1765_v55 = vpop.f32.mrf.mxu1  ;;  %v11294_v10 = vld [vmem:[#allocation16_spill] sm:$0xff]  ;;  %v11300_v53 = vld [vmem:[#allocation21_spill] sm:$0xff] }
 0x2c9   :  { %v1724_v56 = vpop.f32.mrf.mxu0  ;;  %2053 = vmatprep.subr.bf16.mxu0 %v7676_v57  ;;  %v11262_v57 = vld [vmem:[#allocation62_spill] sm:$0xff] }
 0x2ca   :  { %v8640_v42 = vadd.f32 %v1724_v56, %v8464_v46  ;;  %v1766_v58 = vpop.f32.mrf.mxu1  ;;  %v11296_v46 = vld [vmem:[#allocation48_spill] sm:$0xff]  ;;  %v11301_v55 = vld [vmem:[#allocation22_spill] sm:$0xff]  ;;  %v11302_v56 = vld [vmem:[#allocation25_spill] sm:$0xff] }
 0x2cb   :  { %v1726_v60 = vpop.f32.mrf.mxu0  ;;  %2095 = vmatpush1.bf16.msra.mxu1 %v7685_v0  ;;  %v11263_v0 = vld [vmem:[#allocation64_spill] sm:$0xff]  ;;  %v11303_v58 = vld [vmem:[#allocation27_spill] sm:$0xff] }
 0x2cc   :  { %2054 = vmatpush1.bf16.msra.mxu0 %v7691_v5  ;;  %2100 = vmatprep.subr.bf16.mxu1 %v10955_v63  ;;  %v1767_v44 = vpop.f32.mrf.mxu1  ;;  %v11264_v5 = vld [vmem:[#allocation66_spill] sm:$0xff]  ;;  %v11304_v60 = vld [vmem:[#allocation28_spill] sm:$0xff] }
 0x2cd   :  { %v1727_v1 = vpop.f32.mrf.mxu0  ;;  %2059 = vmatprep.subr.bf16.mxu0 %v7698_v61  ;;  %v11265_v61 = vld [vmem:[#allocation67_spill] sm:$0xff]  ;;  %v11305_v44 = vld [vmem:[#allocation29_spill] sm:$0xff] }
 0x2ce   :  { %v11306_v1 = vld [vmem:[#allocation30_spill] sm:$0xff] }
 0x2cf   :  { %2101 = vmatpush2.bf16.msra.mxu1 %v11164_v18 }
 0x2d0   :  { %2060 = vmatpush2.bf16.msra.mxu0 %v11165_v21  ;;  %2102 = vmatprep.subr.bf16.mxu1 %v10955_v63  ;;  %v11274_v21 = vld [vmem:[#allocation60_spill] sm:$0xff] }
 0x2d1   :  { %2061 = vmatprep.subr.bf16.mxu0 %v11166_v22 }
 0x2d3   :  { %2103 = vmatpush2.bf16.msra.mxu1 %v11167_v23 }
 0x2d4   :  { %2062 = vmatpush2.bf16.msra.mxu0 %v11168_v24  ;;  %2104 = vmatprep.subr.bf16.mxu1 %v10955_v63  ;;  %v11275_v24 = vld [vmem:[#allocation61_spill] sm:$0xff] }
 0x2d5   :  { %2063 = vmatprep.subr.bf16.mxu0 %v11169_v25  ;;  %v11276_v25 = vld [vmem:[#allocation63_spill] sm:$0xff] }
 0x2d7   :  { %2105 = vmatpush2.bf16.msra.mxu1 %v11170_v26 }
 0x2d8   :  { %2064 = vmatpush2.bf16.msra.mxu0 %v11171_v27  ;;  %2106 = vmatprep.subr.bf16.mxu1 %v10955_v63 }
 0x2d9   :  { %2065 = vmatprep.subr.bf16.mxu0 %v11172_v29  ;;  %v11277_v29 = vld [vmem:[#allocation65_spill] sm:$0xff] }
 0x2db   :  { %2107 = vmatpush2.bf16.msra.mxu1 %v11173_v30  ;;  %v11278_v30 = vld [vmem:[#allocation69_spill] sm:$0xff] }
 0x2dc   :  { %2066 = vmatpush2.bf16.msra.mxu0 %v11174_v31  ;;  %2108 = vmatprep.subr.bf16.mxu1 %v10955_v63  ;;  %v11279_v31 = vld [vmem:[#allocation70_spill] sm:$0xff] }
 0x2dd   :  { %2067 = vmatprep.subr.bf16.mxu0 %v11175_v32  ;;  %v11280_v32 = vld [vmem:[#allocation71_spill] sm:$0xff] }
 0x2df   :  { %2109 = vmatpush2.bf16.msra.mxu1 %v11176_v33  ;;  %v11281_v33 = vld [vmem:[#allocation72_spill] sm:$0xff] }
 0x2e0   :  { %2068 = vmatpush2.bf16.msra.mxu0 %v11177_v34  ;;  %2110 = vmatprep.subr.bf16.mxu1 %v10955_v63  ;;  %v11282_v34 = vld [vmem:[#allocation73_spill] sm:$0xff] }
 0x2e1   :  { %2069 = vmatprep.subr.bf16.mxu0 %v11178_v35  ;;  %v11283_v35 = vld [vmem:[#allocation5_spill] sm:$0xff] }
 0x2e3   :  { %2111 = vmatpush2.bf16.msra.mxu1 %v11179_v36  ;;  %v11284_v36 = vld [vmem:[#allocation6_spill] sm:$0xff] }
 0x2e4   :  { %2070 = vmatpush2.bf16.msra.mxu0 %v11180_v37  ;;  %2161 = vmatprep.subr.bf16.mxu1 %v10955_v63  ;;  %v11285_v37 = vld [vmem:[#allocation7_spill] sm:$0xff] }
 0x2e5   :  { %2120 = vmatprep.subr.bf16.mxu0 %v11181_v39  ;;  %v11286_v39 = vld [vmem:[#allocation8_spill] sm:$0xff] }
 0x2e6   :  { %2113 = vmatmul.mubr.bf16.vlgmr.msra.gmra.mxu1 %v8583_v62 }
 0x2e7   :  { %2072 = vmatmul.mubr.bf16.vlgmr.msra.gmra.mxu0 %v8583_v62  ;;  %2162 = vmatpush1.bf16.msra.mxu1 %v11182_v40  ;;  %v11287_v40 = vld [vmem:[#allocation9_spill] sm:$0xff]  ;;  %v11298_v62 = vld [vmem:[#allocation19_spill] sm:$0xff] }
 0x2e8   :  { %2121 = vmatpush1.bf16.msra.mxu0 %v11183_v41  ;;  %2163 = vmatprep.subr.bf16.mxu1 %v10955_v63  ;;  %v11288_v41 = vld [vmem:[#allocation10_spill] sm:$0xff] }
 0x2e9   :  { %2122 = vmatprep.subr.bf16.mxu0 %v11184_v45  ;;  %5311 = vmatprep.mubr.msk.bf16.mxu1 %vm536_vm0, %v7966_v11  ;;  %v11289_v45 = vld [vmem:[#allocation11_spill] sm:$0xff] }
 0x2ea   :  { %5310 = vmatprep.mubr.msk.bf16.mxu0 %vm536_vm0, %v7966_v11  ;;  %v11266_v11 = vld [vmem:[#allocation68_spill] sm:$0xff] }
 0x2eb   :  { %2164 = vmatpush1.bf16.msra.mxu1 %v11186_v47  ;;  %v11290_v47 = vld [vmem:[#allocation12_spill] sm:$0xff] }
 0x2ec   :  { %2123 = vmatpush1.bf16.msra.mxu0 %v11187_v49  ;;  %2165 = vmatprep.subr.bf16.mxu1 %v10955_v63  ;;  %v11291_v49 = vld [vmem:[#allocation13_spill] sm:$0xff] }
 0x2ed   :  { %2124 = vmatprep.subr.bf16.mxu0 %v11188_v50  ;;  %v11292_v50 = vld [vmem:[#allocation14_spill] sm:$0xff] }
 0x2ef   :  { %2166 = vmatpush1.bf16.msra.mxu1 %v11189_v16  ;;  %v5045_v16 = vld [vmem:[%s10924_s5 + $0x68] sm:$0xff] }
 0x2f0   :  { %2125 = vmatpush1.bf16.msra.mxu0 %v11190_v3  ;;  %2167 = vmatprep.subr.bf16.mxu1 %v10955_v63  ;;  %v11293_v3 = vld [vmem:[#allocation15_spill] sm:$0xff]  ;;  %v140_v9 = vpack.c.bf16 %v5045_v16, %v5045_v16 }
 0x2f1   :  { %2126 = vmatprep.subr.bf16.mxu0 %v11262_v57  ;;  %v11307_v57 = vld [vmem:[#allocation31_spill] sm:$0xff] }
 0x2f3   :  { %2168 = vmatpush1.bf16.msra.mxu1 %v11263_v0  ;;  %v11308_v0 = vld [vmem:[#allocation32_spill] sm:$0xff] }
 0x2f4   :  { %2127 = vmatpush1.bf16.msra.mxu0 %v11264_v5  ;;  %2169 = vmatprep.subr.bf16.mxu1 %v10955_v63  ;;  %v11309_v5 = vld [vmem:[#allocation33_spill] sm:$0xff] }
 0x2f5   :  { %2128 = vmatprep.subr.bf16.mxu0 %v11265_v61  ;;  %v11310_v61 = vld [vmem:[#allocation2_spill] sm:$0xff] }
 0x2f7   :  { %2170 = vmatpush1.bf16.msra.mxu1 %v11266_v11  ;;  %v11311_v11 = vld [vmem:[#allocation34_spill] sm:$0xff] }
 0x2f8   :  { %2129 = vmatpush1.bf16.msra.mxu0 %v11267_v15  ;;  %2171 = vmatprep.subr.bf16.mxu1 %v10955_v63  ;;  %v11312_v15 = vld [vmem:[#allocation35_spill] sm:$0xff] }
 0x2f9   :  { %2130 = vmatprep.subr.bf16.mxu0 %v11268_v19  ;;  %v11313_v19 = vld [vmem:[#allocation36_spill] sm:$0xff] }
 0x2fb   :  { %2172 = vmatpush1.bf16.msra.mxu1 %v11269_v43  ;;  %v11314_v43 = vld [vmem:[#allocation37_spill] sm:$0xff] }
 0x2fc   :  { %2131 = vmatpush1.bf16.msra.mxu0 %v11270_v4  ;;  %2173 = vmatprep.subr.bf16.mxu1 %v10955_v63 }
 0x2fd   :  { %2132 = vmatprep.subr.bf16.mxu0 %v11271_v20 }
 0x2fe   :  { %v8700_v13 = vpop.f32.mrf.mxu1 }
 0x2ff   :  { %v8702_v2 = vpop.f32.mrf.mxu0  ;;  %2174 = vmatpush1.bf16.msra.mxu1 %v11272_v8 }
 0x300   :  { %2133 = vmatpush1.bf16.msra.mxu0 %v11273_v12  ;;  %2175 = vmatprep.subr.bf16.mxu1 %v10955_v63  ;;  %v1858_v28 = vpop.f32.mrf.mxu1  ;;  %v11315_v12 = vld [vmem:[#allocation38_spill] sm:$0xff] }
 0x301   :  { %v8707_v18 = vpop.f32.mrf.mxu0  ;;  %2134 = vmatprep.subr.bf16.mxu0 %v11274_v21  ;;  %v11316_v21 = vld [vmem:[#allocation39_spill] sm:$0xff] }
 0x302   :  { %v1859_v22 = vpop.f32.mrf.mxu1 }
 0x303   :  { %v1819_v23 = vpop.f32.mrf.mxu0  ;;  %2176 = vmatpush1.bf16.msra.mxu1 %v11275_v24 }
 0x304   :  { %2135 = vmatpush1.bf16.msra.mxu0 %v11276_v25  ;;  %2181 = vmatprep.subr.bf16.mxu1 %v10955_v63  ;;  %v1860_v26 = vpop.f32.mrf.mxu1 }
 0x305   :  { %v1820_v27 = vpop.f32.mrf.mxu0  ;;  %2140 = vmatprep.subr.bf16.mxu0 %v11277_v29  ;;  %v11317_v26 = vld [vmem:[#allocation40_spill] sm:$0xff]  ;;  %v11318_v29 = vld [vmem:[#allocation41_spill] sm:$0xff] }
 0x307   :  { %2182 = vmatpush2.bf16.msra.mxu1 %v11278_v30  ;;  %v11319_v30 = vld [vmem:[#allocation42_spill] sm:$0xff] }
 0x308   :  { %2141 = vmatpush2.bf16.msra.mxu0 %v11279_v31  ;;  %2183 = vmatprep.subr.bf16.mxu1 %v10955_v63  ;;  %v11320_v31 = vld [vmem:[#allocation43_spill] sm:$0xff] }
 0x309   :  { %2142 = vmatprep.subr.bf16.mxu0 %v11280_v32  ;;  %v11322_v32 = vld [vmem:[#allocation45_spill] sm:$0xff] }
 0x30b   :  { %2184 = vmatpush2.bf16.msra.mxu1 %v11281_v33  ;;  %v11324_v33 = vld [vmem:[#allocation3_spill] sm:$0xff] }
 0x30c   :  { %2143 = vmatpush2.bf16.msra.mxu0 %v11282_v34  ;;  %2185 = vmatprep.subr.bf16.mxu1 %v10955_v63 }
 0x30d   :  { %2144 = vmatprep.subr.bf16.mxu0 %v11283_v35  ;;  %v11325_v35 = vld [vmem:[#allocation47_spill] sm:$0xff] }
 0x30f   :  { %2186 = vmatpush2.bf16.msra.mxu1 %v11284_v36 }
 0x310   :  { %2145 = vmatpush2.bf16.msra.mxu0 %v11285_v37  ;;  %2187 = vmatprep.subr.bf16.mxu1 %v10955_v63  ;;  %v11327_v37 = vld [vmem:[#allocation53_spill] sm:$0xff] }
 0x311   :  { %2146 = vmatprep.subr.bf16.mxu0 %v11286_v39  ;;  %v11328_v39 = vld [vmem:[#allocation54_spill] sm:$0xff] }
 0x313   :  { %2188 = vmatpush2.bf16.msra.mxu1 %v11287_v40  ;;  %v8807_v40 = vld [vmem:[%s11329_s24] sm:$0x7] }
 0x314   :  { %2147 = vmatpush2.bf16.msra.mxu0 %v11288_v41  ;;  %2189 = vmatprep.subr.bf16.mxu1 %v10955_v63  ;;  %v11330_v41 = vld [vmem:[#allocation55_spill] sm:$0xff] }
 0x315   :  { %2148 = vmatprep.subr.bf16.mxu0 %v11289_v45 }
 0x317   :  { %2190 = vmatpush2.bf16.msra.mxu1 %v11290_v47  ;;  %v11332_v47 = vld [vmem:[#allocation59_spill] sm:$0xff] }
 0x318   :  { %2149 = vmatpush2.bf16.msra.mxu0 %v11291_v49  ;;  %2191 = vmatprep.subr.bf16.mxu1 %v10955_v63  ;;  %v11333_v49 = vld [vmem:[#allocation4_spill] sm:$0xff] }
 0x319   :  { %2150 = vmatprep.subr.bf16.mxu0 %v11292_v50  ;;  %v11334_v50 = vld [vmem:[#allocation51_spill] sm:$0xff] }
 0x31b   :  { %2192 = vmatpush2.bf16.msra.mxu1 %v11293_v3  ;;  %v11335_v3 = vld [vmem:[#allocation77_spill] sm:$0xff] }
 0x31c   :  { %2151 = vmatpush2.bf16.msra.mxu0 %v11294_v10  ;;  %2245 = vmatprep.subr.bf16.mxu1 %v10955_v63  ;;  %v5044_v10 = vld [vmem:[%s10924_s5 + $0x60] sm:$0xff]  ;;  %s6357_s5 = smov 2  }
 0x31d   :  { %2204 = vmatprep.subr.bf16.mxu0 %v11295_v38  ;;  %v11336_v38 = vld [vmem:[#allocation78_spill] sm:$0xff] }
 0x31e   :  { %2194 = vmatmul.mubr.bf16.vlgmr.msra.gmra.mxu1 %v11296_v46 }
 0x31f   :  { %2153 = vmatmul.mubr.bf16.vlgmr.msra.gmra.mxu0 %v11296_v46  ;;  %2246 = vmatpush1.bf16.msra.mxu1 %v11297_v48  ;;  %v8834_v46 = vld [vmem:[%s11337_s27 + $0x1b4] ss:$8 sps:$4 sm:$0xff]  }
 0x320   :  { %2205 = vmatpush1.bf16.msra.mxu0 %v11298_v62  ;;  %2247 = vmatprep.subr.bf16.mxu1 %v10955_v63  ;;  %11338 = vst [vmem:[#allocation66_spill] sm:$0xff] %v8834_v46  ;;  %v139_v62 = vpack.c.bf16 %v5044_v10, %v5044_v10 }
 0x321   :  { %2206 = vmatprep.subr.bf16.mxu0 %v11299_v51  ;;  %5313 = vmatprep.mubr.msk.bf16.mxu1 %vm536_vm0, %v140_v9  ;;  %v8840_v51 = vld [vmem:[%s11337_s27 + $0x270] ss:$8 sps:$4 sm:$0xff]  }
 0x322   :  { %5312 = vmatprep.mubr.msk.bf16.mxu0 %vm536_vm0, %v140_v9  ;;  %v8828_v9 = vld [vmem:[%s11337_s27 + $0x274] ss:$8 sps:$4 sm:$0xff]  }
 0x323   :  { %2248 = vmatpush1.bf16.msra.mxu1 %v11300_v53  ;;  %v8858_v53 = vld [vmem:[%s11337_s27 + $0x1a4] ss:$8 sps:$4 sm:$0xff]  }
 0x324   :  { %2207 = vmatpush1.bf16.msra.mxu0 %v11301_v55  ;;  %2249 = vmatprep.subr.bf16.mxu1 %v10955_v63  ;;  %11340 = vst [vmem:[#allocation68_spill] sm:$0xff] %v8858_v53 }
 0x325   :  { %2208 = vmatprep.subr.bf16.mxu0 %v11302_v56  ;;  %v8867_v56 = vld [vmem:[%s11337_s27 + $0x260] ss:$8 sps:$4 sm:$0xff]  }
 0x327   :  { %2250 = vmatpush1.bf16.msra.mxu1 %v11303_v58  ;;  %v8874_v58 = vld [vmem:[%s11337_s27 + $0x1a0] ss:$8 sps:$4 sm:$0xff]  }
 0x328   :  { %2209 = vmatpush1.bf16.msra.mxu0 %v11304_v60  ;;  %2251 = vmatprep.subr.bf16.mxu1 %v10955_v63  ;;  %11341 = vst [vmem:[#allocation74_spill] sm:$0xff] %v8874_v58  ;;  %v8879_v60 = vld [vmem:[%s11337_s27 + $0x254] ss:$8 sps:$4 sm:$0xff]  }
 0x329   :  { %2210 = vmatprep.subr.bf16.mxu0 %v11305_v44  ;;  %v8886_v44 = vld [vmem:[%s11337_s27 + $0x194] ss:$8 sps:$4 sm:$0xff]  }
 0x32a   :  { %11342 = vst [vmem:[#allocation75_spill] sm:$0xff] %v8886_v44 }
 0x32b   :  { %2252 = vmatpush1.bf16.msra.mxu1 %v11306_v1 }
 0x32c   :  { %2211 = vmatpush1.bf16.msra.mxu0 %v11307_v57  ;;  %2253 = vmatprep.subr.bf16.mxu1 %v10955_v63  ;;  %v8896_v57 = vld [vmem:[%s11337_s27 + $0x250] ss:$8 sps:$4 sm:$0xff]  }
 0x32d   :  { %2212 = vmatprep.subr.bf16.mxu0 %v11308_v0  ;;  %v11344_v0 = vld [vmem:[#allocation49_spill] sm:$0xff] }
 0x32f   :  { %2254 = vmatpush1.bf16.msra.mxu1 %v11309_v5 }
 0x330   :  { %2213 = vmatpush1.bf16.msra.mxu0 %v11310_v61  ;;  %2255 = vmatprep.subr.bf16.mxu1 %v10955_v63  ;;  %v8905_v61 = vld [vmem:[%s11337_s27 + $0x190] ss:$8 sps:$4 sm:$0xff]  }
 0x331   :  { %2214 = vmatprep.subr.bf16.mxu0 %v11311_v11  ;;  %11345 = vst [vmem:[#allocation52_spill] sm:$0xff] %v8905_v61  ;;  %v8910_v11 = vld [vmem:[%s11337_s27 + $0x244] ss:$8 sps:$4 sm:$0xff]  }
 0x333   :  { %2256 = vmatpush1.bf16.msra.mxu1 %v11312_v15  ;;  %v11346_v15 = vld [vmem:[#allocation26_spill] sm:$0xff] }
 0x334   :  { %2215 = vmatpush1.bf16.msra.mxu0 %v11313_v19  ;;  %2257 = vmatprep.subr.bf16.mxu1 %v10955_v63 }
 0x335   :  { %2216 = vmatprep.subr.bf16.mxu0 %v11314_v43  ;;  %v8918_v43 = vld [vmem:[%s11337_s27 + $0x184] ss:$8 sps:$4 sm:$0xff]  }
 0x336   :  { %v1937_v4 = vpop.f32.mrf.mxu1  ;;  %11347 = vst [vmem:[#allocation56_spill] sm:$0xff] %v8918_v43 }
 0x337   :  { %v8770_v20 = vadd.f32 %v1937_v4, %v8700_v13  ;;  %v1896_v8 = vpop.f32.mrf.mxu0  ;;  %2258 = vmatpush1.bf16.msra.mxu1 %v11315_v12  ;;  %v8924_v4 = vld [vmem:[%s11337_s27 + $0x240] ss:$8 sps:$4 sm:$0xff]  }
 0x338   :  { %v8774_v28 = vadd.f32 %v1896_v8, %v8702_v2  ;;  %2217 = vmatpush1.bf16.msra.mxu0 %v11316_v21  ;;  %2259 = vmatprep.subr.bf16.mxu1 %v10955_v63  ;;  %v1939_v22 = vpop.f32.mrf.mxu1  ;;  %v8931_v12 = vld [vmem:[%s11337_s27 + $0x180] ss:$8 sps:$4 sm:$0xff]   ;;  %v8936_v21 = vld [vmem:[%s11337_s27 + $0x74] ss:$8 sps:$4 sm:$0xff]  }
 0x339   :  { %v1898_v23 = vpop.f32.mrf.mxu0  ;;  %2218 = vmatprep.subr.bf16.mxu0 %v8460_v59  ;;  %v11321_v59 = vld [vmem:[#allocation44_spill] sm:$0xff]  ;;  %11348 = vst [vmem:[#allocation57_spill] sm:$0xff] %v8931_v12 }
 0x33a   :  { %v8780_v24 = vadd.f32 %v1898_v23, %v8707_v18  ;;  %v1940_v25 = vpop.f32.mrf.mxu1  ;;  %v10748_v18 = vlaneseq  ;;  %v8942_v23 = vld [vmem:[%s11337_s27 + $0x174] ss:$8 sps:$4 sm:$0xff]  }
 0x33b   :  { %v1900_v13 = vpop.f32.mrf.mxu0  ;;  %2260 = vmatpush1.bf16.msra.mxu1 %v8469_v6  ;;  %v11323_v6 = vld [vmem:[#allocation46_spill] sm:$0xff]  ;;  %11349 = vst [vmem:[#allocation58_spill] sm:$0xff] %v8942_v23  ;;  %v8948_v25 = vld [vmem:[%s11337_s27 + $0x70] ss:$8 sps:$4 sm:$0xff]  }
 0x33c   :  { %2219 = vmatpush1.bf16.msra.mxu0 %v11317_v26  ;;  %2265 = vmatprep.subr.bf16.mxu1 %v10955_v63  ;;  %v1941_v2 = vpop.f32.mrf.mxu1  ;;  %v8795_v34 = vshrl.u32 %v10748_v18, 7  ;;  %v8957_v26 = vld [vmem:[%s11337_s27 + $0x170] ss:$8 sps:$4 sm:$0xff]   ;;  %v9147_v18 = vld [vmem:[%s11337_s27 + $0x1f4] ss:$8 sps:$4 sm:$0xff]  }
 0x33d   :  { %v1901_v27 = vpop.f32.mrf.mxu0  ;;  %2224 = vmatprep.subr.bf16.mxu0 %v11318_v29  ;;  %11351 = vst [vmem:[#allocation61_spill] sm:$0xff] %v8957_v26  ;;  %v8962_v2 = vld [vmem:[%s11337_s27 + $0x64] ss:$8 sps:$4 sm:$0xff]  }
 0x33e   :  { %v8799_v36 = vsub.s32 1, %v8795_v34  ;;  %11352 = vst [vmem:[#allocation63_spill] sm:$0xff] %v8962_v2  ;;  %v8968_v29 = vld [vmem:[%s11337_s27 + $0x164] ss:$8 sps:$4 sm:$0xff]  }
 0x33f   :  { %2266 = vmatpush2.bf16.msra.mxu1 %v11319_v30  ;;  %11353 = vst [vmem:[#allocation65_spill] sm:$0xff] %v8968_v29  ;;  %v8976_v30 = vld [vmem:[%s11337_s27 + $0x60] ss:$8 sps:$4 sm:$0xff]  }
 0x340   :  { %2225 = vmatpush2.bf16.msra.mxu0 %v11320_v31  ;;  %2267 = vmatprep.subr.bf16.mxu1 %v10955_v63  ;;  %11326 = vst [vmem:[#allocation62_spill] sm:$0xff] %v8799_v36  ;;  %v8812_v45 = vrot.slane %v8807_v40, %v8799_v36  ;;  %11354 = vst [vmem:[#allocation69_spill] sm:$0xff] %v8976_v30  ;;  %v8983_v31 = vld [vmem:[%s11337_s27 + $0x160] ss:$8 sps:$4 sm:$0xff]   ;;  %v9153_v36 = vld [vmem:[%s11337_s27 + $0xf0] ss:$8 sps:$4 sm:$0xff]  }
 0x341   :  { %2226 = vmatprep.subr.bf16.mxu0 %v11321_v59  ;;  %11355 = vst [vmem:[#allocation70_spill] sm:$0xff] %v8983_v31  ;;  %v8988_v59 = vld [vmem:[%s11337_s27 + $0x54] ss:$8 sps:$4 sm:$0xff]   ;;  %11383 = vst [vmem:[#allocation31_spill] sm:$0xff] %v9153_v36 }
 0x342   :  { %11331 = vst [vmem:[#allocation64_spill] sm:$0xff] %v8812_v45  ;;  %v1515_v16 = vadd.f32 %v11334_v50, %v8812_v45  ;;  %v1257_v19 = vadd.f32 %v8812_v45, %v11346_v15  ;;  %11356 = vst [vmem:[#allocation71_spill] sm:$0xff] %v8988_v59 }
 0x343   :  { %2268 = vmatpush2.bf16.msra.mxu1 %v11322_v32  ;;  %v8994_v32 = vld [vmem:[%s11337_s27 + $0x154] ss:$8 sps:$4 sm:$0xff]  }
 0x344   :  { %2227 = vmatpush2.bf16.msra.mxu0 %v11323_v6  ;;  %2269 = vmatprep.subr.bf16.mxu1 %v10955_v63  ;;  %v1518_v48 = vmax.f32 %v1515_v16, 0.0  ;;  %v1260_v22 = vmax.f32 %v1257_v19, 0.0  ;;  %11357 = vst [vmem:[#allocation72_spill] sm:$0xff] %v8994_v32  ;;  %v9000_v6 = vld [vmem:[%s11337_s27 + $0x50] ss:$8 sps:$4 sm:$0xff]  }
 0x345   :  { %2228 = vmatprep.subr.bf16.mxu0 %v11324_v33  ;;  %11358 = vst [vmem:[#allocation73_spill] sm:$0xff] %v9000_v6  ;;  %v9007_v33 = vld [vmem:[%s11337_s27 + $0x150] ss:$8 sps:$4 sm:$0xff]   ;;  %v9042_v16 = vld [vmem:[%s11337_s27 + $0x34] ss:$8 sps:$4 sm:$0xff]  }
 0x346   :  { %v8861_v55 = vpack.c.bf16 %v1518_v48, %v1518_v48  ;;  %v1263_v27 = vpack.c.bf16 %v1260_v22, %v1260_v22  ;;  %11359 = vst [vmem:[#allocation5_spill] sm:$0xff] %v9007_v33  ;;  %11366 = vst [vmem:[#allocation12_spill] sm:$0xff] %v9042_v16  ;;  %v9075_v19 = vld [vmem:[%s11337_s27 + $0x224] ss:$8 sps:$4 sm:$0xff]   ;;  %v9088_v22 = vld [vmem:[%s11337_s27 + $0x220] ss:$8 sps:$4 sm:$0xff]  }
 0x347   :  { %2270 = vmatpush2.bf16.msra.mxu1 %v11325_v35  ;;  %v9012_v35 = vld [vmem:[%s11337_s27 + $0x44] ss:$8 sps:$4 sm:$0xff]   ;;  %11372 = vst [vmem:[#allocation48_spill] sm:$0xff] %v9075_v19  ;;  %11374 = vst [vmem:[#allocation19_spill] sm:$0xff] %v9088_v22 }
 0x348   :  { %2229 = vmatpush2.bf16.msra.mxu0 %v11327_v37  ;;  %2271 = vmatprep.subr.bf16.mxu1 %v10955_v63  ;;  %11360 = vst [vmem:[#allocation6_spill] sm:$0xff] %v9012_v35  ;;  %v9018_v37 = vld [vmem:[%s11337_s27 + $0x144] ss:$8 sps:$4 sm:$0xff]  }
 0x349   :  { %2230 = vmatprep.subr.bf16.mxu0 %v11328_v39  ;;  %11361 = vst [vmem:[#allocation7_spill] sm:$0xff] %v9018_v37 }
 0x34b   :  { %2272 = vmatpush2.bf16.msra.mxu1 %v11330_v41 }
 0x34c   :  { %2231 = vmatpush2.bf16.msra.mxu0 %v11332_v47  ;;  %2273 = vmatprep.subr.bf16.mxu1 %v10955_v63 }
 0x34d   :  { %2232 = vmatprep.subr.bf16.mxu0 %v11333_v49  ;;  %v9027_v49 = vld [vmem:[%s11337_s27 + $0x40] ss:$8 sps:$4 sm:$0xff]  }
 0x34e   :  { %11363 = vst [vmem:[#allocation9_spill] sm:$0xff] %v9027_v49 }
 0x34f   :  { %2274 = vmatpush2.bf16.msra.mxu1 %v11335_v3 }
 0x350   :  { %2233 = vmatpush2.bf16.msra.mxu0 %v11336_v38  ;;  %2275 = vmatprep.subr.bf16.mxu1 %v10955_v63 }
 0x351   :  { %2234 = vmatprep.subr.bf16.mxu0 %v8580_v17  ;;  %v8847_v17 = vld [vmem:[%s11337_s27 + $0x1b0] ss:$8 sps:$4 sm:$0xff]  }
 0x352   :  { %11339 = vst [vmem:[#allocation67_spill] sm:$0xff] %v8847_v17 }
 0x353   :  { %2276 = vmatpush2.bf16.msra.mxu1 %v8588_v7  ;;  %v8853_v7 = vld [vmem:[%s11337_s27 + $0x264] ss:$8 sps:$4 sm:$0xff]  }
 0x354   :  { %2235 = vmatpush2.bf16.msra.mxu0 %v8594_v14  ;;  %2673 = vmatprep.subr.bf16.mxu1 %v8828_v9  ;;  %v1251_v14 = vsub.s32 2, %v8795_v34 }
 0x355   :  { %2624 = vmatprep.subr.bf16.mxu0 %v8834_v46 }
 0x356   :  { %2278 = vmatmul.mubr.bf16.vlgmr.msra.gmra.mxu1 %v139_v62  ;;  %v8889_v1 = vrot.slane %v8807_v40, %v1251_v14  ;;  %v9057_v14 = vld [vmem:[%s11337_s27 + $0x30] ss:$8 sps:$4 sm:$0xff]  }
 0x357   :  { %2237 = vmatmul.mubr.bf16.vlgmr.msra.gmra.mxu0 %v139_v62  ;;  %2674 = vmatpush1.bf16.msra.mxu1 %v8840_v51  ;;  %11369 = vst [vmem:[#allocation15_spill] sm:$0xff] %v9057_v14 }
 0x358   :  { %2625 = vmatpush1.bf16.msra.mxu0 %v8847_v17  ;;  %2656 = vmatprep.mubr.bf16.mxu0 %v8861_v55  ;;  %11343 = vst [vmem:[#allocation76_spill] sm:$0xff] %v8889_v1  ;;  %v1516_v5 = vadd.f32 %v11344_v0, %v8889_v1  ;;  %v9064_v0 = vld [vmem:[%s11337_s27 + $0x230] ss:$8 sps:$4 sm:$0xff]  }
 0x359   :  { %2675 = vmatprep.subr.bf16.mxu1 %v8853_v7  ;;  %2626 = vmatprep.subr.bf16.mxu0 %v8858_v53  ;;  %11370 = vst [vmem:[#allocation16_spill] sm:$0xff] %v9064_v0 }
 0x35a   :  { %2697 = vmatprep.mubr.bf16.mxu1 %v10955_v63  ;;  %v1519_v8 = vmax.f32 %v1516_v5, 0.0 }
 0x35b   :  { %2676 = vmatpush1.bf16.msra.mxu1 %v8867_v56 }
 0x35c   :  { %2627 = vmatpush1.bf16.msra.mxu0 %v8874_v58  ;;  %2677 = vmatprep.subr.bf16.mxu1 %v8879_v60  ;;  %v8950_v13 = vpack.c.bf16 %v1519_v8, %v1519_v8  ;;  %v9081_v8 = vld [vmem:[%s11337_s27 + $0x20] ss:$8 sps:$4 sm:$0xff]  }
 0x35d   :  { %2628 = vmatprep.subr.bf16.mxu0 %v8886_v44  ;;  %11373 = vst [vmem:[#allocation18_spill] sm:$0xff] %v9081_v8 }
 0x35e   :  { %11350 = vst [vmem:[#allocation60_spill] sm:$0xff] %v8950_v13 }
 0x35f   :  { %2678 = vmatpush1.bf16.msra.mxu1 %v8896_v57 }
 0x360   :  { %2629 = vmatpush1.bf16.msra.mxu0 %v8905_v61  ;;  %2679 = vmatprep.subr.bf16.mxu1 %v8910_v11 }
 0x361   :  { %2630 = vmatprep.subr.bf16.mxu0 %v8918_v43 }
 0x363   :  { %2680 = vmatpush1.bf16.msra.mxu1 %v8924_v4 }
 0x364   :  { %2631 = vmatpush1.bf16.msra.mxu0 %v8931_v12  ;;  %2909 = vmatprep.subr.bf16.mxu1 %v8936_v21 }
 0x365   :  { %2632 = vmatprep.subr.bf16.mxu0 %v8942_v23 }
 0x366   :  { %5434 = vmatmul.mubr.msk.bf16.vlgmr.msra.gmra.mxu1 %vm2620_vm1, %v8950_v13  ;;  %v9252_v13 = vld [vmem:[%s11337_s27 + $0x134] ss:$8 sps:$4 sm:$0xff]  }
 0x367   :  { %2910 = vmatpush1.bf16.msra.mxu1 %v8948_v25  ;;  %2941 = vmatprep.mubr.bf16.mxu1 %v1263_v27  ;;  %v9093_v27 = vld [vmem:[%s11337_s27 + $0x14] ss:$8 sps:$4 sm:$0xff]   ;;  %11399 = vst [vmem:[#allocation45_spill] sm:$0xff] %v9252_v13 }
 0x368   :  { %2633 = vmatpush1.bf16.msra.mxu0 %v8957_v26  ;;  %2911 = vmatprep.subr.bf16.mxu1 %v8962_v2  ;;  %11375 = vst [vmem:[#allocation20_spill] sm:$0xff] %v9093_v27 }
 0x369   :  { %2634 = vmatprep.subr.bf16.mxu0 %v8968_v29 }
 0x36b   :  { %2912 = vmatpush1.bf16.msra.mxu1 %v8976_v30 }
 0x36c   :  { %2635 = vmatpush1.bf16.msra.mxu0 %v8983_v31  ;;  %2913 = vmatprep.subr.bf16.mxu1 %v8988_v59  ;;  %v9319_v59 = vld [vmem:[%s11337_s27 + $0x110] ss:$8 sps:$4 sm:$0xff]  }
 0x36d   :  { %2636 = vmatprep.subr.bf16.mxu0 %v8994_v32  ;;  %11411 = vst [vmem:[#allocation78_spill] sm:$0xff] %v9319_v59 }
 0x36e   :  { %v2021_v39 = vpop.f32.mrf.mxu1 }
 0x36f   :  { %v9021_v41 = vadd.f32 %v2021_v39, %v8770_v20  ;;  %v1980_v47 = vpop.f32.mrf.mxu0  ;;  %2914 = vmatpush1.bf16.msra.mxu1 %v9000_v6  ;;  %v9037_v20 = vld [vmem:[%s11337_s27 + $0x140] ss:$8 sps:$4 sm:$0xff]   ;;  %v9099_v39 = vld [vmem:[%s11337_s27 + $0x214] ss:$8 sps:$4 sm:$0xff]  }
 0x370   :  { %v9030_v50 = vadd.f32 %v1980_v47, %v8774_v28  ;;  %2637 = vmatpush1.bf16.msra.mxu0 %v9007_v33  ;;  %2915 = vmatprep.subr.bf16.mxu1 %v9012_v35  ;;  %11365 = vst [vmem:[#allocation11_spill] sm:$0xff] %v9037_v20  ;;  %v2023_v3 = vpop.f32.mrf.mxu1  ;;  %v9048_v28 = vld [vmem:[%s11337_s27 + $0x234] ss:$8 sps:$4 sm:$0xff]   ;;  %11376 = vst [vmem:[#allocation21_spill] sm:$0xff] %v9099_v39  ;;  %v9105_v47 = vld [vmem:[%s11337_s27 + $0x10] ss:$8 sps:$4 sm:$0xff]  }
 0x371   :  { %11362 = vst [vmem:[#allocation8_spill] sm:$0xff] %v9021_v41  ;;  %v1982_v10 = vpop.f32.mrf.mxu0  ;;  %2638 = vmatprep.subr.bf16.mxu0 %v9018_v37  ;;  %11367 = vst [vmem:[#allocation13_spill] sm:$0xff] %v9048_v28  ;;  %v9112_v3 = vld [vmem:[%s11337_s27 + $0x210] ss:$8 sps:$4 sm:$0xff]  }
 0x372   :  { %11364 = vst [vmem:[#allocation10_spill] sm:$0xff] %v9030_v50  ;;  %v9051_v38 = vadd.f32 %v1982_v10, %v8780_v24  ;;  %v2024_v48 = vpop.f32.mrf.mxu1  ;;  %v9069_v24 = vld [vmem:[%s11337_s27 + $0x24] ss:$8 sps:$4 sm:$0xff]   ;;  %11377 = vst [vmem:[#allocation22_spill] sm:$0xff] %v9105_v47  ;;  %v9160_v41 = vld [vmem:[%s11337_s27 + $0x1f0] ss:$8 sps:$4 sm:$0xff]  }
 0x373   :  { %v1984_v62 = vpop.f32.mrf.mxu0  ;;  %2916 = vmatpush1.bf16.msra.mxu1 %v9027_v49  ;;  %11371 = vst [vmem:[#allocation17_spill] sm:$0xff] %v9069_v24  ;;  %11378 = vst [vmem:[#allocation25_spill] sm:$0xff] %v9112_v3  ;;  %v9117_v10 = vld [vmem:[%s11337_s27 + $0x4] ss:$8 sps:$4 sm:$0xff]   ;;  %v11410_v35 = vld [vmem:[#allocation24_spill] sm:$0xff] }
 0x374   :  { %11368 = vst [vmem:[#allocation14_spill] sm:$0xff] %v9051_v38  ;;  %2639 = vmatpush1.bf16.msra.mxu0 %v9037_v20  ;;  %2917 = vmatprep.subr.bf16.mxu1 %v9042_v16  ;;  %v2025_v5 = vpop.f32.mrf.mxu1  ;;  %11379 = vst [vmem:[#allocation27_spill] sm:$0xff] %v9117_v10  ;;  %v9123_v48 = vld [vmem:[%s11337_s27 + $0x204] ss:$8 sps:$4 sm:$0xff]   ;;  %v9129_v62 = vld [vmem:[%s11337_s27] ss:$8 sps:$4 sm:$0xff]  }
 0x375   :  { %v1985_v15 = vpop.f32.mrf.mxu0  ;;  %2640 = vmatprep.subr.bf16.mxu0 %v9048_v28  ;;  %11380 = vst [vmem:[#allocation28_spill] sm:$0xff] %v9123_v48  ;;  %11381 = vst [vmem:[#allocation29_spill] sm:$0xff] %v9129_v62  ;;  %v9136_v5 = vld [vmem:[%s11337_s27 + $0x200] ss:$8 sps:$4 sm:$0xff]   ;;  %v9165_v50 = vld [vmem:[%s11337_s27 + $0xe4] ss:$8 sps:$4 sm:$0xff]  }
 0x376   :  { %v9141_v15 = vld [vmem:[%s11337_s27 + $0xf4] ss:$8 sps:$4 sm:$0xff]   ;;  %11384 = vst [vmem:[#allocation32_spill] sm:$0xff] %v9165_v50  ;;  %v9270_v16 = vld [vmem:[%s11337_s27 + $0xa4] ss:$8 sps:$4 sm:$0xff]  }
 0x377   :  { %2918 = vmatpush1.bf16.msra.mxu1 %v9057_v14  ;;  %11382 = vst [vmem:[#allocation30_spill] sm:$0xff] %v9141_v15  ;;  %v9246_v14 = vld [vmem:[%s11337_s27 + $0xb4] ss:$8 sps:$4 sm:$0xff]   ;;  %11402 = vst [vmem:[#allocation47_spill] sm:$0xff] %v9270_v16  ;;  %v9278_v49 = vld [vmem:[%s11337_s27 + $0x124] ss:$8 sps:$4 sm:$0xff]  }
 0x378   :  { %2641 = vmatpush2.bf16.msra.mxu0 %v9064_v0  ;;  %2919 = vmatprep.subr.bf16.mxu1 %v9069_v24  ;;  %v9228_v24 = vld [vmem:[%s11337_s27 + $0x1c4] ss:$8 sps:$4 sm:$0xff]   ;;  %11398 = vst [vmem:[#allocation44_spill] sm:$0xff] %v9246_v14  ;;  %11404 = vst [vmem:[#allocation54_spill] sm:$0xff] %v9278_v49 }
 0x379   :  { %2642 = vmatprep.subr.bf16.mxu0 %v9075_v19  ;;  %11395 = vst [vmem:[#allocation41_spill] sm:$0xff] %v9228_v24  ;;  %v11413_v38 = vld [vmem:[#allocation23_spill] sm:$0xff] }
 0x37a   :  { %v1258_v30 = vadd.f32 %v8889_v1, %v11413_v38  ;;  %v9347_v38 = vld [vmem:[%s11337_s27 + $0x100] ss:$8 sps:$4 sm:$0xff]  }
 0x37b   :  { %2920 = vmatpush1.bf16.msra.mxu1 %v9081_v8  ;;  %v9215_v8 = vld [vmem:[%s11337_s27 + $0x1d0] ss:$8 sps:$4 sm:$0xff]   ;;  %11416 = vst [vmem:[#allocation24_spill] sm:$0xff] %v9347_v38 }
 0x37c   :  { %2643 = vmatpush2.bf16.msra.mxu0 %v9088_v22  ;;  %2921 = vmatprep.subr.bf16.mxu1 %v9093_v27  ;;  %v9208_v27 = vld [vmem:[%s11337_s27 + $0xd0] ss:$8 sps:$4 sm:$0xff]   ;;  %11392 = vst [vmem:[#allocation39_spill] sm:$0xff] %v9215_v8 }
 0x37d   :  { %2644 = vmatprep.subr.bf16.mxu0 %v9099_v39  ;;  %11391 = vst [vmem:[#allocation38_spill] sm:$0xff] %v9208_v27 }
 0x37f   :  { %2922 = vmatpush1.bf16.msra.mxu1 %v9105_v47  ;;  %v9187_v47 = vld [vmem:[%s11337_s27 + $0x1e0] ss:$8 sps:$4 sm:$0xff]  }
 0x380   :  { %2645 = vmatpush2.bf16.msra.mxu0 %v9112_v3  ;;  %2923 = vmatprep.subr.bf16.mxu1 %v9117_v10  ;;  %v9174_v10 = vsub.s32 0, %v8795_v34  ;;  %11387 = vst [vmem:[#allocation34_spill] sm:$0xff] %v9187_v47  ;;  %v9192_v34 = vld [vmem:[%s11337_s27 + $0xd4] ss:$8 sps:$4 sm:$0xff]  }
 0x381   :  { %2646 = vmatprep.subr.bf16.mxu0 %v9123_v48  ;;  %11388 = vst [vmem:[#allocation35_spill] sm:$0xff] %v9192_v34 }
 0x382   :  { %11385 = vst [vmem:[#allocation33_spill] sm:$0xff] %v9174_v10 }
 0x383   :  { %2924 = vmatpush1.bf16.msra.mxu1 %v9129_v62  ;;  %v9171_v62 = vld [vmem:[%s11337_s27 + $0x1e4] ss:$8 sps:$4 sm:$0xff]  }
 0x384   :  { %2647 = vmatpush2.bf16.msra.mxu0 %v9136_v5  ;;  %2925 = vmatprep.subr.bf16.mxu1 %v9141_v15  ;;  %v9180_v15 = vld [vmem:[%s11337_s27 + $0xe0] ss:$8 sps:$4 sm:$0xff]  }
 0x385   :  { %2648 = vmatprep.subr.bf16.mxu0 %v9147_v18  ;;  %11386 = vst [vmem:[#allocation2_spill] sm:$0xff] %v9180_v15 }
 0x387   :  { %2926 = vmatpush2.bf16.msra.mxu1 %v9153_v36  ;;  %v9198_v36 = vld [vmem:[%s11337_s27 + $0x1d4] ss:$8 sps:$4 sm:$0xff]  }
 0x388   :  { %2649 = vmatpush2.bf16.msra.mxu0 %v9160_v41  ;;  %2927 = vmatprep.subr.bf16.mxu1 %v9165_v50  ;;  %11389 = vst [vmem:[#allocation36_spill] sm:$0xff] %v9198_v36  ;;  %v9202_v50 = vrot.slane %v8807_v40, %v9174_v10  ;;  %v9220_v40 = vld [vmem:[%s11337_s27 + $0xc4] ss:$8 sps:$4 sm:$0xff]  }
 0x389   :  { %2650 = vmatprep.subr.bf16.mxu0 %v9171_v62  ;;  %11393 = vst [vmem:[#allocation40_spill] sm:$0xff] %v9220_v40  ;;  %v11394_v10 = vld [vmem:[#allocation50_spill] sm:$0xff] }
 0x38a   :  { %11390 = vst [vmem:[#allocation37_spill] sm:$0xff] %v9202_v50  ;;  %v1256_v6 = vadd.f32 %v9202_v50, %v11410_v35  ;;  %v9332_v35 = vld [vmem:[%s11337_s27 + $0x104] ss:$8 sps:$4 sm:$0xff]  }
 0x38b   :  { %2928 = vmatpush2.bf16.msra.mxu1 %v9180_v15  ;;  %v1514_v15 = vadd.f32 %v11394_v10, %v9202_v50  ;;  %v9241_v10 = vld [vmem:[%s11337_s27 + $0x1c0] ss:$8 sps:$4 sm:$0xff]   ;;  %11414 = vst [vmem:[#allocation26_spill] sm:$0xff] %v9332_v35 }
 0x38c   :  { %2651 = vmatpush2.bf16.msra.mxu0 %v9187_v47  ;;  %2929 = vmatprep.subr.bf16.mxu1 %v9192_v34  ;;  %v9234_v34 = vld [vmem:[%s11337_s27 + $0xc0] ss:$8 sps:$4 sm:$0xff]   ;;  %11397 = vst [vmem:[#allocation43_spill] sm:$0xff] %v9241_v10  ;;  %v1259_v2 = vmax.f32 %v1256_v6, 0.0  ;;  %v9358_v6 = vld [vmem:[%s11337_s27 + $0x2f4] ss:$8 sps:$4 sm:$0xff]  }
 0x38d   :  { %2652 = vmatprep.subr.bf16.mxu0 %v9198_v36  ;;  %11396 = vst [vmem:[#allocation42_spill] sm:$0xff] %v9234_v34  ;;  %11418 = vst [vmem:[#allocation79_spill] sm:$0xff] %v9358_v6 }
 0x38f   :  { %2930 = vmatpush2.bf16.msra.mxu1 %v9208_v27  ;;  %v1517_v27 = vmax.f32 %v1514_v15, 0.0  ;;  %v9265_v15 = vld [vmem:[%s11337_s27 + $0x130] ss:$8 sps:$4 sm:$0xff]  }
 0x390   :  { %2653 = vmatpush2.bf16.msra.mxu0 %v9215_v8  ;;  %2931 = vmatprep.subr.bf16.mxu1 %v9220_v40  ;;  %v9258_v40 = vld [vmem:[%s11337_s27 + $0xb0] ss:$8 sps:$4 sm:$0xff]   ;;  %11401 = vst [vmem:[#allocation3_spill] sm:$0xff] %v9265_v15 }
 0x391   :  { %2654 = vmatprep.subr.bf16.mxu0 %v9228_v24  ;;  %11400 = vst [vmem:[#allocation46_spill] sm:$0xff] %v9258_v40 }
 0x393   :  { %2932 = vmatpush2.bf16.msra.mxu1 %v9234_v34  ;;  %v9272_v34 = vpack.c.bf16 %v1517_v27, %v1517_v27  ;;  %v9292_v27 = vld [vmem:[%s11337_s27 + $0x120] ss:$8 sps:$4 sm:$0xff]  }
 0x394   :  { %2655 = vmatpush2.bf16.msra.mxu0 %v9241_v10  ;;  %2933 = vmatprep.subr.bf16.mxu1 %v9246_v14  ;;  %v9285_v14 = vld [vmem:[%s11337_s27 + $0xa0] ss:$8 sps:$4 sm:$0xff]   ;;  %11406 = vst [vmem:[#allocation59_spill] sm:$0xff] %v9292_v27 }
 0x395   :  { %11403 = vst [vmem:[#allocation53_spill] sm:$0xff] %v9272_v34  ;;  %2958 = vmatprep.subr.bf16.mxu0 %v9252_v13  ;;  %11405 = vst [vmem:[#allocation55_spill] sm:$0xff] %v9285_v14 }
 0x397   :  { %2657 = vmatmul.mubr.bf16.vlgmr.msra.gmra.mxu0 %v9272_v34  ;;  %2934 = vmatpush2.bf16.msra.mxu1 %v9258_v40  ;;  %v9297_v34 = vld [vmem:[%s11337_s27 + $0x94] ss:$8 sps:$4 sm:$0xff]  }
 0x398   :  { %2959 = vmatpush1.bf16.msra.mxu0 %v9265_v15  ;;  %2935 = vmatprep.subr.bf16.mxu1 %v9270_v16  ;;  %11407 = vst [vmem:[#allocation4_spill] sm:$0xff] %v9297_v34  ;;  %v9303_v40 = vld [vmem:[%s11337_s27 + $0x114] ss:$8 sps:$4 sm:$0xff]   ;;  %v9310_v16 = vld [vmem:[%s11337_s27 + $0x90] ss:$8 sps:$4 sm:$0xff]  }
 0x399   :  { %2960 = vmatprep.subr.bf16.mxu0 %v9278_v49  ;;  %11408 = vst [vmem:[#allocation51_spill] sm:$0xff] %v9303_v40  ;;  %2982 = vmatprep.mubr.bf16.mxu0 %v10955_v63  ;;  %11409 = vst [vmem:[#allocation77_spill] sm:$0xff] %v9310_v16 }
 0x39b   :  { %2936 = vmatpush2.bf16.msra.mxu1 %v9285_v14  ;;  %v9324_v14 = vld [vmem:[%s11337_s27 + $0x84] ss:$8 sps:$4 sm:$0xff]  }
 0x39c   :  { %2961 = vmatpush1.bf16.msra.mxu0 %v9292_v27  ;;  %2937 = vmatprep.subr.bf16.mxu1 %v9297_v34  ;;  %11412 = vst [vmem:[#allocation49_spill] sm:$0xff] %v9324_v14  ;;  %v1773_v34 = vadd.f32 %v8640_v42, %v8812_v45  ;;  %v9340_v27 = vld [vmem:[%s11337_s27 + $0x80] ss:$8 sps:$4 sm:$0xff]   ;;  %v9352_v42 = vld [vmem:[%s11337_s27 + $0x3b4] ss:$8 sps:$4 sm:$0xff]   ;;  %v1262_v45 = vpack.c.bf16 %v1259_v2, %v1259_v2 }
 0x39d   :  { %2962 = vmatprep.subr.bf16.mxu0 %v9303_v40  ;;  %11415 = vst [vmem:[#allocation50_spill] sm:$0xff] %v9340_v27  ;;  %11417 = vst [vmem:[#allocation23_spill] sm:$0xff] %v9352_v42  ;;  %v9382_v2 = vld [vmem:[%s11337_s27 + $0x2e4] ss:$8 sps:$4 sm:$0xff]  }
 0x39e   :  { %11422 = vst [vmem:[#allocation83_spill] sm:$0xff] %v9382_v2 }
 0x39f   :  { %2938 = vmatpush2.bf16.msra.mxu1 %v9310_v16  ;;  %v1261_v16 = vmax.f32 %v1258_v30, 0.0  ;;  %v9371_v30 = vld [vmem:[%s11337_s27 + $0x2f0] ss:$8 sps:$4 sm:$0xff]  }
 0x3a0   :  { %2963 = vmatpush1.bf16.msra.mxu0 %v9319_v59  ;;  %2939 = vmatprep.subr.bf16.mxu1 %v9324_v14  ;;  %v1776_v59 = vmax.f32 %v1773_v34, 0.0  ;;  %v9364_v14 = vld [vmem:[%s11337_s27 + $0x3b0] ss:$8 sps:$4 sm:$0xff]   ;;  %11420 = vst [vmem:[#allocation81_spill] sm:$0xff] %v9371_v30  ;;  %v9377_v34 = vld [vmem:[%s11337_s27 + $0x3a4] ss:$8 sps:$4 sm:$0xff]  }
 0x3a1   :  { %2964 = vmatprep.subr.bf16.mxu0 %v9332_v35  ;;  %11419 = vst [vmem:[#allocation80_spill] sm:$0xff] %v9364_v14  ;;  %v1264_v35 = vpack.c.bf16 %v1261_v16, %v1261_v16  ;;  %11421 = vst [vmem:[#allocation82_spill] sm:$0xff] %v9377_v34  ;;  %v9395_v16 = vld [vmem:[%s11337_s27 + $0x3a0] ss:$8 sps:$4 sm:$0xff]  }
 0x3a2   :  { %11424 = vst [vmem:[#allocation85_spill] sm:$0xff] %v9395_v16 }
 0x3a3   :  { %2940 = vmatpush2.bf16.msra.mxu1 %v9340_v27  ;;  %v9384_v27 = vpack.c.bf16 %v1776_v59, %v1776_v59  ;;  %v9407_v59 = vld [vmem:[%s11337_s27 + $0x394] ss:$8 sps:$4 sm:$0xff]  }
 0x3a4   :  { %2965 = vmatpush1.bf16.msra.mxu0 %v9347_v38  ;;  %3243 = vmatprep.subr.bf16.mxu1 %v9352_v42  ;;  %11426 = vst [vmem:[#allocation87_spill] sm:$0xff] %v9407_v59 }
 0x3a5   :  { %3194 = vmatprep.subr.bf16.mxu0 %v9358_v6  ;;  %11423 = vst [vmem:[#allocation84_spill] sm:$0xff] %v9384_v27 }
 0x3a6   :  { %2942 = vmatmul.mubr.bf16.vlgmr.msra.gmra.mxu1 %v1262_v45  ;;  %v9386_v42 = vpop.f32.mrf.mxu1  ;;  %v9402_v45 = vld [vmem:[%s11337_s27 + $0x2e0] ss:$8 sps:$4 sm:$0xff]  }
 0x3a7   :  { %v9388_v38 = vpop.f32.mrf.mxu0  ;;  %5475 = vmatmul.mubr.msk.bf16.vlgmr.msra.gmra.mxu0 %vm2620_vm1, %v1264_v35  ;;  %3244 = vmatpush1.bf16.msra.mxu1 %v9364_v14  ;;  %11425 = vst [vmem:[#allocation86_spill] sm:$0xff] %v9402_v45 }
 0x3a8   :  { %3195 = vmatpush1.bf16.msra.mxu0 %v9371_v30  ;;  %3226 = vmatprep.mubr.bf16.mxu0 %v9384_v27  ;;  %v2116_v35 = vpop.f32.mrf.mxu1  ;;  %v9416_v30 = vld [vmem:[%s11337_s27 + $0x2d4] ss:$8 sps:$4 sm:$0xff]  }
 0x3a9   :  { %v9409_v14 = vpop.f32.mrf.mxu0  ;;  %3245 = vmatprep.subr.bf16.mxu1 %v9377_v34  ;;  %3196 = vmatprep.subr.bf16.mxu0 %v9382_v2  ;;  %11427 = vst [vmem:[#allocation88_spill] sm:$0xff] %v9416_v30  ;;  %v9423_v35 = vld [vmem:[%s11337_s27 + $0x390] ss:$8 sps:$4 sm:$0xff]   ;;  %v1774_v34 = vadd.f32 %v8630_v52, %v8889_v1  ;;  %v9443_v52 = vld [vmem:[%s11337_s27 + $0x2c4] ss:$8 sps:$4 sm:$0xff]  }
 0x3aa   :  { %3267 = vmatprep.mubr.bf16.mxu1 %v10955_v63  ;;  %v2117_v6 = vpop.f32.mrf.mxu1  ;;  %11428 = vst [vmem:[#allocation89_spill] sm:$0xff] %v9423_v35  ;;  %v9432_v2 = vld [vmem:[%s11337_s27 + $0x2d0] ss:$8 sps:$4 sm:$0xff]   ;;  %11431 = vst [vmem:[#allocation92_spill] sm:$0xff] %v9443_v52 }
 0x3ab   :  { %v2077_v40 = vpop.f32.mrf.mxu0  ;;  %3246 = vmatpush1.bf16.msra.mxu1 %v9395_v16  ;;  %11429 = vst [vmem:[#allocation90_spill] sm:$0xff] %v9432_v2  ;;  %v1777_v1 = vmax.f32 %v1774_v34, 0.0  ;;  %v9472_v34 = vld [vmem:[%s11337_s27 + $0x2b0] ss:$8 sps:$4 sm:$0xff]  }
 0x3ac   :  { %3197 = vmatpush1.bf16.msra.mxu0 %v9402_v45  ;;  %3247 = vmatprep.subr.bf16.mxu1 %v9407_v59  ;;  %v9437_v40 = vld [vmem:[%s11337_s27 + $0x384] ss:$8 sps:$4 sm:$0xff]   ;;  %v2118_v6 = vpop.f32.mrf.mxu1  ;;  %v9449_v59 = vld [vmem:[%s11337_s27 + $0x380] ss:$8 sps:$4 sm:$0xff]   ;;  %11436 = vst [vmem:[#allocation97_spill] sm:$0xff] %v9472_v34 }
 0x3ad   :  { %11430 = vst [vmem:[#allocation91_spill] sm:$0xff] %v9437_v40  ;;  %v2078_v16 = vpop.f32.mrf.mxu0  ;;  %3198 = vmatprep.subr.bf16.mxu0 %v9416_v30  ;;  %11432 = vst [vmem:[#allocation93_spill] sm:$0xff] %v9449_v59  ;;  %v9462_v6 = vld [vmem:[%s11337_s27 + $0x2b4] ss:$8 sps:$4 sm:$0xff]  }
 0x3ae   :  { %v9456_v16 = vld [vmem:[%s11337_s27 + $0x2c0] ss:$8 sps:$4 sm:$0xff]   ;;  %11434 = vst [vmem:[#allocation95_spill] sm:$0xff] %v9462_v6 }
 0x3af   :  { %3248 = vmatpush1.bf16.msra.mxu1 %v9423_v35  ;;  %11433 = vst [vmem:[#allocation94_spill] sm:$0xff] %v9456_v16  ;;  %v9465_v35 = vpack.c.bf16 %v1777_v1, %v1777_v1  ;;  %v9489_v1 = vld [vmem:[%s11337_s27 + $0x2a0] ss:$8 sps:$4 sm:$0xff]  }
 0x3b0   :  { %3199 = vmatpush1.bf16.msra.mxu0 %v9432_v2  ;;  %3249 = vmatprep.subr.bf16.mxu1 %v9437_v40  ;;  %v9478_v40 = vld [vmem:[%s11337_s27 + $0x2a4] ss:$8 sps:$4 sm:$0xff]   ;;  %11438 = vst [vmem:[#allocation99_spill] sm:$0xff] %v9489_v1 }
 0x3b1   :  { %3200 = vmatprep.subr.bf16.mxu0 %v9443_v52  ;;  %11435 = vst [vmem:[#allocation96_spill] sm:$0xff] %v9465_v35  ;;  %11437 = vst [vmem:[#allocation98_spill] sm:$0xff] %v9478_v40 }
 0x3b3   :  { %3250 = vmatpush1.bf16.msra.mxu1 %v9449_v59 }
 0x3b4   :  { %3201 = vmatpush1.bf16.msra.mxu0 %v9456_v16  ;;  %3295 = vmatprep.subr.bf16.mxu1 %v8834_v46  ;;  %v9495_v46 = vld [vmem:[%s11337_s27 + $0x294] ss:$8 sps:$4 sm:$0xff]  }
 0x3b5   :  { %3202 = vmatprep.subr.bf16.mxu0 %v9462_v6  ;;  %11439 = vst [vmem:[#allocation100_spill] sm:$0xff] %v9495_v46 }
 0x3b6   :  { %5516 = vmatmul.mubr.msk.bf16.vlgmr.msra.gmra.mxu1 %vm2620_vm1, %v9465_v35 }
 0x3b7   :  { %3296 = vmatpush1.bf16.msra.mxu1 %v8847_v17  ;;  %3327 = vmatprep.mubr.bf16.mxu1 %v9384_v27  ;;  %v9503_v27 = vld [vmem:[%s11337_s27 + $0x290] ss:$8 sps:$4 sm:$0xff]   ;;  %v9623_v17 = vld [vmem:[%s11337_s27 + $0x304] ss:$8 sps:$4 sm:$0xff]  }
 0x3b8   :  { %3203 = vmatpush1.bf16.msra.mxu0 %v9472_v34  ;;  %3297 = vmatprep.subr.bf16.mxu1 %v8858_v53  ;;  %11440 = vst [vmem:[#allocation101_spill] sm:$0xff] %v9503_v27  ;;  %v9509_v53 = vld [vmem:[%s11337_s27 + $0x284] ss:$8 sps:$4 sm:$0xff]  }
 0x3b9   :  { %3204 = vmatprep.subr.bf16.mxu0 %v9478_v40  ;;  %11441 = vst [vmem:[#allocation102_spill] sm:$0xff] %v9509_v53 }
 0x3bb   :  { %3298 = vmatpush1.bf16.msra.mxu1 %v8874_v58  ;;  %v9523_v58 = vld [vmem:[%s11337_s27 + $0x374] ss:$8 sps:$4 sm:$0xff]  }
 0x3bc   :  { %3205 = vmatpush1.bf16.msra.mxu0 %v9489_v1  ;;  %3299 = vmatprep.subr.bf16.mxu1 %v8886_v44  ;;  %v9517_v44 = vld [vmem:[%s11337_s27 + $0x280] ss:$8 sps:$4 sm:$0xff]   ;;  %11443 = vst [vmem:[#allocation104_spill] sm:$0xff] %v9523_v58 }
 0x3bd   :  { %3206 = vmatprep.subr.bf16.mxu0 %v9495_v46  ;;  %11442 = vst [vmem:[#allocation103_spill] sm:$0xff] %v9517_v44 }
 0x3bf   :  { %3300 = vmatpush1.bf16.msra.mxu1 %v8905_v61  ;;  %v9537_v61 = vld [vmem:[%s11337_s27 + $0x364] ss:$8 sps:$4 sm:$0xff]  }
 0x3c0   :  { %3207 = vmatpush1.bf16.msra.mxu0 %v9503_v27  ;;  %3301 = vmatprep.subr.bf16.mxu1 %v8918_v43  ;;  %v9531_v43 = vld [vmem:[%s11337_s27 + $0x370] ss:$8 sps:$4 sm:$0xff]   ;;  %11445 = vst [vmem:[#allocation106_spill] sm:$0xff] %v9537_v61 }
 0x3c1   :  { %3208 = vmatprep.subr.bf16.mxu0 %v9509_v53  ;;  %11444 = vst [vmem:[#allocation105_spill] sm:$0xff] %v9531_v43 }
 0x3c3   :  { %3302 = vmatpush1.bf16.msra.mxu1 %v8931_v12  ;;  %v9551_v12 = vld [vmem:[%s11337_s27 + $0x354] ss:$8 sps:$4 sm:$0xff]  }
 0x3c4   :  { %3209 = vmatpush1.bf16.msra.mxu0 %v9517_v44  ;;  %3303 = vmatprep.subr.bf16.mxu1 %v8942_v23  ;;  %v9545_v23 = vld [vmem:[%s11337_s27 + $0x360] ss:$8 sps:$4 sm:$0xff]   ;;  %11447 = vst [vmem:[#allocation108_spill] sm:$0xff] %v9551_v12 }
 0x3c5   :  { %3210 = vmatprep.subr.bf16.mxu0 %v9523_v58  ;;  %11446 = vst [vmem:[#allocation107_spill] sm:$0xff] %v9545_v23 }
 0x3c7   :  { %3304 = vmatpush1.bf16.msra.mxu1 %v8957_v26  ;;  %v9565_v26 = vld [vmem:[%s11337_s27 + $0x344] ss:$8 sps:$4 sm:$0xff]  }
 0x3c8   :  { %3211 = vmatpush2.bf16.msra.mxu0 %v9531_v43  ;;  %3305 = vmatprep.subr.bf16.mxu1 %v8968_v29  ;;  %v9559_v29 = vld [vmem:[%s11337_s27 + $0x350] ss:$8 sps:$4 sm:$0xff]   ;;  %11449 = vst [vmem:[#allocation110_spill] sm:$0xff] %v9565_v26 }
 0x3c9   :  { %3212 = vmatprep.subr.bf16.mxu0 %v9537_v61  ;;  %11448 = vst [vmem:[#allocation109_spill] sm:$0xff] %v9559_v29 }
 0x3cb   :  { %3306 = vmatpush1.bf16.msra.mxu1 %v8983_v31  ;;  %v9579_v31 = vld [vmem:[%s11337_s27 + $0x334] ss:$8 sps:$4 sm:$0xff]  }
 0x3cc   :  { %3213 = vmatpush2.bf16.msra.mxu0 %v9545_v23  ;;  %3307 = vmatprep.subr.bf16.mxu1 %v8994_v32  ;;  %v9573_v32 = vld [vmem:[%s11337_s27 + $0x340] ss:$8 sps:$4 sm:$0xff]   ;;  %11451 = vst [vmem:[#allocation112_spill] sm:$0xff] %v9579_v31 }
 0x3cd   :  { %3214 = vmatprep.subr.bf16.mxu0 %v9551_v12  ;;  %11450 = vst [vmem:[#allocation111_spill] sm:$0xff] %v9573_v32 }
 0x3cf   :  { %3308 = vmatpush1.bf16.msra.mxu1 %v9007_v33  ;;  %v9593_v33 = vld [vmem:[%s11337_s27 + $0x324] ss:$8 sps:$4 sm:$0xff]  }
 0x3d0   :  { %3215 = vmatpush2.bf16.msra.mxu0 %v9559_v29  ;;  %3309 = vmatprep.subr.bf16.mxu1 %v9018_v37  ;;  %v9587_v37 = vld [vmem:[%s11337_s27 + $0x330] ss:$8 sps:$4 sm:$0xff]   ;;  %11453 = vst [vmem:[#allocation114_spill] sm:$0xff] %v9593_v33 }
 0x3d1   :  { %3216 = vmatprep.subr.bf16.mxu0 %v9565_v26  ;;  %11452 = vst [vmem:[#allocation113_spill] sm:$0xff] %v9587_v37 }
 0x3d3   :  { %3310 = vmatpush1.bf16.msra.mxu1 %v9037_v20  ;;  %v9607_v20 = vld [vmem:[%s11337_s27 + $0x314] ss:$8 sps:$4 sm:$0xff]  }
 0x3d4   :  { %3217 = vmatpush2.bf16.msra.mxu0 %v9573_v32  ;;  %3311 = vmatprep.subr.bf16.mxu1 %v9048_v28  ;;  %v9601_v28 = vld [vmem:[%s11337_s27 + $0x320] ss:$8 sps:$4 sm:$0xff]   ;;  %11455 = vst [vmem:[#allocation116_spill] sm:$0xff] %v9607_v20 }
 0x3d5   :  { %3218 = vmatprep.subr.bf16.mxu0 %v9579_v31  ;;  %11454 = vst [vmem:[#allocation115_spill] sm:$0xff] %v9601_v28 }
 0x3d7   :  { %3312 = vmatpush2.bf16.msra.mxu1 %v9064_v0  ;;  %v1772_v0 = vadd.f32 %v8634_v54, %v9202_v50  ;;  %v9637_v54 = vld [vmem:[%s11337_s27 + $0x300] ss:$8 sps:$4 sm:$0xff]  }
 0x3d8   :  { %3219 = vmatpush2.bf16.msra.mxu0 %v9587_v37  ;;  %3313 = vmatprep.subr.bf16.mxu1 %v9075_v19  ;;  %v9615_v19 = vld [vmem:[%s11337_s27 + $0x310] ss:$8 sps:$4 sm:$0xff]  }
 0x3d9   :  { %3220 = vmatprep.subr.bf16.mxu0 %v9593_v33  ;;  %v1775_v50 = vmax.f32 %v1772_v0, 0.0  ;;  %v11461_v0 = vld [vmem:[#allocation64_spill] sm:$0xff] }
 0x3db   :  { %3314 = vmatpush2.bf16.msra.mxu1 %v9088_v22 }
 0x3dc   :  { %3221 = vmatpush2.bf16.msra.mxu0 %v9601_v28  ;;  %3315 = vmatprep.subr.bf16.mxu1 %v9099_v39 }
 0x3dd   :  { %3222 = vmatprep.subr.bf16.mxu0 %v9607_v20 }
 0x3de   :  { %v2195_v22 = vpop.f32.mrf.mxu1 }
 0x3df   :  { %v9626_v59 = vadd.f32 %v2195_v22, %v9386_v42  ;;  %v2154_v39 = vpop.f32.mrf.mxu0  ;;  %3316 = vmatpush2.bf16.msra.mxu1 %v9112_v3 }
 0x3e0   :  { %v9630_v28 = vadd.f32 %v2154_v39, %v9388_v38  ;;  %3223 = vmatpush2.bf16.msra.mxu0 %v9615_v19  ;;  %3317 = vmatprep.subr.bf16.mxu1 %v9123_v48  ;;  %v2197_v20 = vpop.f32.mrf.mxu1  ;;  %v9646_v48 = vpack.c.bf16 %v1775_v50, %v1775_v50  ;;  %v11458_v50 = vld [vmem:[#allocation59_spill] sm:$0xff] }
 0x3e1   :  { %v2156_v33 = vpop.f32.mrf.mxu0  ;;  %3224 = vmatprep.subr.bf16.mxu0 %v9623_v17  ;;  %v11459_v20 = vld [vmem:[#allocation69_spill] sm:$0xff] }
 0x3e2   :  { %v9641_v22 = vadd.f32 %v2156_v33, %v9409_v14  ;;  %v2198_v42 = vpop.f32.mrf.mxu1  ;;  %11456 = vst [vmem:[#allocation117_spill] sm:$0xff] %v9646_v48  ;;  %v11457_v33 = vld [vmem:[#allocation63_spill] sm:$0xff] }
 0x3e3   :  { %v2158_v39 = vpop.f32.mrf.mxu0  ;;  %3318 = vmatpush2.bf16.msra.mxu1 %v9136_v5  ;;  %v11460_v14 = vld [vmem:[#allocation51_spill] sm:$0xff] }
 0x3e4   :  { %3225 = vmatpush2.bf16.msra.mxu0 %v9637_v54  ;;  %3319 = vmatprep.subr.bf16.mxu1 %v9147_v18  ;;  %v2199_v38 = vpop.f32.mrf.mxu1  ;;  %v11463_v39 = vld [vmem:[#allocation71_spill] sm:$0xff] }
 0x3e5   :  { %v2159_v3 = vpop.f32.mrf.mxu0  ;;  %3344 = vmatprep.subr.bf16.mxu0 %v8828_v9  ;;  %v11464_v38 = vld [vmem:[#allocation78_spill] sm:$0xff] }
 0x3e6   :  { %v11462_v3 = vld [vmem:[#allocation14_spill] sm:$0xff] }
 0x3e7   :  { %3227 = vmatmul.mubr.bf16.vlgmr.msra.gmra.mxu0 %v9646_v48  ;;  %3320 = vmatpush2.bf16.msra.mxu1 %v9160_v41  ;;  %v2031_v42 = vadd.f32 %v11462_v3, %v11461_v0  ;;  %v11471_v3 = vld [vmem:[#allocation12_spill] sm:$0xff] }
 0x3e8   :  { %3345 = vmatpush1.bf16.msra.mxu0 %v8840_v51  ;;  %3321 = vmatprep.subr.bf16.mxu1 %v9171_v62  ;;  %v11472_v0 = vld [vmem:[#allocation60_spill] sm:$0xff] }
 0x3e9   :  { %3346 = vmatprep.subr.bf16.mxu0 %v8853_v7  ;;  %3368 = vmatprep.mubr.bf16.mxu0 %v10955_v63 }
 0x3eb   :  { %3322 = vmatpush2.bf16.msra.mxu1 %v9187_v47 }
 0x3ec   :  { %3347 = vmatpush1.bf16.msra.mxu0 %v8867_v56  ;;  %3323 = vmatprep.subr.bf16.mxu1 %v9198_v36  ;;  %v11486_v36 = vld [vmem:[#allocation32_spill] sm:$0xff] }
 0x3ed   :  { %3348 = vmatprep.subr.bf16.mxu0 %v8879_v60 }
 0x3ef   :  { %3324 = vmatpush2.bf16.msra.mxu1 %v9215_v8 }
 0x3f0   :  { %3349 = vmatpush1.bf16.msra.mxu0 %v8896_v57  ;;  %3325 = vmatprep.subr.bf16.mxu1 %v9228_v24 }
 0x3f1   :  { %3350 = vmatprep.subr.bf16.mxu0 %v8910_v11 }
 0x3f3   :  { %3326 = vmatpush2.bf16.msra.mxu1 %v9241_v10 }
 0x3f4   :  { %3351 = vmatpush1.bf16.msra.mxu0 %v8924_v4  ;;  %3426 = vmatprep.subr.bf16.mxu1 %v9252_v13  ;;  %v11470_v13 = vld [vmem:[#allocation79_spill] sm:$0xff] }
 0x3f5   :  { %3377 = vmatprep.subr.bf16.mxu0 %v8936_v21 }
 0x3f6   :  { %3328 = vmatmul.mubr.bf16.vlgmr.msra.gmra.mxu1 %v9646_v48  ;;  %v2034_v48 = vmax.f32 %v2031_v42, 0.0  ;;  %v11474_v42 = vld [vmem:[#allocation15_spill] sm:$0xff] }
 0x3f7   :  { %5517 = vmatmul.mubr.msk.bf16.vlgmr.msra.gmra.mxu0 %vm2620_vm1, %v9465_v35  ;;  %3427 = vmatpush1.bf16.msra.mxu1 %v9265_v15  ;;  %v11466_v35 = vld [vmem:[#allocation26_spill] sm:$0xff]  ;;  %v11468_v15 = vld [vmem:[#allocation24_spill] sm:$0xff] }
 0x3f8   :  { %3378 = vmatpush1.bf16.msra.mxu0 %v8948_v25  ;;  %3409 = vmatprep.mubr.bf16.mxu0 %v8861_v55  ;;  %v11465_v55 = vld [vmem:[#allocation73_spill] sm:$0xff] }
 0x3f9   :  { %3428 = vmatprep.subr.bf16.mxu1 %v9278_v49  ;;  %3379 = vmatprep.subr.bf16.mxu0 %v11457_v33  ;;  %v11467_v49 = vld [vmem:[#allocation6_spill] sm:$0xff] }
 0x3fa   :  { %3450 = vmatprep.mubr.bf16.mxu1 %v10955_v63 }
 0x3fb   :  { %3429 = vmatpush1.bf16.msra.mxu1 %v11458_v50  ;;  %v11469_v50 = vld [vmem:[#allocation9_spill] sm:$0xff] }
 0x3fc   :  { %3380 = vmatpush1.bf16.msra.mxu0 %v11459_v20  ;;  %3430 = vmatprep.subr.bf16.mxu1 %v11460_v14  ;;  %v9689_v14 = vpack.c.bf16 %v2034_v48, %v2034_v48  ;;  %v11478_v48 = vld [vmem:[#allocation20_spill] sm:$0xff] }
 0x3fd   :  { %3381 = vmatprep.subr.bf16.mxu0 %v11463_v39 }
 0x3ff   :  { %3431 = vmatpush1.bf16.msra.mxu1 %v11464_v38  ;;  %v11473_v38 = vld [vmem:[#allocation81_spill] sm:$0xff] }
 0x400   :  { %3382 = vmatpush1.bf16.msra.mxu0 %v11465_v55  ;;  %3432 = vmatprep.subr.bf16.mxu1 %v11466_v35  ;;  %v11475_v35 = vld [vmem:[#allocation83_spill] sm:$0xff] }
 0x401   :  { %3383 = vmatprep.subr.bf16.mxu0 %v11467_v49 }
 0x403   :  { %3433 = vmatpush1.bf16.msra.mxu1 %v11468_v15  ;;  %v11476_v15 = vld [vmem:[#allocation17_spill] sm:$0xff] }
 0x404   :  { %3384 = vmatpush1.bf16.msra.mxu0 %v11469_v50  ;;  %3462 = vmatprep.subr.bf16.mxu1 %v11470_v13  ;;  %v11477_v13 = vld [vmem:[#allocation18_spill] sm:$0xff] }
 0x405   :  { %3385 = vmatprep.subr.bf16.mxu0 %v11471_v3 }
 0x406   :  { %5518 = vmatmul.mubr.msk.bf16.vlgmr.msra.gmra.mxu1 %vm2620_vm1, %v11472_v0  ;;  %v11479_v0 = vld [vmem:[#allocation22_spill] sm:$0xff] }
 0x407   :  { %3463 = vmatpush1.bf16.msra.mxu1 %v11473_v38  ;;  %3494 = vmatprep.mubr.bf16.mxu1 %v9689_v14  ;;  %v11480_v38 = vld [vmem:[#allocation27_spill] sm:$0xff] }
 0x408   :  { %3386 = vmatpush1.bf16.msra.mxu0 %v11474_v42  ;;  %3464 = vmatprep.subr.bf16.mxu1 %v11475_v35  ;;  %v11481_v35 = vld [vmem:[#allocation29_spill] sm:$0xff] }
 0x409   :  { %3387 = vmatprep.subr.bf16.mxu0 %v11476_v15 }
 0x40b   :  { %3465 = vmatpush1.bf16.msra.mxu1 %v9402_v45  ;;  %v11482_v45 = vld [vmem:[#allocation30_spill] sm:$0xff] }
 0x40c   :  { %3388 = vmatpush1.bf16.msra.mxu0 %v11477_v13  ;;  %3466 = vmatprep.subr.bf16.mxu1 %v9416_v30 }
 0x40d   :  { %3389 = vmatprep.subr.bf16.mxu0 %v11478_v48 }
 0x40f   :  { %3467 = vmatpush1.bf16.msra.mxu1 %v9432_v2 }
 0x410   :  { %3390 = vmatpush1.bf16.msra.mxu0 %v11479_v0  ;;  %3468 = vmatprep.subr.bf16.mxu1 %v9443_v52  ;;  %v11485_v52 = vld [vmem:[#allocation31_spill] sm:$0xff] }
 0x411   :  { %3391 = vmatprep.subr.bf16.mxu0 %v11480_v38 }
 0x413   :  { %3469 = vmatpush1.bf16.msra.mxu1 %v9456_v16 }
 0x414   :  { %3392 = vmatpush1.bf16.msra.mxu0 %v11481_v35  ;;  %3470 = vmatprep.subr.bf16.mxu1 %v9462_v6 }
 0x415   :  { %3393 = vmatprep.subr.bf16.mxu0 %v11482_v45 }
 0x416   :  { %v2279_v10 = vpop.f32.mrf.mxu1 }
 0x417   :  { %v9712_v30 = vadd.f32 %v2279_v10, %v9626_v59  ;;  %v2238_v24 = vpop.f32.mrf.mxu0  ;;  %3471 = vmatpush1.bf16.msra.mxu1 %v9472_v34  ;;  %v11487_v59 = vld [vmem:[#allocation2_spill] sm:$0xff] }
 0x418   :  { %v9716_v2 = vadd.f32 %v2238_v24, %v9630_v28  ;;  %3394 = vmatpush2.bf16.msra.mxu0 %v11485_v52  ;;  %3472 = vmatprep.subr.bf16.mxu1 %v9478_v40  ;;  %v2281_v16 = vpop.f32.mrf.mxu1  ;;  %v11507_v40 = vld [vmem:[#allocation10_spill] sm:$0xff] }
 0x419   :  { %11483 = vst [vmem:[#allocation63_spill] sm:$0xff] %v9712_v30  ;;  %v2240_v8 = vpop.f32.mrf.mxu0  ;;  %3395 = vmatprep.subr.bf16.mxu0 %v11486_v36  ;;  %v11489_v16 = vld [vmem:[#allocation38_spill] sm:$0xff]  ;;  %v11509_v30 = vld [vmem:[#allocation116_spill] sm:$0xff] }
 0x41a   :  { %11484 = vst [vmem:[#allocation69_spill] sm:$0xff] %v9716_v2  ;;  %v9722_v6 = vadd.f32 %v2240_v8, %v9641_v22  ;;  %v2282_v47 = vpop.f32.mrf.mxu1  ;;  %v11488_v2 = vld [vmem:[#allocation35_spill] sm:$0xff]  ;;  %v11490_v8 = vld [vmem:[#allocation40_spill] sm:$0xff] }
 0x41b   :  { %v2242_v10 = vpop.f32.mrf.mxu0  ;;  %3473 = vmatpush1.bf16.msra.mxu1 %v9489_v1  ;;  %v11491_v47 = vld [vmem:[#allocation42_spill] sm:$0xff]  ;;  %v11492_v22 = vld [vmem:[#allocation44_spill] sm:$0xff]  ;;  %v11498_v1 = vld [vmem:[#allocation49_spill] sm:$0xff] }
 0x41c   :  { %3396 = vmatpush2.bf16.msra.mxu0 %v11487_v59  ;;  %3474 = vmatprep.subr.bf16.mxu1 %v9495_v46  ;;  %v2283_v28 = vpop.f32.mrf.mxu1  ;;  %v11495_v46 = vld [vmem:[#allocation55_spill] sm:$0xff] }
 0x41d   :  { %v2243_v24 = vpop.f32.mrf.mxu0  ;;  %3397 = vmatprep.subr.bf16.mxu0 %v11488_v2 }
 0x41e   :  { %v11493_v24 = vld [vmem:[#allocation46_spill] sm:$0xff] }
 0x41f   :  { %3475 = vmatpush1.bf16.msra.mxu1 %v9503_v27 }
 0x420   :  { %3398 = vmatpush2.bf16.msra.mxu0 %v11489_v16  ;;  %3476 = vmatprep.subr.bf16.mxu1 %v9509_v53  ;;  %v11494_v53 = vld [vmem:[#allocation47_spill] sm:$0xff] }
 0x421   :  { %3399 = vmatprep.subr.bf16.mxu0 %v11490_v8 }
 0x423   :  { %3477 = vmatpush1.bf16.msra.mxu1 %v9517_v44 }
 0x424   :  { %3400 = vmatpush2.bf16.msra.mxu0 %v11491_v47  ;;  %3478 = vmatprep.subr.bf16.mxu1 %v9523_v58  ;;  %v11496_v58 = vld [vmem:[#allocation4_spill] sm:$0xff] }
 0x425   :  { %3401 = vmatprep.subr.bf16.mxu0 %v11492_v22 }
 0x426   :  { %v9736_v10 = vpop.f32.mrf.mxu1 }
 0x427   :  { %3479 = vmatpush2.bf16.msra.mxu1 %v9531_v43  ;;  %v11497_v43 = vld [vmem:[#allocation77_spill] sm:$0xff] }
 0x428   :  { %v9739_v28 = vpop.f32.mrf.mxu1  ;;  %3402 = vmatpush2.bf16.msra.mxu0 %v11493_v24  ;;  %3480 = vmatprep.subr.bf16.mxu1 %v9537_v61  ;;  %v11504_v61 = vld [vmem:[#allocation82_spill] sm:$0xff] }
 0x429   :  { %3403 = vmatprep.subr.bf16.mxu0 %v11494_v53 }
 0x42a   :  { %v2703_v27 = vpop.f32.mrf.mxu1 }
 0x42b   :  { %3481 = vmatpush2.bf16.msra.mxu1 %v9545_v23  ;;  %v11499_v27 = vld [vmem:[#allocation50_spill] sm:$0xff]  ;;  %v11501_v23 = vld [vmem:[#allocation53_spill] sm:$0xff] }
 0x42c   :  { %v2704_v44 = vpop.f32.mrf.mxu1  ;;  %3404 = vmatpush2.bf16.msra.mxu0 %v11495_v46  ;;  %3482 = vmatprep.subr.bf16.mxu1 %v9551_v12  ;;  %v11502_v12 = vld [vmem:[#allocation80_spill] sm:$0xff] }
 0x42d   :  { %3405 = vmatprep.subr.bf16.mxu0 %v11496_v58  ;;  %v11500_v44 = vld [vmem:[#allocation23_spill] sm:$0xff] }
 0x42f   :  { %3483 = vmatpush2.bf16.msra.mxu1 %v9559_v29  ;;  %v11503_v29 = vld [vmem:[#allocation114_spill] sm:$0xff] }
 0x430   :  { %3406 = vmatpush2.bf16.msra.mxu0 %v11497_v43  ;;  %3484 = vmatprep.subr.bf16.mxu1 %v9565_v26  ;;  %v11505_v26 = vld [vmem:[#allocation115_spill] sm:$0xff] }
 0x431   :  { %3407 = vmatprep.subr.bf16.mxu0 %v11498_v1 }
 0x433   :  { %3485 = vmatpush2.bf16.msra.mxu1 %v9573_v32  ;;  %v11506_v32 = vld [vmem:[#allocation37_spill] sm:$0xff] }
 0x434   :  { %3408 = vmatpush2.bf16.msra.mxu0 %v11499_v27  ;;  %3486 = vmatprep.subr.bf16.mxu1 %v9579_v31  ;;  %v2030_v34 = vadd.f32 %v11507_v40, %v11506_v32  ;;  %v11508_v31 = vld [vmem:[#allocation85_spill] sm:$0xff]  ;;  %v11512_v27 = vld [vmem:[#allocation87_spill] sm:$0xff]  ;;  %v11516_v32 = vld [vmem:[#allocation66_spill] sm:$0xff] }
 0x435   :  { %3511 = vmatprep.subr.bf16.mxu0 %v11500_v44  ;;  %v11511_v44 = vld [vmem:[#allocation8_spill] sm:$0xff] }
 0x437   :  { %3410 = vmatmul.mubr.bf16.vlgmr.msra.gmra.mxu0 %v11501_v23  ;;  %3487 = vmatpush2.bf16.msra.mxu1 %v9587_v37  ;;  %v11510_v23 = vld [vmem:[#allocation76_spill] sm:$0xff] }
 0x438   :  { %3512 = vmatpush1.bf16.msra.mxu0 %v11502_v12  ;;  %3488 = vmatprep.subr.bf16.mxu1 %v11503_v29  ;;  %v2032_v37 = vadd.f32 %v11511_v44, %v11510_v23  ;;  %v2033_v29 = vmax.f32 %v2030_v34, 0.0  ;;  %v11514_v12 = vld [vmem:[#allocation91_spill] sm:$0xff] }
 0x439   :  { %3513 = vmatprep.subr.bf16.mxu0 %v11504_v61  ;;  %3535 = vmatprep.mubr.bf16.mxu0 %v10955_v63  ;;  %v11513_v61 = vld [vmem:[#allocation89_spill] sm:$0xff] }
 0x43a   :  { %v9775_v40 = vpack.c.bf16 %v2033_v29, %v2033_v29  ;;  %v11518_v29 = vld [vmem:[#allocation68_spill] sm:$0xff] }
 0x43b   :  { %3489 = vmatpush2.bf16.msra.mxu1 %v11505_v26  ;;  %v2035_v26 = vmax.f32 %v2032_v37, 0.0  ;;  %v11517_v37 = vld [vmem:[#allocation67_spill] sm:$0xff] }
 0x43c   :  { %3514 = vmatpush1.bf16.msra.mxu0 %v11508_v31  ;;  %3490 = vmatprep.subr.bf16.mxu1 %v11509_v30  ;;  %v11515_v30 = vld [vmem:[#allocation93_spill] sm:$0xff] }
 0x43d   :  { %3515 = vmatprep.subr.bf16.mxu0 %v11512_v27  ;;  %v2038_v44 = vpack.c.bf16 %v2035_v26, %v2035_v26  ;;  %v11520_v26 = vld [vmem:[#allocation75_spill] sm:$0xff] }
 0x43f   :  { %3491 = vmatpush2.bf16.msra.mxu1 %v9615_v19 }
 0x440   :  { %3516 = vmatpush1.bf16.msra.mxu0 %v11513_v61  ;;  %3492 = vmatprep.subr.bf16.mxu1 %v9623_v17 }
 0x441   :  { %3517 = vmatprep.subr.bf16.mxu0 %v11514_v12 }
 0x443   :  { %3493 = vmatpush2.bf16.msra.mxu1 %v9637_v54 }
 0x444   :  { %3518 = vmatpush1.bf16.msra.mxu0 %v11515_v30  ;;  %3601 = vmatprep.subr.bf16.mxu1 %v8828_v9  ;;  %v11519_v9 = vld [vmem:[#allocation74_spill] sm:$0xff] }
 0x445   :  { %3552 = vmatprep.subr.bf16.mxu0 %v11516_v32  ;;  %v11522_v32 = vld [vmem:[#allocation56_spill] sm:$0xff] }
 0x446   :  { %3495 = vmatmul.mubr.bf16.vlgmr.msra.gmra.mxu1 %v9775_v40 }
 0x447   :  { %5519 = vmatmul.mubr.msk.bf16.vlgmr.msra.gmra.mxu0 %vm2620_vm1, %v2038_v44  ;;  %3602 = vmatpush1.bf16.msra.mxu1 %v8840_v51  ;;  %v11521_v51 = vld [vmem:[#allocation52_spill] sm:$0xff] }
 0x448   :  { %3553 = vmatpush1.bf16.msra.mxu0 %v11517_v37  ;;  %3584 = vmatprep.mubr.bf16.mxu0 %v9689_v14  ;;  %v11527_v14 = vld [vmem:[#allocation65_spill] sm:$0xff] }
 0x449   :  { %3603 = vmatprep.subr.bf16.mxu1 %v8853_v7  ;;  %3554 = vmatprep.subr.bf16.mxu0 %v11518_v29  ;;  %v11523_v7 = vld [vmem:[#allocation57_spill] sm:$0xff]  ;;  %v11529_v29 = vld [vmem:[#allocation72_spill] sm:$0xff] }
 0x44a   :  { %3625 = vmatprep.mubr.bf16.mxu1 %v10955_v63 }
 0x44b   :  { %3604 = vmatpush1.bf16.msra.mxu1 %v8867_v56  ;;  %v11524_v56 = vld [vmem:[#allocation58_spill] sm:$0xff] }
 0x44c   :  { %3555 = vmatpush1.bf16.msra.mxu0 %v11519_v9  ;;  %3605 = vmatprep.subr.bf16.mxu1 %v8879_v60 }
 0x44d   :  { %3556 = vmatprep.subr.bf16.mxu0 %v11520_v26 }
 0x44f   :  { %3606 = vmatpush1.bf16.msra.mxu1 %v8896_v57  ;;  %v11525_v57 = vld [vmem:[#allocation84_spill] sm:$0xff] }
 0x450   :  { %3557 = vmatpush1.bf16.msra.mxu0 %v11521_v51  ;;  %3607 = vmatprep.subr.bf16.mxu1 %v8910_v11  ;;  %v11526_v11 = vld [vmem:[#allocation61_spill] sm:$0xff]  ;;  %v11534_v51 = vld [vmem:[#allocation16_spill] sm:$0xff] }
 0x451   :  { %3558 = vmatprep.subr.bf16.mxu0 %v11522_v32 }
 0x453   :  { %3608 = vmatpush1.bf16.msra.mxu1 %v8924_v4 }
 0x454   :  { %3559 = vmatpush1.bf16.msra.mxu0 %v11523_v7  ;;  %3634 = vmatprep.subr.bf16.mxu1 %v8936_v21  ;;  %v11535_v7 = vld [vmem:[#allocation48_spill] sm:$0xff] }
 0x455   :  { %3560 = vmatprep.subr.bf16.mxu0 %v11524_v56 }
 0x456   :  { %5520 = vmatmul.mubr.msk.bf16.vlgmr.msra.gmra.mxu1 %vm2620_vm1, %v2038_v44  ;;  %v11528_v44 = vld [vmem:[#allocation70_spill] sm:$0xff] }
 0x457   :  { %v2658_v60 = vpop.f32.mrf.mxu0  ;;  %3635 = vmatpush1.bf16.msra.mxu1 %v8948_v25  ;;  %3666 = vmatprep.mubr.bf16.mxu1 %v11525_v57 }
 0x458   :  { %v2700_v34 = vadd.f32 %v9736_v10, %v2658_v60  ;;  %3561 = vmatpush1.bf16.msra.mxu0 %v11526_v11  ;;  %3636 = vmatprep.subr.bf16.mxu1 %v11457_v33  ;;  %v11530_v10 = vld [vmem:[#allocation5_spill] sm:$0xff]  ;;  %v11531_v33 = vld [vmem:[#allocation7_spill] sm:$0xff] }
 0x459   :  { %v2660_v4 = vpop.f32.mrf.mxu0  ;;  %3562 = vmatprep.subr.bf16.mxu0 %v11527_v14  ;;  %v11537_v11 = vld [vmem:[#allocation21_spill] sm:$0xff] }
 0x45a   :  { %v2702_v21 = vadd.f32 %v9739_v28, %v2660_v4  ;;  %v11532_v28 = vld [vmem:[#allocation11_spill] sm:$0xff]  ;;  %v11539_v4 = vld [vmem:[#allocation28_spill] sm:$0xff] }
 0x45b   :  { %v2662_v37 = vpop.f32.mrf.mxu0  ;;  %3637 = vmatpush1.bf16.msra.mxu1 %v11459_v20  ;;  %v11533_v20 = vld [vmem:[#allocation13_spill] sm:$0xff] }
 0x45c   :  { %3563 = vmatpush1.bf16.msra.mxu0 %v11528_v44  ;;  %3638 = vmatprep.subr.bf16.mxu1 %v11463_v39  ;;  %v11561_v37 = vld [vmem:[#allocation82_spill] sm:$0xff]  ;;  %v11562_v44 = vld [vmem:[#allocation83_spill] sm:$0xff] }
 0x45d   :  { %v2663_v25 = vpop.f32.mrf.mxu0  ;;  %3564 = vmatprep.subr.bf16.mxu0 %v11529_v29 }
 0x45e   :  { %v11563_v25 = vld [vmem:[#allocation63_spill] sm:$0xff] }
 0x45f   :  { %3639 = vmatpush1.bf16.msra.mxu1 %v11465_v55  ;;  %v2290_v29 = vadd.f32 %v11563_v25, %v11510_v23  ;;  %v11590_v25 = vld [vmem:[#allocation114_spill] sm:$0xff] }
 0x460   :  { %3565 = vmatpush1.bf16.msra.mxu0 %v11530_v10  ;;  %3640 = vmatprep.subr.bf16.mxu1 %v11467_v49  ;;  %v11564_v10 = vld [vmem:[#allocation86_spill] sm:$0xff] }
 0x461   :  { %3566 = vmatprep.subr.bf16.mxu0 %v11531_v33  ;;  %v11565_v33 = vld [vmem:[#allocation88_spill] sm:$0xff]  ;;  %v2293_v23 = vmax.f32 %v2290_v29, 0.0  ;;  %v11591_v29 = vld [vmem:[#allocation62_spill] sm:$0xff] }
 0x463   :  { %3641 = vmatpush1.bf16.msra.mxu1 %v11469_v50 }
 0x464   :  { %3567 = vmatpush1.bf16.msra.mxu0 %v11532_v28  ;;  %3642 = vmatprep.subr.bf16.mxu1 %v11471_v3  ;;  %v9897_v28 = vld [vmem:[%s11566_s30] sm:$0xff] }
 0x465   :  { %3568 = vmatprep.subr.bf16.mxu0 %v11533_v20  ;;  %74 = vrot.lane.b32.xlu0 %v9897_v28, %s6357_s5  ;;  %v11568_v20 = vld [vmem:[#allocation90_spill] sm:$0xff] }
 0x466   :  { %v2943_v39 = vpop.f32.mrf.mxu1 }
 0x467   :  { %v2944_v9 = vadd.f32 %v2943_v39, %v2700_v34  ;;  %v2984_v26 = vpop.f32.mrf.mxu0  ;;  %3643 = vmatpush1.bf16.msra.mxu1 %v11474_v42  ;;  %v11536_v34 = vld [vmem:[#allocation19_spill] sm:$0xff]  ;;  %v2296_v39 = vpack.c.bf16 %v2293_v23, %v2293_v23 }
 0x468   :  { %v2945_v55 = vpop.f32.mrf.mxu1  ;;  %3569 = vmatpush2.bf16.msra.mxu0 %v11534_v51  ;;  %3644 = vmatprep.subr.bf16.mxu1 %v11476_v15  ;;  %v11538_v15 = vld [vmem:[#allocation25_spill] sm:$0xff]  ;;  %v6140_v23 = vld [vmem:[%s11570_s2 + $0xa8] sm:$0xff]  }
 0x469   :  { %v9823_v49 = vadd.f32 %v2984_v26, %v2944_v9  ;;  %v2946_v32 = vadd.f32 %v2945_v55, %v2702_v21  ;;  %v2986_v50 = vpop.f32.mrf.mxu0  ;;  %3570 = vmatprep.subr.bf16.mxu0 %v11535_v7  ;;  %v11557_v21 = vld [vmem:[#allocation117_spill] sm:$0xff]  ;;  %v11571_v9 = vld [vmem:[#allocation94_spill] sm:$0xff]  ;;  %v11572_v26 = vld [vmem:[#allocation95_spill] sm:$0xff] }
 0x46a   :  { %v2947_v56 = vpop.f32.mrf.mxu1  ;;  %v6124_v55 = vld [vmem:[%s11570_s2 + $0x90] sm:$0xff]   ;;  %v11573_v51 = vld [vmem:[#allocation97_spill] sm:$0xff] }
 0x46b   :  { %v9826_v3 = vadd.f32 %v2986_v50, %v2946_v32  ;;  %v2988_v60 = vpop.f32.mrf.mxu0  ;;  %3645 = vmatpush1.bf16.msra.mxu1 %v11477_v13  ;;  %v11574_v50 = vld [vmem:[#allocation98_spill] sm:$0xff] }
 0x46c   :  { %v2948_v57 = vpop.f32.mrf.mxu1  ;;  %3571 = vmatpush2.bf16.msra.mxu0 %v11536_v34  ;;  %3646 = vmatprep.subr.bf16.mxu1 %v11478_v48 }
 0x46d   :  { %v2989_v42 = vpop.f32.mrf.mxu0  ;;  %3572 = vmatprep.subr.bf16.mxu0 %v11537_v11  ;;  %v6126_v57 = vld [vmem:[%s11570_s2 + $0x88] sm:$0xff]  }
 0x46e   :  { %v11575_v42 = vld [vmem:[#allocation99_spill] sm:$0xff] }
 0x46f   :  { %3647 = vmatpush1.bf16.msra.mxu1 %v11479_v0  ;;  %v11548_v0 = vld [vmem:[#allocation59_spill] sm:$0xff] }
 0x470   :  { %3573 = vmatpush2.bf16.msra.mxu0 %v11538_v15  ;;  %3648 = vmatprep.subr.bf16.mxu1 %v11480_v38  ;;  %v11576_v15 = vld [vmem:[#allocation100_spill] sm:$0xff] }
 0x471   :  { %3574 = vmatprep.subr.bf16.mxu0 %v11539_v4  ;;  %v11577_v4 = vld [vmem:[#allocation101_spill] sm:$0xff] }
 0x473   :  { %3649 = vmatpush1.bf16.msra.mxu1 %v11481_v35  ;;  %v11540_v35 = vld [vmem:[#allocation34_spill] sm:$0xff] }
 0x474   :  { %3575 = vmatpush2.bf16.msra.mxu0 %v9136_v5  ;;  %3650 = vmatprep.subr.bf16.mxu1 %v11482_v45  ;;  %v11542_v45 = vld [vmem:[#allocation39_spill] sm:$0xff] }
 0x475   :  { %3576 = vmatprep.subr.bf16.mxu0 %v9147_v18  ;;  %v11541_v18 = vld [vmem:[#allocation36_spill] sm:$0xff] }
 0x476   :  { %v9840_v13 = vpop.f32.mrf.mxu1 }
 0x477   :  { %3651 = vmatpush2.bf16.msra.mxu1 %v11485_v52  ;;  %v11547_v52 = vld [vmem:[#allocation54_spill] sm:$0xff] }
 0x478   :  { %v9843_v48 = vpop.f32.mrf.mxu1  ;;  %3577 = vmatpush2.bf16.msra.mxu0 %v9160_v41  ;;  %3652 = vmatprep.subr.bf16.mxu1 %v11486_v36  ;;  %v11543_v41 = vld [vmem:[#allocation41_spill] sm:$0xff]  ;;  %v11544_v36 = vld [vmem:[#allocation43_spill] sm:$0xff] }
 0x479   :  { %3578 = vmatprep.subr.bf16.mxu0 %v9171_v62  ;;  %v11545_v62 = vld [vmem:[#allocation45_spill] sm:$0xff] }
 0x47a   :  { %v3273_v38 = vpop.f32.mrf.mxu1 }
 0x47b   :  { %3653 = vmatpush2.bf16.msra.mxu1 %v11487_v59  ;;  %v11549_v59 = vld [vmem:[#allocation51_spill] sm:$0xff]  ;;  %v11580_v38 = vld [vmem:[#allocation104_spill] sm:$0xff] }
 0x47c   :  { %v3274_v5 = vpop.f32.mrf.mxu1  ;;  %3579 = vmatpush2.bf16.msra.mxu0 %v11540_v35  ;;  %3654 = vmatprep.subr.bf16.mxu1 %v11488_v2  ;;  %v11546_v2 = vld [vmem:[#allocation3_spill] sm:$0xff] }
 0x47d   :  { %3580 = vmatprep.subr.bf16.mxu0 %v11541_v18  ;;  %v6132_v18 = vld [vmem:[%s11570_s2 + $0x70] sm:$0xff]  }
 0x47f   :  { %3655 = vmatpush2.bf16.msra.mxu1 %v11489_v16  ;;  %v11550_v16 = vld [vmem:[#allocation64_spill] sm:$0xff] }
 0x480   :  { %3581 = vmatpush2.bf16.msra.mxu0 %v11542_v45  ;;  %3656 = vmatprep.subr.bf16.mxu1 %v11490_v8  ;;  %v2289_v8 = vadd.f32 %v9722_v6, %v11550_v16  ;;  %v11558_v6 = vld [vmem:[#allocation96_spill] sm:$0xff]  ;;  %v6134_v16 = vld [vmem:[%s11570_s2 + $0x68] sm:$0xff]  }
 0x481   :  { %3582 = vmatprep.subr.bf16.mxu0 %v11543_v41 }
 0x483   :  { %3657 = vmatpush2.bf16.msra.mxu1 %v11491_v47  ;;  %v11551_v47 = vld [vmem:[#allocation78_spill] sm:$0xff] }
 0x484   :  { %3583 = vmatpush2.bf16.msra.mxu0 %v11544_v36  ;;  %3658 = vmatprep.subr.bf16.mxu1 %v11492_v22  ;;  %v2292_v22 = vmax.f32 %v2289_v8, 0.0  ;;  %v11581_v36 = vld [vmem:[#allocation105_spill] sm:$0xff] }
 0x485   :  { %3683 = vmatprep.subr.bf16.mxu0 %v11545_v62 }
 0x486   :  { %v2295_v14 = vpack.c.bf16 %v2292_v22, %v2292_v22  ;;  %v11584_v22 = vld [vmem:[#allocation108_spill] sm:$0xff] }
 0x487   :  { %3585 = vmatmul.mubr.bf16.vlgmr.msra.gmra.mxu0 %v9775_v40  ;;  %3659 = vmatpush2.bf16.msra.mxu1 %v11493_v24  ;;  %v11553_v24 = vld [vmem:[#allocation50_spill] sm:$0xff]  ;;  %v11555_v40 = vld [vmem:[#allocation23_spill] sm:$0xff] }
 0x488   :  { %3684 = vmatpush1.bf16.msra.mxu0 %v11546_v2  ;;  %3660 = vmatprep.subr.bf16.mxu1 %v11494_v53  ;;  %v11552_v53 = vld [vmem:[#allocation26_spill] sm:$0xff] }
 0x489   :  { %3685 = vmatprep.subr.bf16.mxu0 %v11547_v52  ;;  %3707 = vmatprep.mubr.bf16.mxu0 %v10955_v63  ;;  %v11582_v2 = vld [vmem:[#allocation106_spill] sm:$0xff] }
 0x48b   :  { %3661 = vmatpush2.bf16.msra.mxu1 %v11495_v46  ;;  %v11554_v46 = vld [vmem:[#allocation24_spill] sm:$0xff] }
 0x48c   :  { %3686 = vmatpush1.bf16.msra.mxu0 %v11548_v0  ;;  %3662 = vmatprep.subr.bf16.mxu1 %v11496_v58  ;;  %v11556_v58 = vld [vmem:[#allocation79_spill] sm:$0xff] }
 0x48d   :  { %3687 = vmatprep.subr.bf16.mxu0 %v11549_v59 }
 0x48f   :  { %3663 = vmatpush2.bf16.msra.mxu1 %v11497_v43  ;;  %v11559_v43 = vld [vmem:[#allocation80_spill] sm:$0xff] }
 0x490   :  { %3688 = vmatpush1.bf16.msra.mxu0 %v11551_v47  ;;  %3664 = vmatprep.subr.bf16.mxu1 %v11498_v1  ;;  %v11560_v1 = vld [vmem:[#allocation81_spill] sm:$0xff]  ;;  %v11583_v47 = vld [vmem:[#allocation107_spill] sm:$0xff] }
 0x491   :  { %3689 = vmatprep.subr.bf16.mxu0 %v11552_v53 }
 0x493   :  { %3665 = vmatpush2.bf16.msra.mxu1 %v11553_v24  ;;  %v6136_v24 = vld [vmem:[%s11570_s2 + $0x60] sm:$0xff]  }
 0x494   :  { %3690 = vmatpush1.bf16.msra.mxu0 %v11554_v46  ;;  %3768 = vmatprep.subr.bf16.mxu1 %v11555_v40  ;;  %v11585_v46 = vld [vmem:[#allocation109_spill] sm:$0xff]  ;;  %v11586_v40 = vld [vmem:[#allocation110_spill] sm:$0xff] }
 0x495   :  { %3719 = vmatprep.subr.bf16.mxu0 %v11556_v58  ;;  %v6138_v58 = vld [vmem:[%s11570_s2 + $0xb8] sm:$0xff]  }
 0x496   :  { %3667 = vmatmul.mubr.bf16.vlgmr.msra.gmra.mxu1 %v11557_v21  ;;  %v11588_v21 = vld [vmem:[#allocation112_spill] sm:$0xff] }
 0x497   :  { %5521 = vmatmul.mubr.msk.bf16.vlgmr.msra.gmra.mxu0 %vm2620_vm1, %v11558_v6  ;;  %3769 = vmatpush1.bf16.msra.mxu1 %v11559_v43  ;;  %v6139_v43 = vld [vmem:[%s11570_s2 + $0xb0] sm:$0xff]  }
 0x498   :  { %3720 = vmatpush1.bf16.msra.mxu0 %v11560_v1  ;;  %3751 = vmatprep.mubr.bf16.mxu0 %v2295_v14  ;;  %v11587_v14 = vld [vmem:[#allocation111_spill] sm:$0xff] }
 0x499   :  { %3770 = vmatprep.subr.bf16.mxu1 %v11561_v37  ;;  %3721 = vmatprep.subr.bf16.mxu0 %v11562_v44  ;;  %v11589_v37 = vld [vmem:[#allocation113_spill] sm:$0xff]  ;;  %v2419_v44 = vld [vmem:[%s10417_s7] sm:$0x3] }
 0x49a   :  { %3792 = vmatprep.mubr.bf16.mxu1 %v10955_v63 }
 0x49b   :  { %3771 = vmatpush1.bf16.msra.mxu1 %v11508_v31  ;;  %v9904_v31 = vld [vmem:[%s11567_s29] sm:$0xff] }
 0x49c   :  { %3722 = vmatpush1.bf16.msra.mxu0 %v11564_v10  ;;  %3772 = vmatprep.subr.bf16.mxu1 %v11512_v27  ;;  %v11569_v27 = vld [vmem:[#allocation92_spill] sm:$0xff]  ;;  %v9992_v10 = vrot.slane %v2419_v44, %v11591_v29 }
 0x49d   :  { %3723 = vmatprep.subr.bf16.mxu0 %v11565_v33  ;;  %86 = vrot.lane.b32.xlu0 %v9904_v31, %s6357_s5 }
 0x49f   :  { %3773 = vmatpush1.bf16.msra.mxu1 %v11513_v61  ;;  %v6122_v61 = vld [vmem:[%s11570_s2 + $0x98] sm:$0xff]  }
 0x4a0   :  { %3724 = vmatpush1.bf16.msra.mxu0 %v11568_v20  ;;  %3774 = vmatprep.subr.bf16.mxu1 %v11514_v12 }
 0x4a1   :  { %3725 = vmatprep.subr.bf16.mxu0 %v11569_v27  ;;  %v11592_v27 = vld [vmem:[#allocation115_spill] sm:$0xff] }
 0x4a3   :  { %3775 = vmatpush1.bf16.msra.mxu1 %v11515_v30 }
 0x4a4   :  { %3726 = vmatpush1.bf16.msra.mxu0 %v11571_v9  ;;  %3959 = vmatprep.subr.bf16.mxu1 %v10955_v63 }
 0x4a5   :  { %3727 = vmatprep.subr.bf16.mxu0 %v11572_v26  ;;  %v11595_v26 = vld [vmem:[#allocation116_spill] sm:$0xff] }
 0x4a6   :  { %5522 = vmatmul.mubr.msk.bf16.vlgmr.msra.gmra.mxu1 %vm2620_vm1, %v2296_v39  ;;  %v11594_v39 = vld [vmem:[#allocation69_spill] sm:$0xff] }
 0x4a7   :  { %v3228_v12 = vpop.f32.mrf.mxu0  ;;  %3960 = vmatpush1.bf16.msra.mxu1 %v6122_v61  ;;  %v11593_v61 = vld [vmem:[#allocation37_spill] sm:$0xff] }
 0x4a8   :  { %v3270_v30 = vadd.f32 %v9840_v13, %v3228_v12  ;;  %3728 = vmatpush1.bf16.msra.mxu0 %v11573_v51  ;;  %3961 = vmatprep.subr.bf16.mxu1 %v10955_v63  ;;  %v11578_v13 = vld [vmem:[#allocation102_spill] sm:$0xff]  ;;  %v2288_v9 = vadd.f32 %v11594_v39, %v11593_v61  ;;  %v6144_v61 = vld [vmem:[%s11570_s2 + $0xe8] sm:$0xff]  }
 0x4a9   :  { %v3230_v32 = vpop.f32.mrf.mxu0  ;;  %3729 = vmatprep.subr.bf16.mxu0 %v11574_v50 }
 0x4aa   :  { %v9926_v7 = vadd.f32 %v3270_v30, %v9823_v49  ;;  %v3272_v56 = vadd.f32 %v9843_v48, %v3230_v32  ;;  %v6128_v49 = vld [vmem:[%s11570_s2 + $0x80] sm:$0xff]   ;;  %v11579_v48 = vld [vmem:[#allocation103_spill] sm:$0xff]  ;;  %v2291_v30 = vmax.f32 %v2288_v9, 0.0  ;;  %v6118_v32 = vld [vmem:[%s11570_s2 + $0x38] sm:$0xff]  }
 0x4ab   :  { %v3232_v60 = vpop.f32.mrf.mxu0  ;;  %3962 = vmatpush1.bf16.msra.mxu1 %v6124_v55  ;;  %v6141_v55 = vld [vmem:[%s11570_s2 + $0xa0] sm:$0xff]  }
 0x4ac   :  { %v9933_v34 = vadd.f32 %v3272_v56, %v9826_v3  ;;  %3730 = vmatpush1.bf16.msra.mxu0 %v11575_v42  ;;  %3963 = vmatprep.subr.bf16.mxu1 %v10955_v63  ;;  %v6130_v3 = vld [vmem:[%s11570_s2 + $0x78] sm:$0xff]   ;;  %v2294_v50 = vpack.c.bf16 %v2291_v30, %v2291_v30  ;;  %v6129_v42 = vld [vmem:[%s11570_s2] sm:$0xff]  }
 0x4ad   :  { %v3233_v11 = vpop.f32.mrf.mxu0  ;;  %3731 = vmatprep.subr.bf16.mxu0 %v11576_v15  ;;  %v6123_v60 = vld [vmem:[%s11570_s2 + $0x18] sm:$0xff]  }
 0x4ae   :  { %v3290_v12 = vadd.f32 %v9992_v10, %v9933_v34  ;;  %v6127_v34 = vld [vmem:[%s11570_s2 + $0x8] sm:$0xff]   ;;  %v6131_v11 = vld [vmem:[%s11570_s2 + $0x58] sm:$0xff]  }
 0x4af   :  { %3964 = vmatpush1.bf16.msra.mxu1 %v6126_v57  ;;  %v6125_v57 = vld [vmem:[%s11570_s2 + $0x10] sm:$0xff]  }
 0x4b0   :  { %3732 = vmatpush1.bf16.msra.mxu0 %v11577_v4  ;;  %3965 = vmatprep.subr.bf16.mxu1 %v10955_v63  ;;  %v3292_v51 = vmax.f32 %v3290_v12, 0.0  ;;  %v6133_v4 = vld [vmem:[%s11570_s2 + $0x50] sm:$0xff]  }
 0x4b1   :  { %3733 = vmatprep.subr.bf16.mxu0 %v11578_v13  ;;  %v11596_v13 = vld [vmem:[#allocation33_spill] sm:$0xff] }
 0x4b2   :  { %v3294_v56 = vpack.c.bf16 %v3292_v51, %v3292_v51 }
 0x4b3   :  { %3966 = vmatpush1.bf16.msra.mxu1 %v6128_v49 }
 0x4b4   :  { %3734 = vmatpush1.bf16.msra.mxu0 %v11579_v48  ;;  %3967 = vmatprep.subr.bf16.mxu1 %v10955_v63 }
 0x4b5   :  { %3735 = vmatprep.subr.bf16.mxu0 %v11580_v38 }
 0x4b6   :  { %v3329_v5 = vpop.f32.mrf.mxu1 }
 0x4b7   :  { %v3370_v35 = vpop.f32.mrf.mxu0  ;;  %3968 = vmatpush1.bf16.msra.mxu1 %v6130_v3  ;;  %v10054_v3 = vrot.slane %v2419_v44, %v11596_v13 }
 0x4b8   :  { %v9953_v45 = vadd.f32 %v3370_v35, %v3329_v5  ;;  %v3331_v41 = vpop.f32.mrf.mxu1  ;;  %3736 = vmatpush2.bf16.msra.mxu0 %v11581_v36  ;;  %3969 = vmatprep.subr.bf16.mxu1 %v10955_v63 }
 0x4b9   :  { %v3372_v62 = vpop.f32.mrf.mxu0  ;;  %3737 = vmatprep.subr.bf16.mxu0 %v11582_v2 }
 0x4ba   :  { %v9958_v52 = vadd.f32 %v3372_v62, %v3331_v41  ;;  %v3333_v0 = vpop.f32.mrf.mxu1  ;;  %v3289_v41 = vadd.f32 %v10054_v3, %v9926_v7  ;;  %v6137_v62 = vld [vmem:[%s11570_s2 + $0x40] sm:$0xff]  }
 0x4bb   :  { %v3374_v59 = vpop.f32.mrf.mxu0  ;;  %3970 = vmatpush1.bf16.msra.mxu1 %v6132_v18 }
 0x4bc   :  { %v3334_v8 = vpop.f32.mrf.mxu1  ;;  %3738 = vmatpush2.bf16.msra.mxu0 %v11583_v47  ;;  %3971 = vmatprep.subr.bf16.mxu1 %v10955_v63  ;;  %v3291_v2 = vmax.f32 %v3289_v41, 0.0 }
 0x4bd   :  { %v3375_v53 = vpop.f32.mrf.mxu0  ;;  %3739 = vmatprep.subr.bf16.mxu0 %v11584_v22 }
 0x4bf   :  { %3972 = vmatpush1.bf16.msra.mxu1 %v6134_v16 }
 0x4c0   :  { %3740 = vmatpush2.bf16.msra.mxu0 %v11585_v46  ;;  %3973 = vmatprep.subr.bf16.mxu1 %v10955_v63 }
 0x4c1   :  { %3741 = vmatprep.subr.bf16.mxu0 %v11586_v40 }
 0x4c3   :  { %3974 = vmatpush1.bf16.msra.mxu1 %v6136_v24 }
 0x4c4   :  { %3742 = vmatpush2.bf16.msra.mxu0 %v11587_v14  ;;  %3983 = vmatprep.subr.bf16.mxu1 %v10955_v63 }
 0x4c5   :  { %3743 = vmatprep.subr.bf16.mxu0 %v11588_v21 }
 0x4c6   :  { %v9978_v6 = vpop.f32.mrf.mxu1 }
 0x4c7   :  { %3984 = vmatpush2.bf16.msra.mxu1 %v6138_v58 }
 0x4c8   :  { %v9983_v1 = vpop.f32.mrf.mxu1  ;;  %3744 = vmatpush2.bf16.msra.mxu0 %v11589_v37  ;;  %3985 = vmatprep.subr.bf16.mxu1 %v10955_v63  ;;  %v6142_v37 = vld [vmem:[%s11570_s2 + $0xf8] sm:$0xff]  }
 0x4c9   :  { %3745 = vmatprep.subr.bf16.mxu0 %v11590_v25 }
 0x4ca   :  { %v3456_v33 = vpop.f32.mrf.mxu1 }
 0x4cb   :  { %3986 = vmatpush2.bf16.msra.mxu1 %v6139_v43  ;;  %v6143_v33 = vld [vmem:[%s11570_s2 + $0xf0] sm:$0xff]  }
 0x4cc   :  { %v3457_v20 = vpop.f32.mrf.mxu1  ;;  %3746 = vmatpush2.bf16.msra.mxu0 %v11592_v27  ;;  %3987 = vmatprep.subr.bf16.mxu1 %v10955_v63 }
 0x4cd   :  { %3747 = vmatprep.subr.bf16.mxu0 %v11595_v26  ;;  %v6145_v26 = vld [vmem:[%s11570_s2 + $0xe0] sm:$0xff]  }
 0x4cf   :  { %3988 = vmatpush2.bf16.msra.mxu1 %v6140_v23 }
 0x4d0   :  { %3748 = vmatpush2.bf16.msra.mxu0 %v9615_v19  ;;  %3989 = vmatprep.subr.bf16.mxu1 %v10955_v63  ;;  %v6120_v19 = vld [vmem:[%s11570_s2 + $0x28] sm:$0xff]  }
 0x4d1   :  { %3749 = vmatprep.subr.bf16.mxu0 %v9623_v17  ;;  %v6119_v17 = vld [vmem:[%s11570_s2 + $0x30] sm:$0xff]  }
 0x4d3   :  { %3990 = vmatpush2.bf16.msra.mxu1 %v6141_v55  ;;  %v6146_v55 = vld [vmem:[%s11570_s2 + $0xd8] sm:$0xff]  }
 0x4d4   :  { %3750 = vmatpush2.bf16.msra.mxu0 %v9637_v54  ;;  %4189 = vmatprep.subr.bf16.mxu1 %v10955_v63  ;;  %v6121_v54 = vld [vmem:[%s11570_s2 + $0x20] sm:$0xff]  }
 0x4d5   :  { %4074 = vmatprep.subr.bf16.mxu0 %v10955_v63 }
 0x4d7   :  { %3752 = vmatmul.mubr.bf16.vlgmr.msra.gmra.mxu0 %v2294_v50  ;;  %v75_v20 = vpop.permute.xlu0 %74  ;;  %v6147_v50 = vld [vmem:[%s11570_s2 + $0xd0] sm:$0xff]  }
 0x4d8   :  { %4075 = vmatpush1.bf16.msra.mxu0 %v6118_v32  ;;  %5596 = vmatprep.mubr.msk.bf16.mxu0 %vm2620_vm1, %v3294_v56  ;;  %v10084_v39 = vsub.f32 %v9897_v28, %v75_v20  ;;  %v6148_v56 = vld [vmem:[%s11570_s2 + $0xc8] sm:$0xff]  }
 0x4d9   :  { %4076 = vmatprep.subr.bf16.mxu0 %v10955_v63 }
 0x4da   :  { %98 = vrot.lane.b32.xlu1 %v10084_v39, %s6358_s8  ;;  %v78_v51 = vmul.f32 0.5, %v10084_v39  ;;  %6222 = vrcp.f32 %v10084_v39 }
 0x4dc   :  { %4077 = vmatpush1.bf16.msra.mxu0 %v6119_v17  ;;  %v6149_v17 = vld [vmem:[%s11570_s2 + $0xc0] sm:$0xff]  }
 0x4dd   :  { %4078 = vmatprep.subr.bf16.mxu0 %v10955_v63 }
 0x4de   :  { %80 = vrot.lane.b32.xlu1 %v78_v51, %s6358_s8 }
 0x4e0   :  { %4079 = vmatpush1.bf16.msra.mxu0 %v6120_v19  ;;  %v6150_v19 = vld [vmem:[%s11570_s2 + $0x118] sm:$0xff]  }
 0x4e1   :  { %4080 = vmatprep.subr.bf16.mxu0 %v10955_v63 }
 0x4e4   :  { %4081 = vmatpush1.bf16.msra.mxu0 %v6121_v54  ;;  %v6151_v54 = vld [vmem:[%s11570_s2 + $0x110] sm:$0xff]  }
 0x4e5   :  { %4082 = vmatprep.subr.bf16.mxu0 %v10955_v63 }
 0x4e8   :  { %4083 = vmatpush1.bf16.msra.mxu0 %v6123_v60  ;;  %v6152_v60 = vld [vmem:[%s11570_s2 + $0x108] sm:$0xff]  }
 0x4e9   :  { %4084 = vmatprep.subr.bf16.mxu0 %v10955_v63 }
 0x4ec   :  { %4085 = vmatpush1.bf16.msra.mxu0 %v6125_v57  ;;  %v6153_v57 = vld [vmem:[%s11570_s2 + $0x100] sm:$0xff]  }
 0x4ed   :  { %4086 = vmatprep.subr.bf16.mxu0 %v10955_v63 }
 0x4f0   :  { %4087 = vmatpush1.bf16.msra.mxu0 %v6127_v34 }
 0x4f1   :  { %4088 = vmatprep.subr.bf16.mxu0 %v10955_v63 }
 0x4f4   :  { %4089 = vmatpush1.bf16.msra.mxu0 %v6129_v42 }
 0x4f5   :  { %4098 = vmatprep.subr.bf16.mxu0 %v10955_v63 }
 0x4f7   :  { %v3411_v15 = vpop.f32.mrf.mxu0 }
 0x4f8   :  { %v3412_v49 = vadd.f32 %v3411_v15, %v9953_v45  ;;  %4099 = vmatpush2.bf16.msra.mxu0 %v6131_v11  ;;  %v6135_v45 = vld [vmem:[%s11570_s2 + $0x48] sm:$0xff]  }
 0x4f9   :  { %v3413_v48 = vpop.f32.mrf.mxu0  ;;  %4100 = vmatprep.subr.bf16.mxu0 %v10955_v63 }
 0x4fa   :  { %v3453_v38 = vadd.f32 %v9978_v6, %v3412_v49  ;;  %v3414_v5 = vadd.f32 %v3413_v48, %v9958_v52  ;;  %v3293_v52 = vpack.c.bf16 %v3291_v2, %v3291_v2 }
 0x4fb   :  { %v3415_v35 = vpop.f32.mrf.mxu0 }
 0x4fc   :  { %v3455_v18 = vadd.f32 %v9983_v1, %v3414_v5  ;;  %4101 = vmatpush2.bf16.msra.mxu0 %v6133_v4 }
 0x4fd   :  { %v3416_v36 = vpop.f32.mrf.mxu0  ;;  %4102 = vmatprep.subr.bf16.mxu0 %v10955_v63 }
 0x500   :  { %4103 = vmatpush2.bf16.msra.mxu0 %v6135_v45 }
 0x501   :  { %4104 = vmatprep.subr.bf16.mxu0 %v10955_v63 }
 0x504   :  { %4105 = vmatpush2.bf16.msra.mxu0 %v6137_v62 }
 0x506   :  { %v3496_v0 = vpop.f32.mrf.mxu1 }
 0x507   :  { %v3537_v59 = vpop.f32.mrf.mxu0  ;;  %4107 = vmatmul.mubr.bf16.vlgmr.msra.gmra.mxu0 %v3293_v52 }
 0x508   :  { %v3538_v16 = vadd.f32 %v3537_v59, %v3496_v0  ;;  %v3498_v8 = vpop.f32.mrf.mxu1  ;;  %v6359_v0 = vmov 1  }
 0x509   :  { %v3539_v47 = vpop.f32.mrf.mxu0  ;;  %5762 = vset.pattern.permute.xlu0 %v6359_v0 }
 0x50a   :  { %v3544_v7 = vadd.f32 %v3538_v16, %v3453_v38  ;;  %v3540_v53 = vadd.f32 %v3539_v47, %v3498_v8  ;;  %v3500_v22 = vpop.f32.mrf.mxu1  ;;  %v6360_v16 = vmov 0.0   ;;  %v6156_v8 = vld [vmem:[%s10419_s11 + $0x38] sm:$0xff]   ;;  %v6158_v47 = vld [vmem:[%s10419_s11 + $0x30] sm:$0xff]  }
 0x50b   :  { %v3541_v24 = vpop.f32.mrf.mxu0  ;;  %5701 = vmatprep.subr.bf16.mxu0 %v6360_v16  ;;  %5717 = vmatprep.mubr.msk.bf16.mxu0 %vm6363_vm2, %v6360_v16 }
 0x50c   :  { %v3546_v46 = vadd.f32 %v3544_v7, %v10054_v3  ;;  %v3545_v40 = vadd.f32 %v3540_v53, %v3455_v18  ;;  %v3501_v58 = vpop.f32.mrf.mxu1  ;;  %5702 = vmatpush3.bf16.msra.mxu0 %v6156_v8  ;;  %v6160_v7 = vld [vmem:[%s10419_s11 + $0x28] sm:$0xff]   ;;  %v6162_v24 = vld [vmem:[%s10419_s11 + $0x20] sm:$0xff]  }
 0x50d   :  { %v3542_v14 = vpop.f32.mrf.mxu0  ;;  %5703 = vmatprep.subr.bf16.mxu0 %v6360_v16  ;;  %v6164_v58 = vld [vmem:[%s10419_s11 + $0x18] sm:$0xff]   ;;  %v6169_v8 = vld [vmem:[%s10419_s11] sm:$0xff]  }
 0x50e   :  { %v3547_v21 = vadd.f32 %v3545_v40, %v9992_v10  ;;  %v3548_v6 = vmax.f32 %v3546_v46, 0.0  ;;  %v6166_v14 = vld [vmem:[%s10419_s11 + $0x10] sm:$0xff]  }
 0x50f   :  { %v87_v12 = vpop.permute.xlu0 %86 }
 0x510   :  { %v3549_v43 = vmax.f32 %v3547_v21, 0.0  ;;  %v3550_v44 = vpack.c.bf16 %v3548_v6, %v3548_v6  ;;  %v10097_v30 = vsub.f32 %v9904_v31, %v87_v12  ;;  %5704 = vmatpush3.bf16.msra.mxu0 %v6158_v47  ;;  %v6223_v21 = vpop.eup %6222  ;;  %v6172_v47 = vld [vmem:[%s10421_s16 + $0x34] ss:$8 sps:$4 sm:$0xff]  }
 0x511   :  { %5705 = vmatprep.subr.bf16.mxu0 %v6360_v16 }
 0x512   :  { %v3551_v1 = vpack.c.bf16 %v3549_v43, %v3549_v43  ;;  %v90_v32 = vmul.f32 0.5, %v10097_v30  ;;  %v104_v43 = vmul.f32 %v6223_v21, %v10097_v30  ;;  %v6196_v21 = vld [vmem:[%s10422_s15 + $0x34] ss:$8 sps:$4 sm:$0xff]  }
 0x514   :  { %5583 = vmatprep.mubr.msk.bf16.mxu1 %vm2620_vm1, %v3551_v1  ;;  %92 = vrot.lane.b32.xlu0 %v90_v32, %s6358_s8 }
 0x515   :  { %3992 = vmatmul.mubr.bf16.vlgmr.msra.gmra.mxu1 %v3550_v44  ;;  %5706 = vmatpush3.bf16.msra.mxu0 %v6160_v7  ;;  %v6182_v7 = vld [vmem:[%s10422_s15 + $0x70] ss:$8 sps:$4 sm:$0xff]  }
 0x516   :  { %v3627_v25 = vpop.f32.mrf.mxu1  ;;  %4190 = vmatpush1.bf16.msra.mxu1 %v6142_v37  ;;  %5707 = vmatprep.subr.bf16.mxu0 %v6360_v16 }
 0x517   :  { %4191 = vmatprep.subr.bf16.mxu1 %v10955_v63 }
 0x518   :  { %v3629_v23 = vpop.f32.mrf.mxu1 }
 0x519   :  { %5708 = vmatpush3.bf16.msra.mxu0 %v6162_v24  ;;  %v6185_v24 = vld [vmem:[%s10422_s15 + $0x60] ss:$8 sps:$4 sm:$0xff]  }
 0x51a   :  { %v3631_v27 = vpop.f32.mrf.mxu1  ;;  %4192 = vmatpush1.bf16.msra.mxu1 %v6143_v33  ;;  %5709 = vmatprep.subr.bf16.mxu0 %v6360_v16 }
 0x51b   :  { %4193 = vmatprep.subr.bf16.mxu1 %v10955_v63 }
 0x51c   :  { %v3632_v9 = vpop.f32.mrf.mxu1 }
 0x51d   :  { %5710 = vmatpush3.bf16.msra.mxu0 %v6164_v58  ;;  %v6193_v58 = vld [vmem:[%s10422_s15 + $0x44] ss:$8 sps:$4 sm:$0xff]  }
 0x51e   :  { %4194 = vmatpush1.bf16.msra.mxu1 %v6144_v61  ;;  %5711 = vmatprep.subr.bf16.mxu0 %v6360_v16 }
 0x51f   :  { %4195 = vmatprep.subr.bf16.mxu1 %v10955_v63 }
 0x521   :  { %5712 = vmatpush3.bf16.msra.mxu0 %v6166_v14  ;;  %v6191_v14 = vld [vmem:[%s10422_s15 + $0x40] ss:$8 sps:$4 sm:$0xff]  }
 0x522   :  { %4196 = vmatpush1.bf16.msra.mxu1 %v6145_v26  ;;  %5713 = vmatprep.subr.bf16.mxu0 %v6360_v16 }
 0x523   :  { %4197 = vmatprep.subr.bf16.mxu1 %v10955_v63 }
 0x526   :  { %4198 = vmatpush1.bf16.msra.mxu1 %v6146_v55 }
 0x527   :  { %4199 = vmatprep.subr.bf16.mxu1 %v10955_v63 }
 0x52a   :  { %4200 = vmatpush1.bf16.msra.mxu1 %v6147_v50 }
 0x52b   :  { %4201 = vmatprep.subr.bf16.mxu1 %v10955_v63 }
 0x52e   :  { %4202 = vmatpush1.bf16.msra.mxu1 %v6148_v56 }
 0x52f   :  { %4203 = vmatprep.subr.bf16.mxu1 %v10955_v63 }
 0x532   :  { %4204 = vmatpush1.bf16.msra.mxu1 %v6149_v17 }
 0x533   :  { %4213 = vmatprep.subr.bf16.mxu1 %v10955_v63 }
 0x536   :  { %4214 = vmatpush2.bf16.msra.mxu1 %v6150_v19 }
 0x537   :  { %4215 = vmatprep.subr.bf16.mxu1 %v10955_v63 }
 0x53a   :  { %4216 = vmatpush2.bf16.msra.mxu1 %v6151_v54 }
 0x53b   :  { %4217 = vmatprep.subr.bf16.mxu1 %v10955_v63 }
 0x53e   :  { %4218 = vmatpush2.bf16.msra.mxu1 %v6152_v60  ;;  %v6155_v60 = vld [vmem:[%s10418_s10 + $0x30] sm:$0xff]  }
 0x53f   :  { %4219 = vmatprep.subr.bf16.mxu1 %v10955_v63 }
 0x542   :  { %4220 = vmatpush2.bf16.msra.mxu1 %v6153_v57  ;;  %v6362_v57 = vmov 3  }
 0x543   :  { %5721 = vmatprep.subr.bf16.mxu1 %v6360_v16 }
 0x547   :  { %v3586_v34 = vpop.f32.mrf.mxu0 }
 0x548   :  { %v3628_v42 = vadd.f32 %v3627_v25, %v3586_v34  ;;  %v6157_v34 = vld [vmem:[%s10418_s10 + $0x28] sm:$0xff]  }
 0x549   :  { %v3588_v11 = vpop.f32.mrf.mxu0 }
 0x54a   :  { %v3630_v15 = vadd.f32 %v3629_v23, %v3588_v11  ;;  %v6161_v11 = vld [vmem:[%s10418_s10 + $0x18] sm:$0xff]  }
 0x54b   :  { %v3590_v49 = vpop.f32.mrf.mxu0 }
 0x54c   :  { %v99_v6 = vpop.permute.xlu1 %98  ;;  %v6165_v49 = vld [vmem:[%s10418_s10 + $0x8] sm:$0xff]  }
 0x54d   :  { %v3591_v4 = vpop.f32.mrf.mxu0  ;;  %6224 = vrcp.f32 %v99_v6  ;;  %v6194_v6 = vld [vmem:[%s10422_s15 + $0x30] ss:$8 sps:$4 sm:$0xff]  }
 0x54e   :  { %6226 = vlog2.f32 %v104_v43  ;;  %v6197_v43 = vld [vmem:[%s10422_s15 + $0x20] ss:$8 sps:$4 sm:$0xff]  }
 0x550   :  { %v81_v44 = vpop.permute.xlu1 %80 }
 0x551   :  { %v83_v33 = vadd.f32 %v81_v44, %v9897_v28  ;;  %v5629_v44 = vld [vmem:[%s10423_s13 + $0x1] ss:$0 sm:$0xff] }
 0x556   :  { %v3668_v48 = vpop.f32.mrf.mxu1 }
 0x557   :  { %v3669_v38 = vadd.f32 %v3668_v48, %v3628_v42  ;;  %v3709_v5 = vpop.f32.mrf.mxu0  ;;  %v6159_v42 = vld [vmem:[%s10418_s10 + $0x20] sm:$0xff]  }
 0x558   :  { %v3670_v35 = vpop.f32.mrf.mxu1 }
 0x559   :  { %v3710_v18 = vadd.f32 %v3709_v5, %v3669_v38  ;;  %v3671_v45 = vadd.f32 %v3670_v35, %v3630_v15  ;;  %v3711_v41 = vpop.f32.mrf.mxu0  ;;  %v6163_v15 = vld [vmem:[%s10418_s10 + $0x10] sm:$0xff]  }
 0x55a   :  { %v3672_v36 = vpop.f32.mrf.mxu1  ;;  %v6225_v39 = vpop.eup %6224 }
 0x55b   :  { %v3712_v62 = vadd.f32 %v3711_v41, %v3671_v45  ;;  %v3713_v2 = vpop.f32.mrf.mxu0  ;;  %v6227_v56 = vpop.eup %6226 }
 0x55c   :  { %v3673_v52 = vpop.f32.mrf.mxu1  ;;  %v10172_v19 = vmul.f32 0.6931472, %v6227_v56  ;;  %v6168_v2 = vld [vmem:[%s10419_s11 + $0x8] sm:$0xff]   ;;  %v5631_v56 = vld [vmem:[%s10423_s13 + $0x3] ss:$0 sm:$0xff] }
 0x55d   :  { %v3714_v59 = vpop.f32.mrf.mxu0  ;;  %v4239_v52 = vld [vmem:[%s10420_s1] sm:$0xff]  ;;  %5714 = vmatpush3.bf16.msra.mxu0 %v6168_v2  ;;  %v6202_v2 = vld [vmem:[%s10422_s15 + $0x14] ss:$8 sps:$4 sm:$0xff]  }
 0x55e   :  { %v4240_v59 = vpack.c.bf16 %v4239_v52, %v4239_v52  ;;  %5715 = vmatprep.subr.bf16.mxu0 %v6360_v16 }
 0x561   :  { %5716 = vmatpush3.bf16.msra.mxu0 %v6169_v8  ;;  %v6205_v8 = vld [vmem:[%s10422_s15 + $0x4] ss:$8 sps:$4 sm:$0xff]  }
 0x562   :  { %4589 = vmatprep.subr.bf16.mxu0 %v6172_v47  ;;  %v6203_v47 = vld [vmem:[%s10422_s15] ss:$8 sps:$4 sm:$0xff]  }
 0x566   :  { %v3794_v53 = vpop.f32.mrf.mxu1 }
 0x568   :  { %v3796_v22 = vpop.f32.mrf.mxu1 }
 0x56a   :  { %v3798_v46 = vpop.f32.mrf.mxu1 }
 0x56b   :  { %v6190_v46 = vld [vmem:[%s10422_s15 + $0x54] ss:$8 sps:$4 sm:$0xff]  }
 0x56c   :  { %v3799_v40 = vpop.f32.mrf.mxu1 }
 0x56d   :  { %v6188_v40 = vld [vmem:[%s10422_s15 + $0x50] ss:$8 sps:$4 sm:$0xff]  }
 0x586   :  { %v93_v23 = vpop.permute.xlu0 %92 }
 0x587   :  { %v10163_v61 = vadd.f32 %v93_v23, %v9904_v31 }
 0x589   :  { %v96_v55 = vsub.f32 %v10163_v61, %v83_v33 }
 0x58b   :  { %v10168_v50 = vmul.f32 %v6225_v39, %v96_v55  ;;  %v5610_v39 = vld [vmem:[%s10424_s9] ss:$0 sm:$0xff] }
 0x58d   :  { %4472 = vperm.xlu0 %5762, %v10168_v50   ;;  %4462 = vperm.xlu1 %5761, %v10168_v50  }
 0x591   :  { %4996 = vrot.lane.b32.xlu0 %v10097_v30, %s6358_s8 }
 0x592   :  { %5766 = vset.pattern.permute.xlu0 %v6362_v57 }
 0x597   :  { %v3753_v1 = vpop.f32.mrf.mxu0 }
 0x598   :  { %v3795_v37 = vadd.f32 %v3794_v53, %v3753_v1  ;;  %v6184_v53 = vld [vmem:[%s10422_s15 + $0x74] ss:$8 sps:$4 sm:$0xff]   ;;  %v6199_v1 = vld [vmem:[%s10422_s15 + $0x24] ss:$8 sps:$4 sm:$0xff]  }
 0x599   :  { %v3755_v25 = vpop.f32.mrf.mxu0 }
 0x59a   :  { %v3801_v20 = vadd.f32 %v3795_v37, %v3710_v18  ;;  %v3797_v27 = vadd.f32 %v3796_v22, %v3755_v25  ;;  %v6187_v22 = vld [vmem:[%s10422_s15 + $0x64] ss:$8 sps:$4 sm:$0xff]   ;;  %v5628_v25 = vld [vmem:[%s10423_s13] ss:$0 sm:$0xff] }
 0x59b   :  { %v3757_v9 = vpop.f32.mrf.mxu0 }
 0x59c   :  { %v3803_v26 = vadd.f32 %v3801_v20, %v10054_v3  ;;  %v3802_v12 = vadd.f32 %v3797_v27, %v3712_v62  ;;  %v6154_v3 = vld [vmem:[%s10418_s10 + $0x38] sm:$0xff]   ;;  %v6167_v62 = vld [vmem:[%s10418_s10] sm:$0xff]  }
 0x59d   :  { %v3758_v51 = vpop.f32.mrf.mxu0  ;;  %v5630_v9 = vld [vmem:[%s10423_s13 + $0x2] ss:$0 sm:$0xff] }
 0x59e   :  { %v3804_v32 = vadd.f32 %v3802_v12, %v9992_v10  ;;  %v3805_v28 = vmax.f32 %v3803_v26, 0.0  ;;  %v6361_v10 = vmov 2  }
 0x59f   :  { %5763 = vset.pattern.permute.xlu1 %v6361_v10 }
 0x5a0   :  { %v3806_v17 = vmax.f32 %v3804_v32, 0.0  ;;  %v3807_v54 = vpack.c.bf16 %v3805_v28, %v3805_v28  ;;  %4484 = vperm.xlu1 %5763, %v10172_v19  }
 0x5a2   :  { %v3808_v31 = vpack.c.bf16 %v3806_v17, %v3806_v17 }
 0x5a4   :  { %5609 = vmatprep.mubr.msk.bf16.mxu1 %vm2620_vm1, %v3808_v31  ;;  %5764 = vset.pattern.permute.xlu1 %v6362_v57  ;;  %v6170_v57 = vld [vmem:[%s10421_s16 + $0x30] ss:$8 sps:$4 sm:$0xff]  }
 0x5a5   :  { %4222 = vmatmul.mubr.bf16.vlgmr.msra.gmra.mxu1 %v3807_v54  ;;  %4495 = vperm.xlu1 %5764, %v10172_v19  }
 0x5a6   :  { %5722 = vmatpush3.bf16.msra.mxu1 %v6154_v3  ;;  %5737 = vmatprep.mubr.msk.bf16.mxu1 %vm6363_vm2, %v6360_v16 }
 0x5a7   :  { %5723 = vmatprep.subr.bf16.mxu1 %v6360_v16 }
 0x5a9   :  { %5765 = vset.pattern.permute.xlu1 %v6361_v10 }
 0x5aa   :  { %5724 = vmatpush3.bf16.msra.mxu1 %v6155_v60 }
 0x5ab   :  { %5725 = vmatprep.subr.bf16.mxu1 %v6360_v16 }
 0x5ae   :  { %5726 = vmatpush3.bf16.msra.mxu1 %v6157_v34 }
 0x5af   :  { %5727 = vmatprep.subr.bf16.mxu1 %v6360_v16 }
 0x5b2   :  { %5728 = vmatpush3.bf16.msra.mxu1 %v6159_v42  ;;  %v6175_v42 = vld [vmem:[%s10421_s16 + $0x24] ss:$8 sps:$4 sm:$0xff]  }
 0x5b3   :  { %5729 = vmatprep.subr.bf16.mxu1 %v6360_v16 }
 0x5b6   :  { %5730 = vmatpush3.bf16.msra.mxu1 %v6161_v11 }
 0x5b7   :  { %5731 = vmatprep.subr.bf16.mxu1 %v6360_v16 }
 0x5ba   :  { %5732 = vmatpush3.bf16.msra.mxu1 %v6163_v15  ;;  %v6173_v15 = vld [vmem:[%s10421_s16 + $0x20] ss:$8 sps:$4 sm:$0xff]  }
 0x5bb   :  { %5733 = vmatprep.subr.bf16.mxu1 %v6360_v16 }
 0x5be   :  { %5734 = vmatpush3.bf16.msra.mxu1 %v6165_v49  ;;  %v5632_v49 = vld [vmem:[%s10425_s14] ss:$0 sm:$0xff] }
 0x5bf   :  { %5735 = vmatprep.subr.bf16.mxu1 %v6360_v16 }
 0x5c2   :  { %5736 = vmatpush3.bf16.msra.mxu1 %v6167_v62 }
 0x5c3   :  { %4702 = vmatprep.subr.bf16.mxu1 %v6184_v53  ;;  %v6207_v53 = vld [vmem:[%s10426_s18 + $0x30] sm:$0xff]  }
 0x5c5   :  { %5738 = vmatmul.mubr.bf16.vlgmr.msra.gmra.mxu1 %v4240_v59  ;;  %v6200_v59 = vld [vmem:[%s10422_s15 + $0x10] ss:$8 sps:$4 sm:$0xff]  }
 0x5c6   :  { %4734 = vmatprep.mubr.bf16.mxu1 %v10955_v63  ;;  %4703 = vmatpush1.bf16.msra.mxu1 %v6182_v7  ;;  %v6206_v7 = vld [vmem:[%s10426_s18 + $0x38] sm:$0xff]  }
 0x5c7   :  { %v4108_v4 = vpop.f32.mrf.mxu0  ;;  %4704 = vmatprep.subr.bf16.mxu1 %v6187_v22  ;;  %v6208_v22 = vld [vmem:[%s10426_s18 + $0x28] sm:$0xff]  }
 0x5c9   :  { %v4110_v48 = vpop.f32.mrf.mxu0 }
 0x5ca   :  { %4705 = vmatpush1.bf16.msra.mxu1 %v6185_v24  ;;  %v6209_v24 = vld [vmem:[%s10426_s18 + $0x20] sm:$0xff]  }
 0x5cb   :  { %v4111_v38 = vpop.f32.mrf.mxu0  ;;  %4706 = vmatprep.subr.bf16.mxu1 %v6190_v46  ;;  %v6210_v46 = vld [vmem:[%s10426_s18 + $0x18] sm:$0xff]  }
 0x5cc   :  { %v6176_v38 = vld [vmem:[%s10421_s16 + $0x10] ss:$8 sps:$4 sm:$0xff]  }
 0x5cd   :  { %v4112_v5 = vpop.f32.mrf.mxu0 }
 0x5ce   :  { %4707 = vmatpush1.bf16.msra.mxu1 %v6188_v40  ;;  %v6181_v5 = vld [vmem:[%s10421_s16 + $0x4] ss:$8 sps:$4 sm:$0xff]   ;;  %v6211_v40 = vld [vmem:[%s10426_s18 + $0x10] sm:$0xff]  }
 0x5cf   :  { %4708 = vmatprep.subr.bf16.mxu1 %v6193_v58  ;;  %v6212_v58 = vld [vmem:[%s10426_s18 + $0x8] sm:$0xff]  }
 0x5d2   :  { %4709 = vmatpush1.bf16.msra.mxu1 %v6191_v14  ;;  %v6213_v14 = vld [vmem:[%s10426_s18] sm:$0xff]  }
 0x5d3   :  { %4710 = vmatprep.subr.bf16.mxu1 %v6196_v21  ;;  %v6214_v21 = vld [vmem:[%s10426_s18 + $0x58] sm:$0xff]  }
 0x5d5   :  { %v3993_v35 = vpop.f32.mrf.mxu1 }
 0x5d6   :  { %v4109_v18 = vadd.f32 %v4108_v4, %v3993_v35  ;;  %4711 = vmatpush1.bf16.msra.mxu1 %v6194_v6  ;;  %v6178_v4 = vld [vmem:[%s10421_s16 + $0x14] ss:$8 sps:$4 sm:$0xff]  }
 0x5d7   :  { %v3995_v45 = vpop.f32.mrf.mxu1  ;;  %4712 = vmatprep.subr.bf16.mxu1 %v6199_v1 }
 0x5d9   :  { %v3996_v41 = vpop.f32.mrf.mxu1 }
 0x5da   :  { %4713 = vmatpush1.bf16.msra.mxu1 %v6197_v43  ;;  %v5627_v43 = vld [vmem:[%s10427_s12] ss:$0 sm:$0xff] }
 0x5db   :  { %v3997_v36 = vpop.f32.mrf.mxu1  ;;  %4714 = vmatprep.subr.bf16.mxu1 %v6202_v2 }
 0x5de   :  { %4715 = vmatpush1.bf16.msra.mxu1 %v6200_v59 }
 0x5df   :  { %4716 = vmatprep.subr.bf16.mxu1 %v6205_v8 }
 0x5e2   :  { %4717 = vmatpush1.bf16.msra.mxu1 %v6203_v47 }
 0x5e3   :  { %5741 = vmatprep.subr.bf16.mxu1 %v6360_v16 }
 0x608   :  { %v4463_v37 = vpop.permute.xlu1 %4462  ;;  %v4473_v33 = vpop.permute.xlu0 %4472 }
 0x609   :  { %v4479_v20 = vmul.f32 %v5629_v44, %v4473_v33  ;;  %v4469_v27 = vmul.f32 %v5628_v25, %v4463_v37 }
 0x60b   :  { %v4480_v55 = vadd.f32 %v4479_v20, %v4469_v27 }
 0x61b   :  { %v4485_v23 = vpop.permute.xlu1 %4484 }
 0x61c   :  { %v4491_v51 = vmul.f32 %v5630_v9, %v4485_v23 }
 0x61e   :  { %v4492_v54 = vadd.f32 %v4491_v51, %v4480_v55  ;;  %v6216_v55 = vld [vmem:[%s10426_s18 + $0x48] sm:$0xff]   ;;  %v6217_v51 = vld [vmem:[%s10426_s18 + $0x40] sm:$0xff]  }
 0x620   :  { %v4496_v28 = vpop.permute.xlu1 %4495 }
 0x621   :  { %v4502_v10 = vmul.f32 %v5631_v56, %v4496_v28  ;;  %v6219_v56 = vld [vmem:[%s10428_s20 + $0x10] sm:$0xff]   ;;  %v4743_v28 = vld [vmem:[%s10429_s17] sm:$0x3] }
 0x623   :  { %v4503_v11 = vadd.f32 %v4502_v10, %v4492_v54  ;;  %v4752_v54 = vrot.slane %v4743_v28, %v11591_v29  ;;  %v6221_v29 = vld [vmem:[%s10428_s20] sm:$0xff]  }
 0x625   :  { %v4511_v48 = vadd.f32 %v5632_v49, %v4503_v11 }
 0x627   :  { %v4512_v35 = vmax.f32 %v4511_v48, 0.0 }
 0x629   :  { %v4529_v45 = vpack.c.bf16 %v4512_v35, %v4512_v35 }
 0x665   :  { %v4223_v26 = vpop.f32.mrf.mxu1 }
 0x666   :  { %v4229_v12 = vadd.f32 %v4223_v26, %v4109_v18  ;;  %v6179_v18 = vld [vmem:[%s10421_s16] ss:$8 sps:$4 sm:$0xff]  }
 0x667   :  { %v4225_v32 = vpop.f32.mrf.mxu1 }
 0x668   :  { %v4236_v17 = vadd.f32 %v5610_v39, %v4229_v12  ;;  %v6215_v12 = vld [vmem:[%s10426_s18 + $0x50] sm:$0xff]   ;;  %v6218_v32 = vld [vmem:[%s10428_s20 + $0x18] sm:$0xff]  }
 0x669   :  { %v4226_v31 = vpop.f32.mrf.mxu1 }
 0x66a   :  { %v4237_v3 = vmax.f32 %v4236_v17, 0.0  ;;  %v4748_v17 = vrot.slane %v4743_v28, %v11596_v13  ;;  %v6220_v13 = vld [vmem:[%s10428_s20 + $0x8] sm:$0xff]  }
 0x66b   :  { %v4227_v60 = vpop.f32.mrf.mxu1 }
 0x66c   :  { %v4238_v34 = vpack.c.bf16 %v4237_v3, %v4237_v3 }
 0x66e   :  { %5718 = vmatmul.mubr.bf16.vlgmr.msra.gmra.mxu0 %v4238_v34 }
 0x66f   :  { %4590 = vmatpush1.bf16.msra.mxu0 %v6170_v57  ;;  %4613 = vmatprep.mubr.bf16.mxu0 %v10955_v63 }
 0x670   :  { %4591 = vmatprep.subr.bf16.mxu0 %v6175_v42 }
 0x673   :  { %4592 = vmatpush1.bf16.msra.mxu0 %v6173_v15 }
 0x674   :  { %4593 = vmatprep.subr.bf16.mxu0 %v6178_v4 }
 0x677   :  { %4594 = vmatpush1.bf16.msra.mxu0 %v6176_v38  ;;  %v5658_v38 = vld [vmem:[%s10430_s19] ss:$0 sm:$0xff] }
 0x678   :  { %4595 = vmatprep.subr.bf16.mxu0 %v6181_v5 }
 0x67b   :  { %4596 = vmatpush1.bf16.msra.mxu0 %v6179_v18 }
 0x67c   :  { %4867 = vmatprep.subr.bf16.mxu0 %v10955_v63 }
 0x67e   :  { %5641 = vmatmul.mubr.msk.bf16.vlgmr.msra.gmra.mxu0 %vm2620_vm1, %v4529_v45 }
 0x67f   :  { %4868 = vmatpush1.bf16.msra.mxu0 %v6206_v7 }
 0x680   :  { %4869 = vmatprep.subr.bf16.mxu0 %v10955_v63 }
 0x683   :  { %4870 = vmatpush1.bf16.msra.mxu0 %v6207_v53 }
 0x684   :  { %4871 = vmatprep.subr.bf16.mxu0 %v10955_v63 }
 0x685   :  { %v4443_v41 = vpop.f32.mrf.mxu1 }
 0x687   :  { %v5739_v36 = vpop.f32.mrf.mxu1  ;;  %4872 = vmatpush1.bf16.msra.mxu0 %v6208_v22 }
 0x688   :  { %4873 = vmatprep.subr.bf16.mxu0 %v10955_v63 }
 0x689   :  { %v4446_v62 = vpop.f32.mrf.mxu1 }
 0x68b   :  { %v5740_v52 = vpop.f32.mrf.mxu1  ;;  %4874 = vmatpush1.bf16.msra.mxu0 %v6209_v24 }
 0x68c   :  { %4875 = vmatprep.subr.bf16.mxu0 %v10955_v63 }
 0x68f   :  { %4876 = vmatpush1.bf16.msra.mxu0 %v6210_v46  ;;  %v4997_v46 = vpop.permute.xlu0 %4996 }
 0x690   :  { %4877 = vmatprep.subr.bf16.mxu0 %v10955_v63 }
 0x693   :  { %4878 = vmatpush1.bf16.msra.mxu0 %v6211_v40 }
 0x694   :  { %4879 = vmatprep.subr.bf16.mxu0 %v10955_v63 }
 0x697   :  { %4880 = vmatpush1.bf16.msra.mxu0 %v6212_v58 }
 0x698   :  { %4881 = vmatprep.subr.bf16.mxu0 %v10955_v63 }
 0x69b   :  { %4882 = vmatpush1.bf16.msra.mxu0 %v6213_v14 }
 0x69c   :  { %4891 = vmatprep.subr.bf16.mxu0 %v10955_v63 }
 0x69f   :  { %4892 = vmatpush2.bf16.msra.mxu0 %v6214_v21  ;;  %v11597_v21 = vlaneseq }
 0x6a0   :  { %4893 = vmatprep.subr.bf16.mxu0 %v10955_v63 }
 0x6a3   :  { %4894 = vmatpush2.bf16.msra.mxu0 %v6215_v12 }
 0x6a4   :  { %4895 = vmatprep.subr.bf16.mxu0 %v10955_v63 }
 0x6a7   :  { %4896 = vmatpush2.bf16.msra.mxu0 %v6216_v55 }
 0x6a8   :  { %4897 = vmatprep.subr.bf16.mxu0 %v10955_v63 }
 0x6ab   :  { %4898 = vmatpush2.bf16.msra.mxu0 %v6217_v51 }
 0x72e   :  { %v4355_v6 = vpop.f32.mrf.mxu0 }
 0x72f   :  { %v4444_v1 = vadd.f32 %v4443_v41, %v4355_v6 }
 0x730   :  { %v5719_v37 = vpop.f32.mrf.mxu0 }
 0x731   :  { %v4456_v44 = vadd.f32 %v5627_v43, %v4444_v1 }
 0x732   :  { %v4358_v25 = vpop.f32.mrf.mxu0 }
 0x733   :  { %v4457_v33 = vmax.f32 %v4456_v44, 0.0 }
 0x734   :  { %v5720_v23 = vpop.f32.mrf.mxu0 }
 0x735   :  { %v4458_v20 = vpack.c.bf16 %v4457_v33, %v4457_v33 }
 0x737   :  { %4735 = vmatmul.mubr.bf16.vlgmr.msra.gmra.mxu1 %v4458_v20 }
 0x738   :  { %5749 = vmatprep.mubr.msk.bf16.mxu1 %vm6363_vm2, %v6360_v16  ;;  %5742 = vmatpush3.bf16.msra.mxu1 %v6218_v32 }
 0x739   :  { %5743 = vmatprep.subr.bf16.mxu1 %v6360_v16 }
 0x73c   :  { %5744 = vmatpush3.bf16.msra.mxu1 %v6219_v56 }
 0x73d   :  { %5745 = vmatprep.subr.bf16.mxu1 %v6360_v16 }
 0x73e   :  { %v4615_v27 = vpop.f32.mrf.mxu0 }
 0x740   :  { %v4617_v9 = vpop.f32.mrf.mxu0  ;;  %5746 = vmatpush3.bf16.msra.mxu1 %v6220_v13 }
 0x741   :  { %5747 = vmatprep.subr.bf16.mxu1 %v6360_v16  ;;  %v5672_v16 = vld [vmem:[%s10431_s21] ss:$0 sm:$0xff] }
 0x742   :  { %v4619_v39 = vpop.f32.mrf.mxu0 }
 0x744   :  { %v4620_v26 = vpop.f32.mrf.mxu0  ;;  %5748 = vmatpush3.bf16.msra.mxu1 %v6221_v29 }
 0x7f7   :  { %v4736_v31 = vpop.f32.mrf.mxu1 }
 0x7f8   :  { %v4737_v3 = vadd.f32 %v4736_v31, %v4615_v27 }
 0x7f9   :  { %v4738_v10 = vpop.f32.mrf.mxu1 }
 0x7fa   :  { %v4755_v60 = vadd.f32 %v4748_v17, %v4737_v3  ;;  %v4739_v57 = vadd.f32 %v4738_v10, %v4617_v9 }
 0x7fb   :  { %v4740_v34 = vpop.f32.mrf.mxu1 }
 0x7fc   :  { %v4756_v42 = vadd.f32 %v4752_v54, %v4739_v57  ;;  %v4757_v11 = vmax.f32 %v4755_v60, 0.0 }
 0x7fd   :  { %v4741_v15 = vpop.f32.mrf.mxu1 }
 0x7fe   :  { %v4758_v49 = vmax.f32 %v4756_v42, 0.0  ;;  %v4759_v48 = vpack.c.bf16 %v4757_v11, %v4757_v11 }
 0x800   :  { %v4760_v4 = vpack.c.bf16 %v4758_v49, %v4758_v49 }
 0x802   :  { %5671 = vmatprep.mubr.msk.bf16.mxu0 %vm2620_vm1, %v4760_v4 }
 0x803   :  { %4900 = vmatmul.mubr.bf16.vlgmr.msra.gmra.mxu0 %v4759_v48 }
 0x8c3   :  { %v4901_v5 = vpop.f32.mrf.mxu0 }
 0x8c4   :  { %v4902_v35 = vadd.f32 %v5658_v38, %v4901_v5 }
 0x8c5   :  { %v4903_v18 = vpop.f32.mrf.mxu0 }
 0x8c6   :  { %v4907_v45 = vmax.f32 %v4902_v35, 0.0 }
 0x8c7   :  { %v4904_v41 = vpop.f32.mrf.mxu0 }
 0x8c8   :  { %v4908_v36 = vpack.c.bf16 %v4907_v45, %v4907_v45 }
 0x8c9   :  { %v4905_v62 = vpop.f32.mrf.mxu0 }
 0x8ca   :  { %5750 = vmatmul.mubr.msk.bf16.vlgmr.msra.gmra.mxu1 %vm2620_vm1, %v4908_v36 }
 0x98a   :  { %v4985_v2 = vpop.f32.mrf.mxu1 }
 0x98b   :  { %v4986_v52 = vadd.f32 %v5672_v16, %v4985_v2 }
 0x98c   :  { %v5751_v59 = vpop.f32.mrf.mxu1 }
 0x98d   :  { %v4992_v8 = vadd.f32 %v4986_v52, %v10172_v19  ;;  %v4991_v22 = vadd.f32 %v4986_v52, %v10168_v50  ;;  %v4994_v50 = vand.u32 127, %v11597_v21 }
 0x98e   :  { %v4988_v47 = vpop.f32.mrf.mxu1 }
 0x98f   :  { %v5001_v7 = vmul.f32 1.442695, %v4992_v8  ;;  %v4999_v58 = vmul.f32 %v4997_v46, %v4991_v22  ;;  %vm5006_vm3 = vcmp.eq.s32.totalorder %v4994_v50, 2  ;;  %vm5005_vm4 = vcmp.eq.s32.totalorder %v4994_v50, 1 }
 0x990   :  { %v5752_v53 = vpop.f32.mrf.mxu1  ;;  %vm5004_vm5 = vcmp.eq.s32.totalorder %v4994_v50, 0 }
 0x991   :  { %6228 = vpow2.f32 %v5001_v7  ;;  %v5000_v14 = vadd.f32 %v4999_v58, %v10163_v61 }
 0x99e   :  { %v6229_v24 = vpop.eup %6228 }
 0x99f   :  { %v5003_v40 = vmul.f32 %v6229_v24, %v10097_v30 }
 0x9a1   :  { %5013 = vperm.xlu0 %5766, %v5003_v40   ;;  %5009 = vperm.xlu1 %5765, %v5003_v40  }
 0x9a5   :  { %5767 = vset.pattern.permute.xlu1 %v6359_v0  ;;  %5769 = vset.pattern.permute.xlu0 %v10955_v63 }
 0x9a6   :  { %5019 = vperm.xlu1 %5767, %v5000_v14  }
 0x9aa   :  { %5768 = vset.pattern.permute.xlu1 %v10955_v63 }
 0x9ab   :  { %5024 = vperm.xlu1 %5768, %v5000_v14  }
 0xa1c   :  { %v5010_v19 = vpop.permute.xlu1 %5009  ;;  %v5014_v43 = vpop.permute.xlu0 %5013 }
 0xa1d   :  { %v5016_v30 = vsel %vm5006_vm3, %v5010_v19, %v5014_v43 }
 0xa21   :  { %v5020_v6 = vpop.permute.xlu1 %5019 }
 0xa22   :  { %v5022_v1 = vsel %vm5005_vm4, %v5020_v6, %v5016_v30 }
 0xa26   :  { %v5025_v61 = vpop.permute.xlu1 %5024 }
 0xa27   :  { %v5027_v37 = vsel %vm5004_vm5, %v5025_v61, %v5022_v1 }
 0xa28   :  { %5029 = vst.msk [vmem:[%s10432_s22] sm:$0xff] %vm5028_vm6, %v5027_v37 }

</bundles_post_ra>
